<compile_context>
chip_gen: v5e
topology: v5e:2x2
jax: 0.10.0
libtpu: 0.0.40
codegen_flags: <defaults>
</compile_context>

<pallas_src>
import functools

import numpy as np

import jax
import jax.numpy as jnp
from jax.experimental import pallas as pl
from jax.experimental.pallas import tpu as pltpu


# ----------------------------------------------------------------------------
# In-kernel helpers
# ----------------------------------------------------------------------------
def _shift_right(x, s, size):
    """out[..., i] = x[..., (i - s) mod size]  (elements move toward higher lanes)."""
    s = s % size
    if s == 0:
        return x
    return pltpu.roll(x, shift=s, axis=1)


def _upsample2x(xb, upmask_ref, up_shifts, n_hi):
    """Nearest-2x upsample of one image: (Cin, H*W) -> (Cin, 4*H*W).

    The low-res data sits in the first H*W lanes of a 4*H*W lane buffer and is
    routed to its destination lanes by a precomputed sequence of conditional
    right-rolls (roll + select with wrapper-built masks)."""
    cin, hw = xb.shape
    buf = jnp.concatenate(
        [xb, jnp.zeros((cin, n_hi - hw), xb.dtype)], axis=1)          # (Cin, N)
    for k, s in enumerate(up_shifts):
        rolled = _shift_right(buf, s, n_hi)
        buf = jnp.where(upmask_ref[k:k + 1, :] != 0, rolled, buf)
    return buf


def _conv3x3_bn_relu(feat, w_ref, scale_ref, bias_ref, mask_ref, Wu, L,
                     use_concat):
    """feat: (Cin, L) f32 with L = Bt*N batch-stacked lanes.

    Returns ReLU(scale * conv3x3(feat) + bias): (Cout, L) f32.
    "same" zero padding, roll wrap-around and cross-image bleed (batch-stacked
    lanes) are all cancelled by the multiplicative border masks."""
    cin = feat.shape[0]
    taps = []
    for tap in range(9):
        dy, dx = tap // 3 - 1, tap % 3 - 1
        s = dy * Wu + dx                       # flat-lane offset of this tap
        rolled = _shift_right(feat, -s, L)     # rolled[q] = feat[q + s]
        if not (dy == 0 and dx == 0):
            rolled = rolled * mask_ref[tap:tap + 1, :]
        taps.append(rolled)
    w = w_ref[...]                                            # (Cout, 9*Cin) bf16
    if use_concat:
        # small-Cin path: one im2col matmul.
        patches = jnp.concatenate(taps, axis=0).astype(jnp.bfloat16)  # (9Cin, L)
        y = jnp.dot(w, patches, preferred_element_type=jnp.float32)
    else:
        # large-Cin path: 9 accumulating matmuls, no 9x patches slab in VMEM.
        y = jnp.zeros((w.shape[0], L), jnp.float32)
        for tap in range(9):
            y = y + jnp.dot(w[:, tap * cin:(tap + 1) * cin],
                            taps[tap].astype(jnp.bfloat16),
                            preferred_element_type=jnp.float32)
    y = y * scale_ref[...] + bias_ref[...]        # folded eval-mode BN + bias
    return jnp.maximum(y, 0.0)                    # ReLU


def _up_fused_kernel(n_layer0, Bt, HW, N, Wu, up_shifts, use_concat,
                     x_ref, skip_ref, upmask_ref, convmask_ref, *rest):
    """Bt batch elements of the full Up block, fully resident in VMEM.

    x_ref:        (Bt, Cin, H*W)   low-res input
    skip_ref:     (Bt, Cin, N)     skip connection at upsampled resolution
    upmask_ref:   (n_steps, N)     masks for the roll/select upsample network
    convmask_ref: (9, Bt*N)        per-tap border masks (f32 0/1)
    rest:         3*(n_layer0+1) param refs [w2d, scale, bias]..., then out_ref
    out_ref:      (Bt, Cout, N)    lane-dense output
    """
    out_ref = rest[-1]
    prm = rest[:-1]
    L = Bt * N

    # Nearest-2x upsample per image, then lane-concatenate the Bt images so all
    # conv matmuls below see a Bt*N-wide free dimension.
    ups = [_upsample2x(x_ref[b], upmask_ref, up_shifts, N) for b in range(Bt)]
    feat = ups[0] if Bt == 1 else jnp.concatenate(ups, axis=1)       # (Cin, L)

    # layer0 conv blocks (repeat-1 of them), Cin -> Cin.
    for i in range(n_layer0):
        feat = _conv3x3_bn_relu(feat, prm[3 * i], prm[3 * i + 1], prm[3 * i + 2],
                                convmask_ref, Wu, L, use_concat)

    # skip connection add.
    if Bt == 1:
        skip = skip_ref[0]
    else:
        skip = jnp.concatenate([skip_ref[b] for b in range(Bt)], axis=1)
    feat = feat + skip

    # layer1 conv block, Cin -> Cout.
    j = 3 * n_layer0
    out = _conv3x3_bn_relu(feat, prm[j], prm[j + 1], prm[j + 2],
                           convmask_ref, Wu, L, use_concat)

    # lane-dense write-back, one image at a time (aligned static slices).
    for b in range(Bt):
        out_ref[b] = out[:, b * N:(b + 1) * N].astype(out_ref.dtype)


# ----------------------------------------------------------------------------
# Wrapper-side plan / constant construction
# ----------------------------------------------------------------------------
def _pick_bt(batch, max_bt=8):
    """Largest divisor of `batch` (<= max_bt) that still leaves >= 2 grid steps
    (so both v7x TensorCores get work)."""
    best = 1
    for d in range(1, batch + 1):
        if batch % d == 0 and d <= max_bt and batch // d >= 2:
            best = d
    return best


def _plan_upsample(H, W):
    """Plan the in-kernel nearest-2x upsample as conditional right-rolls.

    Source element p = y*W + x (in the first H*W lanes of a 4*H*W buffer) is
    routed to its anchor lane (2y)*(2W) + 2x with an MSB-first sequence of
    roll(+2^k) + select steps (displacements are monotone -> collision free),
    then two final steps duplicate the anchors to odd columns / odd rows.
    Returns (shifts tuple[int], masks np.ndarray (n_steps, 4*H*W) f32)."""
    Wu = 2 * W
    HW, N = H * W, 4 * H * W
    p = np.arange(HW)
    y, x = p // W, p % W
    anchor = (2 * y) * Wu + 2 * x
    disp = anchor - p                       # = 3*W*y + x, strictly increasing
    shifts, masks = [], []
    pos = p.copy()
    for k in reversed(range(int(disp.max()).bit_length())):
        step = 1 << k
        move = (disp >> k) & 1
        new_pos = pos + move * step
        assert len(np.unique(new_pos)) == HW        # routing is collision-free
        if move.any():
            m = np.zeros(N, np.float32)
            m[new_pos[move == 1]] = 1.0
            shifts.append(step)
            masks.append(m)
        pos = new_pos
    assert np.array_equal(pos, anchor)
    q = np.arange(N)
    qy, qx = q // Wu, q % Wu
    shifts.append(1)                                # odd columns <- left lane
    masks.append((qx % 2 == 1).astype(np.float32))
    shifts.append(Wu)                               # odd rows    <- row above
    masks.append((qy % 2 == 1).astype(np.float32))
    return tuple(shifts), np.stack(masks, 0)


def _conv_masks(Hu, Wu, Bt):
    """Per-tap 'same'-padding border masks, tiled for Bt batch-stacked images."""
    N = Hu * Wu
    q = np.arange(N)
    yy, xx = q // Wu, q % Wu
    rows = []
    for tap in range(9):
        dy, dx = tap // 3 - 1, tap % 3 - 1
        ok = (yy + dy >= 0) & (yy + dy < Hu) & (xx + dx >= 0) & (xx + dx < Wu)
        rows.append(ok.astype(np.float32))
    return np.tile(np.stack(rows, 0), (1, Bt))      # (9, Bt*N)


def _fold_conv_bn(w_oihw, conv_bias, gamma, beta, mean, var, eps=1e-5):
    """Fold eval-mode BN + conv bias.  Weights become a bf16 (Cout, 9*Cin)
    matrix whose column index is tap*Cin + cin (tap = ky*3 + kx), matching the
    im2col patch ordering in the kernel."""
    cout, cin = w_oihw.shape[0], w_oihw.shape[1]
    scale = gamma / jnp.sqrt(var + eps)                       # (Cout,)
    bias = beta + (conv_bias - mean) * scale                  # (Cout,)
    w2d = jnp.transpose(w_oihw, (0, 2, 3, 1)).reshape(cout, 9 * cin)
    return (w2d.astype(jnp.bfloat16),
            scale.reshape(cout, 1).astype(jnp.float32),
            bias.reshape(cout, 1).astype(jnp.float32))


def up_forward(x_nchw, skip_nchw, params):
    """Forward of `Up`. x: (B,Cin,H,W), _x: (B,Cin,2H,2W), NCHW; returns NCHW."""
    B, Cin, H, W = x_nchw.shape
    Hu, Wu = 2 * H, 2 * W
    HW, N = H * W, Hu * Wu
    Cout = params["layer1"][0].shape[0]
    n_layer0 = len(params["layer0"])
    Bt = _pick_bt(B)
    L = Bt * N
    use_concat = Cin < 32     # small Cin: one im2col matmul; else 9 acc. matmuls

    # Free reshapes only -- no pad / astype / upsample copies in HBM.
    x_flat = x_nchw.reshape(B, Cin, HW)
    skip_flat = skip_nchw.reshape(B, Cin, N)

    up_shifts, up_masks_np = _plan_upsample(H, W)
    up_masks = jnp.asarray(up_masks_np)                       # (n_steps, N)
    conv_masks = jnp.asarray(_conv_masks(Hu, Wu, Bt))         # (9, Bt*N)

    flat_params, param_shapes = [], []
    blocks = list(params["layer0"]) + [params["layer1"]]
    for blk in blocks:
        w2d, sc, bi = _fold_conv_bn(*blk)
        flat_params += [w2d, sc, bi]
        param_shapes += [w2d.shape, sc.shape, bi.shape]

    # Cost estimate: conv MACs * 2 plus the main HBM streams.
    flops = 0
    for blk in blocks:
        co, ci = blk[0].shape[0], blk[0].shape[1]
        flops += 2 * co * 9 * ci * B * N
    wgt_bytes = sum(int(p.size) * p.dtype.itemsize for p in flat_params)
    msk_bytes = int(up_masks.size + conv_masks.size) * 4
    bytes_accessed = (int(x_flat.size) * x_flat.dtype.itemsize
                      + int(skip_flat.size) * skip_flat.dtype.itemsize
                      + B * Cout * N * 4 + wgt_bytes + msk_bytes)
    cost = pl.CostEstimate(flops=int(flops), transcendentals=0,
                           bytes_accessed=int(bytes_accessed))

    # Rough per-step VMEM budget (blocks + weights + activation slabs) with
    # headroom for double buffering of the batch-indexed streams.
    act_bytes = 3 * Cin * L * 4 + 9 * Cin * L * 2 + max(Cin, Cout) * L * 4
    blk_bytes = (Bt * Cin * HW + Bt * Cin * N + Bt * Cout * N) * 4
    vmem_limit = int(min(max(4 * (act_bytes + blk_bytes)
                             + 2 * (wgt_bytes + msk_bytes), 16 * 2 ** 20),
                         48 * 2 ** 20))

    def build_and_call(single_buffer_consts):
        def const_spec(shape):
            imap = lambda g, _n=len(shape): (0,) * _n
            if single_buffer_consts:
                return pl.BlockSpec(shape, imap,
                                    pipeline_mode=pl.Buffered(buffer_count=1))
            return pl.BlockSpec(shape, imap)

        in_specs = [
            pl.BlockSpec((Bt, Cin, HW), lambda g: (g, 0, 0)),
            pl.BlockSpec((Bt, Cin, N), lambda g: (g, 0, 0)),
            const_spec(up_masks.shape),
            const_spec(conv_masks.shape),
        ] + [const_spec(s) for s in param_shapes]

        kernel = functools.partial(_up_fused_kernel, n_layer0, Bt, HW, N, Wu,
                                   up_shifts, use_concat)
        return pl.pallas_call(
            kernel,
            out_shape=jax.ShapeDtypeStruct((B, Cout, N), jnp.float32),
            grid=(B // Bt,),
            in_specs=in_specs,
            out_specs=pl.BlockSpec((Bt, Cout, N), lambda g: (g, 0, 0)),
            compiler_params=pltpu.CompilerParams(
                dimension_semantics=("parallel",),
                vmem_limit_bytes=vmem_limit),
            cost_estimate=cost,
        )(x_flat, skip_flat, up_masks, conv_masks, *flat_params)

    try:
        out_flat = build_and_call(True)
    except Exception:   # pl.Buffered(1) not supported on this jax version
        out_flat = build_and_call(False)

    return out_flat.reshape(B, Cout, Hu, Wu)


# ----------------------------------------------------------------------------
# Pure-JAX reference (for self-check)
# ----------------------------------------------------------------------------
def upsample2x_nearest_ref(x_nhwc):
    B, H, W, C = x_nhwc.shape
    y = jnp.broadcast_to(x_nhwc[:, :, None, :, None, :], (B, H, 2, W, 2, C))
    return y.reshape(B, 2 * H, 2 * W, C)


def conv3x3_bn_relu_ref(x_nhwc, w_oihw, conv_bias, gamma, beta, mean, var,
                        eps=1e-5):
    w_hwio = jnp.transpose(w_oihw, (2, 3, 1, 0))
    y = jax.lax.conv_general_dilated(
        x_nhwc, w_hwio, window_strides=(1, 1), padding="SAME",
        dimension_numbers=("NHWC", "HWIO", "NHWC"))
    y = y + conv_bias
    y = (y - mean) / jnp.sqrt(var + eps) * gamma + beta
    return jnp.maximum(y, 0.0)


def up_forward_ref(x_nchw, skip_nchw, params):
    x = jnp.transpose(x_nchw, (0, 2, 3, 1)).astype(jnp.float32)
    skip = jnp.transpose(skip_nchw, (0, 2, 3, 1)).astype(jnp.float32)
    x = upsample2x_nearest_ref(x)
    for blk in params["layer0"]:
        x = conv3x3_bn_relu_ref(x, *blk)
    x = x + skip
    x = conv3x3_bn_relu_ref(x, *params["layer1"])
    return jnp.transpose(x, (0, 3, 1, 2))


# ----------------------------------------------------------------------------
# Deterministic parameter construction
# ----------------------------------------------------------------------------
def make_conv_bn_params(key, cin, cout):
    k = jax.random.split(key, 6)
    w = 0.1 * jax.random.normal(k[0], (cout, cin, 3, 3), jnp.float32)   # OIHW
    b = 0.05 * jax.random.normal(k[1], (cout,), jnp.float32)
    gamma = 1.0 + 0.1 * jax.random.normal(k[2], (cout,), jnp.float32)
    beta = 0.1 * jax.random.normal(k[3], (cout,), jnp.float32)
    mean = 0.05 * jax.random.normal(k[4], (cout,), jnp.float32)
    var = 1.0 + 0.1 * jax.random.uniform(k[5], (cout,), jnp.float32)
    return (w, b, gamma, beta, mean, var)


if __name__ == "__main__":
    # Up(in_channels=4, out_channels=8, repeat=2); x: (4,4,8,8), _x: (4,4,16,16)
    B, Cin, Cout, H, W = 4, 4, 8, 8, 8
    key = jax.random.PRNGKey(0)
    kx, ks, k0, k1 = jax.random.split(key, 4)

    x = jax.random.normal(kx, (B, Cin, H, W), jnp.float32)          # NCHW
    skip = jax.random.normal(ks, (B, Cin, 2 * H, 2 * W), jnp.float32)

    # TODO(synk): BatchNorm is eval-mode (running stats); training-mode batch
    # statistics are not implemented.
    params = {
        "layer0": [make_conv_bn_params(k0, Cin, Cin)],   # repeat=2 -> one block
        "layer1": make_conv_bn_params(k1, Cin, Cout),
    }

    out = jax.block_until_ready(up_forward(x, skip, params))
    ref = up_forward_ref(x, skip, params)

    assert out.shape == (B, Cout, 2 * H, 2 * W), out.shape
    err = float(jnp.max(jnp.abs(out - ref)))
    # bf16 matmul inputs, f32 accumulation -> loosened tolerance.
    assert jnp.allclose(out, ref, atol=3e-2, rtol=3e-2), err
    print("KERNEL_OK")
</pallas_src>

<mosaic_0001>
module attributes {stable_mosaic.version = 11 : i64} {
  func.func @_up_fused_kernel(%arg0: i32, %arg1: memref<2x4x64xf32, #tpu.memory_space<vmem>>, %arg2: memref<2x4x256xf32, #tpu.memory_space<vmem>>, %arg3: memref<10x256xf32, #tpu.memory_space<vmem>>, %arg4: memref<9x512xf32, #tpu.memory_space<vmem>>, %arg5: memref<4x36xbf16, #tpu.memory_space<vmem>>, %arg6: memref<4x1xf32, #tpu.memory_space<vmem>>, %arg7: memref<4x1xf32, #tpu.memory_space<vmem>>, %arg8: memref<8x36xbf16, #tpu.memory_space<vmem>>, %arg9: memref<8x1xf32, #tpu.memory_space<vmem>>, %arg10: memref<8x1xf32, #tpu.memory_space<vmem>>, %arg11: memref<2x8x256xf32, #tpu.memory_space<vmem>>) attributes {dimension_semantics = [#tpu.dimension_semantics<parallel>], iteration_bounds = array<i64: 2>, scalar_prefetch = 0 : i64, scratch_operands = 0 : i64, tpu.core_type = #tpu.core_type<tc>, window_params = [{transform_indices = @transform_0, window_bounds = array<i64: 2, 4, 64>}, {transform_indices = @transform_1, window_bounds = array<i64: 2, 4, 256>}, {pipeline_mode = #tpu.pipeline_mode<synchronous>, transform_indices = @transform_2, window_bounds = array<i64: 10, 256>}, {pipeline_mode = #tpu.pipeline_mode<synchronous>, transform_indices = @transform_3, window_bounds = array<i64: 9, 512>}, {pipeline_mode = #tpu.pipeline_mode<synchronous>, transform_indices = @transform_4, window_bounds = array<i64: 4, 36>}, {pipeline_mode = #tpu.pipeline_mode<synchronous>, transform_indices = @transform_5, window_bounds = array<i64: 4, 1>}, {pipeline_mode = #tpu.pipeline_mode<synchronous>, transform_indices = @transform_6, window_bounds = array<i64: 4, 1>}, {pipeline_mode = #tpu.pipeline_mode<synchronous>, transform_indices = @transform_7, window_bounds = array<i64: 8, 36>}, {pipeline_mode = #tpu.pipeline_mode<synchronous>, transform_indices = @transform_8, window_bounds = array<i64: 8, 1>}, {pipeline_mode = #tpu.pipeline_mode<synchronous>, transform_indices = @transform_9, window_bounds = array<i64: 8, 1>}, {transform_indices = @transform_10, window_bounds = array<i64: 2, 8, 256>}]} {
    %c0 = arith.constant 0 : index
    %c0_0 = arith.constant 0 : index
    %c0_1 = arith.constant 0 : index
    %0 = vector.load %arg1[%c0, %c0_0, %c0_1] : memref<2x4x64xf32, #tpu.memory_space<vmem>>, vector<1x4x64xf32>
    %1 = vector.shape_cast %0 : vector<1x4x64xf32> to vector<4x64xf32>
    %cst = arith.constant 0.000000e+00 : f32
    %2 = vector.broadcast %cst : f32 to vector<4x192xf32>
    %3 = tpu.concatenate %1, %2 in 1 : vector<4x64xf32>, vector<4x192xf32> -> vector<4x256xf32>
    %c128_i32 = arith.constant 128 : i32
    %4 = tpu.dynamic_rotate %3 by %c128_i32 dim 1 : vector<4x256xf32>, i32 -> vector<4x256xf32>
    %c0_2 = arith.constant 0 : index
    %c0_3 = arith.constant 0 : index
    %5 = vector.load %arg3[%c0_2, %c0_3] : memref<10x256xf32, #tpu.memory_space<vmem>>, vector<1x256xf32>
    %cst_4 = arith.constant 0.000000e+00 : f32
    %6 = vector.broadcast %cst_4 : f32 to vector<1x256xf32>
    %7 = arith.cmpf one, %5, %6 : vector<1x256xf32>
    %8 = vector.shape_cast %7 : vector<1x256xi1> to vector<1x256xi1>
    %9 = vector.broadcast %8 : vector<1x256xi1> to vector<4x256xi1>
    %10 = arith.select %9, %4, %3 : vector<4x256xi1>, vector<4x256xf32>
    %c64_i32 = arith.constant 64 : i32
    %11 = tpu.dynamic_rotate %10 by %c64_i32 dim 1 : vector<4x256xf32>, i32 -> vector<4x256xf32>
    %c1 = arith.constant 1 : index
    %c0_5 = arith.constant 0 : index
    %12 = vector.load %arg3[%c1, %c0_5] : memref<10x256xf32, #tpu.memory_space<vmem>>, vector<1x256xf32>
    %cst_6 = arith.constant 0.000000e+00 : f32
    %13 = vector.broadcast %cst_6 : f32 to vector<1x256xf32>
    %14 = arith.cmpf one, %12, %13 : vector<1x256xf32>
    %15 = vector.shape_cast %14 : vector<1x256xi1> to vector<1x256xi1>
    %16 = vector.broadcast %15 : vector<1x256xi1> to vector<4x256xi1>
    %17 = arith.select %16, %11, %10 : vector<4x256xi1>, vector<4x256xf32>
    %c32_i32 = arith.constant 32 : i32
    %18 = tpu.dynamic_rotate %17 by %c32_i32 dim 1 : vector<4x256xf32>, i32 -> vector<4x256xf32>
    %c2 = arith.constant 2 : index
    %c0_7 = arith.constant 0 : index
    %19 = vector.load %arg3[%c2, %c0_7] : memref<10x256xf32, #tpu.memory_space<vmem>>, vector<1x256xf32>
    %cst_8 = arith.constant 0.000000e+00 : f32
    %20 = vector.broadcast %cst_8 : f32 to vector<1x256xf32>
    %21 = arith.cmpf one, %19, %20 : vector<1x256xf32>
    %22 = vector.shape_cast %21 : vector<1x256xi1> to vector<1x256xi1>
    %23 = vector.broadcast %22 : vector<1x256xi1> to vector<4x256xi1>
    %24 = arith.select %23, %18, %17 : vector<4x256xi1>, vector<4x256xf32>
    %c16_i32 = arith.constant 16 : i32
    %25 = tpu.dynamic_rotate %24 by %c16_i32 dim 1 : vector<4x256xf32>, i32 -> vector<4x256xf32>
    %c3 = arith.constant 3 : index
    %c0_9 = arith.constant 0 : index
    %26 = vector.load %arg3[%c3, %c0_9] : memref<10x256xf32, #tpu.memory_space<vmem>>, vector<1x256xf32>
    %cst_10 = arith.constant 0.000000e+00 : f32
    %27 = vector.broadcast %cst_10 : f32 to vector<1x256xf32>
    %28 = arith.cmpf one, %26, %27 : vector<1x256xf32>
    %29 = vector.shape_cast %28 : vector<1x256xi1> to vector<1x256xi1>
    %30 = vector.broadcast %29 : vector<1x256xi1> to vector<4x256xi1>
    %31 = arith.select %30, %25, %24 : vector<4x256xi1>, vector<4x256xf32>
    %c8_i32 = arith.constant 8 : i32
    %32 = tpu.dynamic_rotate %31 by %c8_i32 dim 1 : vector<4x256xf32>, i32 -> vector<4x256xf32>
    %c4 = arith.constant 4 : index
    %c0_11 = arith.constant 0 : index
    %33 = vector.load %arg3[%c4, %c0_11] : memref<10x256xf32, #tpu.memory_space<vmem>>, vector<1x256xf32>
    %cst_12 = arith.constant 0.000000e+00 : f32
    %34 = vector.broadcast %cst_12 : f32 to vector<1x256xf32>
    %35 = arith.cmpf one, %33, %34 : vector<1x256xf32>
    %36 = vector.shape_cast %35 : vector<1x256xi1> to vector<1x256xi1>
    %37 = vector.broadcast %36 : vector<1x256xi1> to vector<4x256xi1>
    %38 = arith.select %37, %32, %31 : vector<4x256xi1>, vector<4x256xf32>
    %c4_i32 = arith.constant 4 : i32
    %39 = tpu.dynamic_rotate %38 by %c4_i32 dim 1 : vector<4x256xf32>, i32 -> vector<4x256xf32>
    %c5 = arith.constant 5 : index
    %c0_13 = arith.constant 0 : index
    %40 = vector.load %arg3[%c5, %c0_13] : memref<10x256xf32, #tpu.memory_space<vmem>>, vector<1x256xf32>
    %cst_14 = arith.constant 0.000000e+00 : f32
    %41 = vector.broadcast %cst_14 : f32 to vector<1x256xf32>
    %42 = arith.cmpf one, %40, %41 : vector<1x256xf32>
    %43 = vector.shape_cast %42 : vector<1x256xi1> to vector<1x256xi1>
    %44 = vector.broadcast %43 : vector<1x256xi1> to vector<4x256xi1>
    %45 = arith.select %44, %39, %38 : vector<4x256xi1>, vector<4x256xf32>
    %c2_i32 = arith.constant 2 : i32
    %46 = tpu.dynamic_rotate %45 by %c2_i32 dim 1 : vector<4x256xf32>, i32 -> vector<4x256xf32>
    %c6 = arith.constant 6 : index
    %c0_15 = arith.constant 0 : index
    %47 = vector.load %arg3[%c6, %c0_15] : memref<10x256xf32, #tpu.memory_space<vmem>>, vector<1x256xf32>
    %cst_16 = arith.constant 0.000000e+00 : f32
    %48 = vector.broadcast %cst_16 : f32 to vector<1x256xf32>
    %49 = arith.cmpf one, %47, %48 : vector<1x256xf32>
    %50 = vector.shape_cast %49 : vector<1x256xi1> to vector<1x256xi1>
    %51 = vector.broadcast %50 : vector<1x256xi1> to vector<4x256xi1>
    %52 = arith.select %51, %46, %45 : vector<4x256xi1>, vector<4x256xf32>
    %c1_i32 = arith.constant 1 : i32
    %53 = tpu.dynamic_rotate %52 by %c1_i32 dim 1 : vector<4x256xf32>, i32 -> vector<4x256xf32>
    %c7 = arith.constant 7 : index
    %c0_17 = arith.constant 0 : index
    %54 = vector.load %arg3[%c7, %c0_17] : memref<10x256xf32, #tpu.memory_space<vmem>>, vector<1x256xf32>
    %cst_18 = arith.constant 0.000000e+00 : f32
    %55 = vector.broadcast %cst_18 : f32 to vector<1x256xf32>
    %56 = arith.cmpf one, %54, %55 : vector<1x256xf32>
    %57 = vector.shape_cast %56 : vector<1x256xi1> to vector<1x256xi1>
    %58 = vector.broadcast %57 : vector<1x256xi1> to vector<4x256xi1>
    %59 = arith.select %58, %53, %52 : vector<4x256xi1>, vector<4x256xf32>
    %c1_i32_19 = arith.constant 1 : i32
    %60 = tpu.dynamic_rotate %59 by %c1_i32_19 dim 1 : vector<4x256xf32>, i32 -> vector<4x256xf32>
    %c8 = arith.constant 8 : index
    %c0_20 = arith.constant 0 : index
    %61 = vector.load %arg3[%c8, %c0_20] : memref<10x256xf32, #tpu.memory_space<vmem>>, vector<1x256xf32>
    %cst_21 = arith.constant 0.000000e+00 : f32
    %62 = vector.broadcast %cst_21 : f32 to vector<1x256xf32>
    %63 = arith.cmpf one, %61, %62 : vector<1x256xf32>
    %64 = vector.shape_cast %63 : vector<1x256xi1> to vector<1x256xi1>
    %65 = vector.broadcast %64 : vector<1x256xi1> to vector<4x256xi1>
    %66 = arith.select %65, %60, %59 : vector<4x256xi1>, vector<4x256xf32>
    %c16_i32_22 = arith.constant 16 : i32
    %67 = tpu.dynamic_rotate %66 by %c16_i32_22 dim 1 : vector<4x256xf32>, i32 -> vector<4x256xf32>
    %c9 = arith.constant 9 : index
    %c0_23 = arith.constant 0 : index
    %68 = vector.load %arg3[%c9, %c0_23] : memref<10x256xf32, #tpu.memory_space<vmem>>, vector<1x256xf32>
    %cst_24 = arith.constant 0.000000e+00 : f32
    %69 = vector.broadcast %cst_24 : f32 to vector<1x256xf32>
    %70 = arith.cmpf one, %68, %69 : vector<1x256xf32>
    %71 = vector.shape_cast %70 : vector<1x256xi1> to vector<1x256xi1>
    %72 = vector.broadcast %71 : vector<1x256xi1> to vector<4x256xi1>
    %73 = arith.select %72, %67, %66 : vector<4x256xi1>, vector<4x256xf32>
    %c1_25 = arith.constant 1 : index
    %c0_26 = arith.constant 0 : index
    %c0_27 = arith.constant 0 : index
    %74 = vector.load %arg1[%c1_25, %c0_26, %c0_27] : memref<2x4x64xf32, #tpu.memory_space<vmem>>, vector<1x4x64xf32>
    %75 = vector.shape_cast %74 : vector<1x4x64xf32> to vector<4x64xf32>
    %cst_28 = arith.constant 0.000000e+00 : f32
    %76 = vector.broadcast %cst_28 : f32 to vector<4x192xf32>
    %77 = tpu.concatenate %75, %76 in 1 : vector<4x64xf32>, vector<4x192xf32> -> vector<4x256xf32>
    %c128_i32_29 = arith.constant 128 : i32
    %78 = tpu.dynamic_rotate %77 by %c128_i32_29 dim 1 : vector<4x256xf32>, i32 -> vector<4x256xf32>
    %c0_30 = arith.constant 0 : index
    %c0_31 = arith.constant 0 : index
    %79 = vector.load %arg3[%c0_30, %c0_31] : memref<10x256xf32, #tpu.memory_space<vmem>>, vector<1x256xf32>
    %cst_32 = arith.constant 0.000000e+00 : f32
    %80 = vector.broadcast %cst_32 : f32 to vector<1x256xf32>
    %81 = arith.cmpf one, %79, %80 : vector<1x256xf32>
    %82 = vector.shape_cast %81 : vector<1x256xi1> to vector<1x256xi1>
    %83 = vector.broadcast %82 : vector<1x256xi1> to vector<4x256xi1>
    %84 = arith.select %83, %78, %77 : vector<4x256xi1>, vector<4x256xf32>
    %c64_i32_33 = arith.constant 64 : i32
    %85 = tpu.dynamic_rotate %84 by %c64_i32_33 dim 1 : vector<4x256xf32>, i32 -> vector<4x256xf32>
    %c1_34 = arith.constant 1 : index
    %c0_35 = arith.constant 0 : index
    %86 = vector.load %arg3[%c1_34, %c0_35] : memref<10x256xf32, #tpu.memory_space<vmem>>, vector<1x256xf32>
    %cst_36 = arith.constant 0.000000e+00 : f32
    %87 = vector.broadcast %cst_36 : f32 to vector<1x256xf32>
    %88 = arith.cmpf one, %86, %87 : vector<1x256xf32>
    %89 = vector.shape_cast %88 : vector<1x256xi1> to vector<1x256xi1>
    %90 = vector.broadcast %89 : vector<1x256xi1> to vector<4x256xi1>
    %91 = arith.select %90, %85, %84 : vector<4x256xi1>, vector<4x256xf32>
    %c32_i32_37 = arith.constant 32 : i32
    %92 = tpu.dynamic_rotate %91 by %c32_i32_37 dim 1 : vector<4x256xf32>, i32 -> vector<4x256xf32>
    %c2_38 = arith.constant 2 : index
    %c0_39 = arith.constant 0 : index
    %93 = vector.load %arg3[%c2_38, %c0_39] : memref<10x256xf32, #tpu.memory_space<vmem>>, vector<1x256xf32>
    %cst_40 = arith.constant 0.000000e+00 : f32
    %94 = vector.broadcast %cst_40 : f32 to vector<1x256xf32>
    %95 = arith.cmpf one, %93, %94 : vector<1x256xf32>
    %96 = vector.shape_cast %95 : vector<1x256xi1> to vector<1x256xi1>
    %97 = vector.broadcast %96 : vector<1x256xi1> to vector<4x256xi1>
    %98 = arith.select %97, %92, %91 : vector<4x256xi1>, vector<4x256xf32>
    %c16_i32_41 = arith.constant 16 : i32
    %99 = tpu.dynamic_rotate %98 by %c16_i32_41 dim 1 : vector<4x256xf32>, i32 -> vector<4x256xf32>
    %c3_42 = arith.constant 3 : index
    %c0_43 = arith.constant 0 : index
    %100 = vector.load %arg3[%c3_42, %c0_43] : memref<10x256xf32, #tpu.memory_space<vmem>>, vector<1x256xf32>
    %cst_44 = arith.constant 0.000000e+00 : f32
    %101 = vector.broadcast %cst_44 : f32 to vector<1x256xf32>
    %102 = arith.cmpf one, %100, %101 : vector<1x256xf32>
    %103 = vector.shape_cast %102 : vector<1x256xi1> to vector<1x256xi1>
    %104 = vector.broadcast %103 : vector<1x256xi1> to vector<4x256xi1>
    %105 = arith.select %104, %99, %98 : vector<4x256xi1>, vector<4x256xf32>
    %c8_i32_45 = arith.constant 8 : i32
    %106 = tpu.dynamic_rotate %105 by %c8_i32_45 dim 1 : vector<4x256xf32>, i32 -> vector<4x256xf32>
    %c4_46 = arith.constant 4 : index
    %c0_47 = arith.constant 0 : index
    %107 = vector.load %arg3[%c4_46, %c0_47] : memref<10x256xf32, #tpu.memory_space<vmem>>, vector<1x256xf32>
    %cst_48 = arith.constant 0.000000e+00 : f32
    %108 = vector.broadcast %cst_48 : f32 to vector<1x256xf32>
    %109 = arith.cmpf one, %107, %108 : vector<1x256xf32>
    %110 = vector.shape_cast %109 : vector<1x256xi1> to vector<1x256xi1>
    %111 = vector.broadcast %110 : vector<1x256xi1> to vector<4x256xi1>
    %112 = arith.select %111, %106, %105 : vector<4x256xi1>, vector<4x256xf32>
    %c4_i32_49 = arith.constant 4 : i32
    %113 = tpu.dynamic_rotate %112 by %c4_i32_49 dim 1 : vector<4x256xf32>, i32 -> vector<4x256xf32>
    %c5_50 = arith.constant 5 : index
    %c0_51 = arith.constant 0 : index
    %114 = vector.load %arg3[%c5_50, %c0_51] : memref<10x256xf32, #tpu.memory_space<vmem>>, vector<1x256xf32>
    %cst_52 = arith.constant 0.000000e+00 : f32
    %115 = vector.broadcast %cst_52 : f32 to vector<1x256xf32>
    %116 = arith.cmpf one, %114, %115 : vector<1x256xf32>
    %117 = vector.shape_cast %116 : vector<1x256xi1> to vector<1x256xi1>
    %118 = vector.broadcast %117 : vector<1x256xi1> to vector<4x256xi1>
    %119 = arith.select %118, %113, %112 : vector<4x256xi1>, vector<4x256xf32>
    %c2_i32_53 = arith.constant 2 : i32
    %120 = tpu.dynamic_rotate %119 by %c2_i32_53 dim 1 : vector<4x256xf32>, i32 -> vector<4x256xf32>
    %c6_54 = arith.constant 6 : index
    %c0_55 = arith.constant 0 : index
    %121 = vector.load %arg3[%c6_54, %c0_55] : memref<10x256xf32, #tpu.memory_space<vmem>>, vector<1x256xf32>
    %cst_56 = arith.constant 0.000000e+00 : f32
    %122 = vector.broadcast %cst_56 : f32 to vector<1x256xf32>
    %123 = arith.cmpf one, %121, %122 : vector<1x256xf32>
    %124 = vector.shape_cast %123 : vector<1x256xi1> to vector<1x256xi1>
    %125 = vector.broadcast %124 : vector<1x256xi1> to vector<4x256xi1>
    %126 = arith.select %125, %120, %119 : vector<4x256xi1>, vector<4x256xf32>
    %c1_i32_57 = arith.constant 1 : i32
    %127 = tpu.dynamic_rotate %126 by %c1_i32_57 dim 1 : vector<4x256xf32>, i32 -> vector<4x256xf32>
    %c7_58 = arith.constant 7 : index
    %c0_59 = arith.constant 0 : index
    %128 = vector.load %arg3[%c7_58, %c0_59] : memref<10x256xf32, #tpu.memory_space<vmem>>, vector<1x256xf32>
    %cst_60 = arith.constant 0.000000e+00 : f32
    %129 = vector.broadcast %cst_60 : f32 to vector<1x256xf32>
    %130 = arith.cmpf one, %128, %129 : vector<1x256xf32>
    %131 = vector.shape_cast %130 : vector<1x256xi1> to vector<1x256xi1>
    %132 = vector.broadcast %131 : vector<1x256xi1> to vector<4x256xi1>
    %133 = arith.select %132, %127, %126 : vector<4x256xi1>, vector<4x256xf32>
    %c1_i32_61 = arith.constant 1 : i32
    %134 = tpu.dynamic_rotate %133 by %c1_i32_61 dim 1 : vector<4x256xf32>, i32 -> vector<4x256xf32>
    %c8_62 = arith.constant 8 : index
    %c0_63 = arith.constant 0 : index
    %135 = vector.load %arg3[%c8_62, %c0_63] : memref<10x256xf32, #tpu.memory_space<vmem>>, vector<1x256xf32>
    %cst_64 = arith.constant 0.000000e+00 : f32
    %136 = vector.broadcast %cst_64 : f32 to vector<1x256xf32>
    %137 = arith.cmpf one, %135, %136 : vector<1x256xf32>
    %138 = vector.shape_cast %137 : vector<1x256xi1> to vector<1x256xi1>
    %139 = vector.broadcast %138 : vector<1x256xi1> to vector<4x256xi1>
    %140 = arith.select %139, %134, %133 : vector<4x256xi1>, vector<4x256xf32>
    %c16_i32_65 = arith.constant 16 : i32
    %141 = tpu.dynamic_rotate %140 by %c16_i32_65 dim 1 : vector<4x256xf32>, i32 -> vector<4x256xf32>
    %c9_66 = arith.constant 9 : index
    %c0_67 = arith.constant 0 : index
    %142 = vector.load %arg3[%c9_66, %c0_67] : memref<10x256xf32, #tpu.memory_space<vmem>>, vector<1x256xf32>
    %cst_68 = arith.constant 0.000000e+00 : f32
    %143 = vector.broadcast %cst_68 : f32 to vector<1x256xf32>
    %144 = arith.cmpf one, %142, %143 : vector<1x256xf32>
    %145 = vector.shape_cast %144 : vector<1x256xi1> to vector<1x256xi1>
    %146 = vector.broadcast %145 : vector<1x256xi1> to vector<4x256xi1>
    %147 = arith.select %146, %141, %140 : vector<4x256xi1>, vector<4x256xf32>
    %148 = tpu.concatenate %73, %147 in 1 : vector<4x256xf32>, vector<4x256xf32> -> vector<4x512xf32>
    %c17_i32 = arith.constant 17 : i32
    %149 = tpu.dynamic_rotate %148 by %c17_i32 dim 1 : vector<4x512xf32>, i32 -> vector<4x512xf32>
    %c0_69 = arith.constant 0 : index
    %c0_70 = arith.constant 0 : index
    %150 = vector.load %arg4[%c0_69, %c0_70] : memref<9x512xf32, #tpu.memory_space<vmem>>, vector<1x512xf32>
    %151 = vector.broadcast %150 : vector<1x512xf32> to vector<4x512xf32>
    %152 = arith.mulf %149, %151 : vector<4x512xf32>
    %c16_i32_71 = arith.constant 16 : i32
    %153 = tpu.dynamic_rotate %148 by %c16_i32_71 dim 1 : vector<4x512xf32>, i32 -> vector<4x512xf32>
    %c1_72 = arith.constant 1 : index
    %c0_73 = arith.constant 0 : index
    %154 = vector.load %arg4[%c1_72, %c0_73] : memref<9x512xf32, #tpu.memory_space<vmem>>, vector<1x512xf32>
    %155 = vector.broadcast %154 : vector<1x512xf32> to vector<4x512xf32>
    %156 = arith.mulf %153, %155 : vector<4x512xf32>
    %c15_i32 = arith.constant 15 : i32
    %157 = tpu.dynamic_rotate %148 by %c15_i32 dim 1 : vector<4x512xf32>, i32 -> vector<4x512xf32>
    %c2_74 = arith.constant 2 : index
    %c0_75 = arith.constant 0 : index
    %158 = vector.load %arg4[%c2_74, %c0_75] : memref<9x512xf32, #tpu.memory_space<vmem>>, vector<1x512xf32>
    %159 = vector.broadcast %158 : vector<1x512xf32> to vector<4x512xf32>
    %160 = arith.mulf %157, %159 : vector<4x512xf32>
    %c1_i32_76 = arith.constant 1 : i32
    %161 = tpu.dynamic_rotate %148 by %c1_i32_76 dim 1 : vector<4x512xf32>, i32 -> vector<4x512xf32>
    %c3_77 = arith.constant 3 : index
    %c0_78 = arith.constant 0 : index
    %162 = vector.load %arg4[%c3_77, %c0_78] : memref<9x512xf32, #tpu.memory_space<vmem>>, vector<1x512xf32>
    %163 = vector.broadcast %162 : vector<1x512xf32> to vector<4x512xf32>
    %164 = arith.mulf %161, %163 : vector<4x512xf32>
    %c511_i32 = arith.constant 511 : i32
    %165 = tpu.dynamic_rotate %148 by %c511_i32 dim 1 : vector<4x512xf32>, i32 -> vector<4x512xf32>
    %c5_79 = arith.constant 5 : index
    %c0_80 = arith.constant 0 : index
    %166 = vector.load %arg4[%c5_79, %c0_80] : memref<9x512xf32, #tpu.memory_space<vmem>>, vector<1x512xf32>
    %167 = vector.broadcast %166 : vector<1x512xf32> to vector<4x512xf32>
    %168 = arith.mulf %165, %167 : vector<4x512xf32>
    %c497_i32 = arith.constant 497 : i32
    %169 = tpu.dynamic_rotate %148 by %c497_i32 dim 1 : vector<4x512xf32>, i32 -> vector<4x512xf32>
    %c6_81 = arith.constant 6 : index
    %c0_82 = arith.constant 0 : index
    %170 = vector.load %arg4[%c6_81, %c0_82] : memref<9x512xf32, #tpu.memory_space<vmem>>, vector<1x512xf32>
    %171 = vector.broadcast %170 : vector<1x512xf32> to vector<4x512xf32>
    %172 = arith.mulf %169, %171 : vector<4x512xf32>
    %c496_i32 = arith.constant 496 : i32
    %173 = tpu.dynamic_rotate %148 by %c496_i32 dim 1 : vector<4x512xf32>, i32 -> vector<4x512xf32>
    %c7_83 = arith.constant 7 : index
    %c0_84 = arith.constant 0 : index
    %174 = vector.load %arg4[%c7_83, %c0_84] : memref<9x512xf32, #tpu.memory_space<vmem>>, vector<1x512xf32>
    %175 = vector.broadcast %174 : vector<1x512xf32> to vector<4x512xf32>
    %176 = arith.mulf %173, %175 : vector<4x512xf32>
    %c495_i32 = arith.constant 495 : i32
    %177 = tpu.dynamic_rotate %148 by %c495_i32 dim 1 : vector<4x512xf32>, i32 -> vector<4x512xf32>
    %c8_85 = arith.constant 8 : index
    %c0_86 = arith.constant 0 : index
    %178 = vector.load %arg4[%c8_85, %c0_86] : memref<9x512xf32, #tpu.memory_space<vmem>>, vector<1x512xf32>
    %179 = vector.broadcast %178 : vector<1x512xf32> to vector<4x512xf32>
    %180 = arith.mulf %177, %179 : vector<4x512xf32>
    %c0_87 = arith.constant 0 : index
    %c0_88 = arith.constant 0 : index
    %181 = vector.load %arg5[%c0_87, %c0_88] : memref<4x36xbf16, #tpu.memory_space<vmem>>, vector<4x36xbf16>
    %182 = tpu.concatenate %152, %156, %160, %164, %148, %168, %172, %176, %180 in 0 : vector<4x512xf32>, vector<4x512xf32>, vector<4x512xf32>, vector<4x512xf32>, vector<4x512xf32>, vector<4x512xf32>, vector<4x512xf32>, vector<4x512xf32>, vector<4x512xf32> -> vector<36x512xf32>
    %183 = arith.truncf %182 : vector<36x512xf32> to vector<36x512xbf16>
    %cst_89 = arith.constant dense<0.000000e+00> : vector<4x512xf32>
    %184 = tpu.matmul %181, %183, %cst_89 {dimension_numbers = #tpu.dot_dimension_numbers<[1], [0], [0], [1], [0, 0, 1, 1], [], []>} : vector<4x36xbf16>, vector<36x512xbf16>, vector<4x512xf32> -> vector<4x512xf32>
    %c0_90 = arith.constant 0 : index
    %c0_91 = arith.constant 0 : index
    %185 = vector.load %arg6[%c0_90, %c0_91] : memref<4x1xf32, #tpu.memory_space<vmem>>, vector<4x1xf32>
    %186 = vector.broadcast %185 : vector<4x1xf32> to vector<4x512xf32>
    %187 = arith.mulf %184, %186 : vector<4x512xf32>
    %c0_92 = arith.constant 0 : index
    %c0_93 = arith.constant 0 : index
    %188 = vector.load %arg7[%c0_92, %c0_93] : memref<4x1xf32, #tpu.memory_space<vmem>>, vector<4x1xf32>
    %189 = vector.broadcast %188 : vector<4x1xf32> to vector<4x512xf32>
    %190 = arith.addf %187, %189 : vector<4x512xf32>
    %cst_94 = arith.constant 0.000000e+00 : f32
    %191 = vector.broadcast %cst_94 : f32 to vector<4x512xf32>
    %192 = arith.maximumf %190, %191 : vector<4x512xf32>
    %c0_95 = arith.constant 0 : index
    %c0_96 = arith.constant 0 : index
    %c0_97 = arith.constant 0 : index
    %193 = vector.load %arg2[%c0_95, %c0_96, %c0_97] : memref<2x4x256xf32, #tpu.memory_space<vmem>>, vector<1x4x256xf32>
    %194 = vector.shape_cast %193 : vector<1x4x256xf32> to vector<4x256xf32>
    %c1_98 = arith.constant 1 : index
    %c0_99 = arith.constant 0 : index
    %c0_100 = arith.constant 0 : index
    %195 = vector.load %arg2[%c1_98, %c0_99, %c0_100] : memref<2x4x256xf32, #tpu.memory_space<vmem>>, vector<1x4x256xf32>
    %196 = vector.shape_cast %195 : vector<1x4x256xf32> to vector<4x256xf32>
    %197 = tpu.concatenate %194, %196 in 1 : vector<4x256xf32>, vector<4x256xf32> -> vector<4x512xf32>
    %198 = arith.addf %192, %197 : vector<4x512xf32>
    %c17_i32_101 = arith.constant 17 : i32
    %199 = tpu.dynamic_rotate %198 by %c17_i32_101 dim 1 : vector<4x512xf32>, i32 -> vector<4x512xf32>
    %c0_102 = arith.constant 0 : index
    %c0_103 = arith.constant 0 : index
    %200 = vector.load %arg4[%c0_102, %c0_103] : memref<9x512xf32, #tpu.memory_space<vmem>>, vector<1x512xf32>
    %201 = vector.broadcast %200 : vector<1x512xf32> to vector<4x512xf32>
    %202 = arith.mulf %199, %201 : vector<4x512xf32>
    %c16_i32_104 = arith.constant 16 : i32
    %203 = tpu.dynamic_rotate %198 by %c16_i32_104 dim 1 : vector<4x512xf32>, i32 -> vector<4x512xf32>
    %c1_105 = arith.constant 1 : index
    %c0_106 = arith.constant 0 : index
    %204 = vector.load %arg4[%c1_105, %c0_106] : memref<9x512xf32, #tpu.memory_space<vmem>>, vector<1x512xf32>
    %205 = vector.broadcast %204 : vector<1x512xf32> to vector<4x512xf32>
    %206 = arith.mulf %203, %205 : vector<4x512xf32>
    %c15_i32_107 = arith.constant 15 : i32
    %207 = tpu.dynamic_rotate %198 by %c15_i32_107 dim 1 : vector<4x512xf32>, i32 -> vector<4x512xf32>
    %c2_108 = arith.constant 2 : index
    %c0_109 = arith.constant 0 : index
    %208 = vector.load %arg4[%c2_108, %c0_109] : memref<9x512xf32, #tpu.memory_space<vmem>>, vector<1x512xf32>
    %209 = vector.broadcast %208 : vector<1x512xf32> to vector<4x512xf32>
    %210 = arith.mulf %207, %209 : vector<4x512xf32>
    %c1_i32_110 = arith.constant 1 : i32
    %211 = tpu.dynamic_rotate %198 by %c1_i32_110 dim 1 : vector<4x512xf32>, i32 -> vector<4x512xf32>
    %c3_111 = arith.constant 3 : index
    %c0_112 = arith.constant 0 : index
    %212 = vector.load %arg4[%c3_111, %c0_112] : memref<9x512xf32, #tpu.memory_space<vmem>>, vector<1x512xf32>
    %213 = vector.broadcast %212 : vector<1x512xf32> to vector<4x512xf32>
    %214 = arith.mulf %211, %213 : vector<4x512xf32>
    %c511_i32_113 = arith.constant 511 : i32
    %215 = tpu.dynamic_rotate %198 by %c511_i32_113 dim 1 : vector<4x512xf32>, i32 -> vector<4x512xf32>
    %c5_114 = arith.constant 5 : index
    %c0_115 = arith.constant 0 : index
    %216 = vector.load %arg4[%c5_114, %c0_115] : memref<9x512xf32, #tpu.memory_space<vmem>>, vector<1x512xf32>
    %217 = vector.broadcast %216 : vector<1x512xf32> to vector<4x512xf32>
    %218 = arith.mulf %215, %217 : vector<4x512xf32>
    %c497_i32_116 = arith.constant 497 : i32
    %219 = tpu.dynamic_rotate %198 by %c497_i32_116 dim 1 : vector<4x512xf32>, i32 -> vector<4x512xf32>
    %c6_117 = arith.constant 6 : index
    %c0_118 = arith.constant 0 : index
    %220 = vector.load %arg4[%c6_117, %c0_118] : memref<9x512xf32, #tpu.memory_space<vmem>>, vector<1x512xf32>
    %221 = vector.broadcast %220 : vector<1x512xf32> to vector<4x512xf32>
    %222 = arith.mulf %219, %221 : vector<4x512xf32>
    %c496_i32_119 = arith.constant 496 : i32
    %223 = tpu.dynamic_rotate %198 by %c496_i32_119 dim 1 : vector<4x512xf32>, i32 -> vector<4x512xf32>
    %c7_120 = arith.constant 7 : index
    %c0_121 = arith.constant 0 : index
    %224 = vector.load %arg4[%c7_120, %c0_121] : memref<9x512xf32, #tpu.memory_space<vmem>>, vector<1x512xf32>
    %225 = vector.broadcast %224 : vector<1x512xf32> to vector<4x512xf32>
    %226 = arith.mulf %223, %225 : vector<4x512xf32>
    %c495_i32_122 = arith.constant 495 : i32
    %227 = tpu.dynamic_rotate %198 by %c495_i32_122 dim 1 : vector<4x512xf32>, i32 -> vector<4x512xf32>
    %c8_123 = arith.constant 8 : index
    %c0_124 = arith.constant 0 : index
    %228 = vector.load %arg4[%c8_123, %c0_124] : memref<9x512xf32, #tpu.memory_space<vmem>>, vector<1x512xf32>
    %229 = vector.broadcast %228 : vector<1x512xf32> to vector<4x512xf32>
    %230 = arith.mulf %227, %229 : vector<4x512xf32>
    %c0_125 = arith.constant 0 : index
    %c0_126 = arith.constant 0 : index
    %231 = vector.load %arg8[%c0_125, %c0_126] : memref<8x36xbf16, #tpu.memory_space<vmem>>, vector<8x36xbf16>
    %232 = tpu.concatenate %202, %206, %210, %214, %198, %218, %222, %226, %230 in 0 : vector<4x512xf32>, vector<4x512xf32>, vector<4x512xf32>, vector<4x512xf32>, vector<4x512xf32>, vector<4x512xf32>, vector<4x512xf32>, vector<4x512xf32>, vector<4x512xf32> -> vector<36x512xf32>
    %233 = arith.truncf %232 : vector<36x512xf32> to vector<36x512xbf16>
    %cst_127 = arith.constant dense<0.000000e+00> : vector<8x512xf32>
    %234 = tpu.matmul %231, %233, %cst_127 {dimension_numbers = #tpu.dot_dimension_numbers<[1], [0], [0], [1], [0, 0, 1, 1], [], []>} : vector<8x36xbf16>, vector<36x512xbf16>, vector<8x512xf32> -> vector<8x512xf32>
    %c0_128 = arith.constant 0 : index
    %c0_129 = arith.constant 0 : index
    %235 = vector.load %arg9[%c0_128, %c0_129] : memref<8x1xf32, #tpu.memory_space<vmem>>, vector<8x1xf32>
    %236 = vector.broadcast %235 : vector<8x1xf32> to vector<8x512xf32>
    %237 = arith.mulf %234, %236 : vector<8x512xf32>
    %c0_130 = arith.constant 0 : index
    %c0_131 = arith.constant 0 : index
    %238 = vector.load %arg10[%c0_130, %c0_131] : memref<8x1xf32, #tpu.memory_space<vmem>>, vector<8x1xf32>
    %239 = vector.broadcast %238 : vector<8x1xf32> to vector<8x512xf32>
    %240 = arith.addf %237, %239 : vector<8x512xf32>
    %cst_132 = arith.constant 0.000000e+00 : f32
    %241 = vector.broadcast %cst_132 : f32 to vector<8x512xf32>
    %242 = arith.maximumf %240, %241 : vector<8x512xf32>
    %243 = vector.extract_strided_slice %242 {offsets = [0, 0], sizes = [8, 256], strides = [1, 1]} : vector<8x512xf32> to vector<8x256xf32>
    %c0_133 = arith.constant 0 : index
    %c0_134 = arith.constant 0 : index
    %c0_135 = arith.constant 0 : index
    %244 = vector.load %arg11[%c0_133, %c0_134, %c0_135] : memref<2x8x256xf32, #tpu.memory_space<vmem>>, vector<1x8x256xf32>
    %245 = vector.shape_cast %244 : vector<1x8x256xf32> to vector<8x256xf32>
    %246 = vector.shape_cast %243 : vector<8x256xf32> to vector<1x8x256xf32>
    tpu.vector_store %arg11[%c0_133, %c0_134, %c0_135], %246 {strides = array<i32>} : memref<2x8x256xf32, #tpu.memory_space<vmem>>, vector<1x8x256xf32>,
    %247 = vector.extract_strided_slice %242 {offsets = [0, 256], sizes = [8, 256], strides = [1, 1]} : vector<8x512xf32> to vector<8x256xf32>
    %c1_136 = arith.constant 1 : index
    %c0_137 = arith.constant 0 : index
    %c0_138 = arith.constant 0 : index
    %248 = vector.load %arg11[%c1_136, %c0_137, %c0_138] : memref<2x8x256xf32, #tpu.memory_space<vmem>>, vector<1x8x256xf32>
    %249 = vector.shape_cast %248 : vector<1x8x256xf32> to vector<8x256xf32>
    %250 = vector.shape_cast %247 : vector<8x256xf32> to vector<1x8x256xf32>
    tpu.vector_store %arg11[%c1_136, %c0_137, %c0_138], %250 {strides = array<i32>} : memref<2x8x256xf32, #tpu.memory_space<vmem>>, vector<1x8x256xf32>,
    return
  }
  func.func @transform_0(%arg0: i32) -> (i32, i32, i32) {
    %c0_i32 = arith.constant 0 : i32
    %c0_i32_0 = arith.constant 0 : i32
    %c0_i32_1 = arith.constant 0 : i32
    return %arg0, %c0_i32, %c0_i32_0 : i32, i32, i32
  }
  func.func @transform_1(%arg0: i32) -> (i32, i32, i32) {
    %c0_i32 = arith.constant 0 : i32
    %c0_i32_0 = arith.constant 0 : i32
    %c0_i32_1 = arith.constant 0 : i32
    return %arg0, %c0_i32, %c0_i32_0 : i32, i32, i32
  }
  func.func @transform_2(%arg0: i32) -> (i32, i32) {
    %c0_i32 = arith.constant 0 : i32
    %c0_i32_0 = arith.constant 0 : i32
    %c0_i32_1 = arith.constant 0 : i32
    return %c0_i32, %c0_i32_0 : i32, i32
  }
  func.func @transform_3(%arg0: i32) -> (i32, i32) {
    %c0_i32 = arith.constant 0 : i32
    %c0_i32_0 = arith.constant 0 : i32
    %c0_i32_1 = arith.constant 0 : i32
    return %c0_i32, %c0_i32_0 : i32, i32
  }
  func.func @transform_4(%arg0: i32) -> (i32, i32) {
    %c0_i32 = arith.constant 0 : i32
    %c0_i32_0 = arith.constant 0 : i32
    %c0_i32_1 = arith.constant 0 : i32
    return %c0_i32, %c0_i32_0 : i32, i32
  }
  func.func @transform_5(%arg0: i32) -> (i32, i32) {
    %c0_i32 = arith.constant 0 : i32
    %c0_i32_0 = arith.constant 0 : i32
    %c0_i32_1 = arith.constant 0 : i32
    return %c0_i32, %c0_i32_0 : i32, i32
  }
  func.func @transform_6(%arg0: i32) -> (i32, i32) {
    %c0_i32 = arith.constant 0 : i32
    %c0_i32_0 = arith.constant 0 : i32
    %c0_i32_1 = arith.constant 0 : i32
    return %c0_i32, %c0_i32_0 : i32, i32
  }
  func.func @transform_7(%arg0: i32) -> (i32, i32) {
    %c0_i32 = arith.constant 0 : i32
    %c0_i32_0 = arith.constant 0 : i32
    %c0_i32_1 = arith.constant 0 : i32
    return %c0_i32, %c0_i32_0 : i32, i32
  }
  func.func @transform_8(%arg0: i32) -> (i32, i32) {
    %c0_i32 = arith.constant 0 : i32
    %c0_i32_0 = arith.constant 0 : i32
    %c0_i32_1 = arith.constant 0 : i32
    return %c0_i32, %c0_i32_0 : i32, i32
  }
  func.func @transform_9(%arg0: i32) -> (i32, i32) {
    %c0_i32 = arith.constant 0 : i32
    %c0_i32_0 = arith.constant 0 : i32
    %c0_i32_1 = arith.constant 0 : i32
    return %c0_i32, %c0_i32_0 : i32, i32
  }
  func.func @transform_10(%arg0: i32) -> (i32, i32, i32) {
    %c0_i32 = arith.constant 0 : i32
    %c0_i32_0 = arith.constant 0 : i32
    %c0_i32_1 = arith.constant 0 : i32
    return %arg0, %c0_i32, %c0_i32_0 : i32, i32, i32
  }
}

module attributes {stable_mosaic.version = 11 : i64} {
  func.func @_up_fused_kernel(%arg0: i32, %arg1: memref<2x4x64xf32, #tpu.memory_space<vmem>>, %arg2: memref<2x4x256xf32, #tpu.memory_space<vmem>>, %arg3: memref<10x256xf32, #tpu.memory_space<vmem>>, %arg4: memref<9x512xf32, #tpu.memory_space<vmem>>, %arg5: memref<4x36xbf16, #tpu.memory_space<vmem>>, %arg6: memref<4x1xf32, #tpu.memory_space<vmem>>, %arg7: memref<4x1xf32, #tpu.memory_space<vmem>>, %arg8: memref<8x36xbf16, #tpu.memory_space<vmem>>, %arg9: memref<8x1xf32, #tpu.memory_space<vmem>>, %arg10: memref<8x1xf32, #tpu.memory_space<vmem>>, %arg11: memref<2x8x256xf32, #tpu.memory_space<vmem>>) attributes {dimension_semantics = [#tpu.dimension_semantics<parallel>], iteration_bounds = array<i64: 2>, scalar_prefetch = 0 : i64, scratch_operands = 0 : i64, tpu.core_type = #tpu.core_type<tc>, window_params = [{transform_indices = @transform_0, window_bounds = array<i64: 2, 4, 64>}, {transform_indices = @transform_1, window_bounds = array<i64: 2, 4, 256>}, {pipeline_mode = #tpu.pipeline_mode<synchronous>, transform_indices = @transform_2, window_bounds = array<i64: 10, 256>}, {pipeline_mode = #tpu.pipeline_mode<synchronous>, transform_indices = @transform_3, window_bounds = array<i64: 9, 512>}, {pipeline_mode = #tpu.pipeline_mode<synchronous>, transform_indices = @transform_4, window_bounds = array<i64: 4, 36>}, {pipeline_mode = #tpu.pipeline_mode<synchronous>, transform_indices = @transform_5, window_bounds = array<i64: 4, 1>}, {pipeline_mode = #tpu.pipeline_mode<synchronous>, transform_indices = @transform_6, window_bounds = array<i64: 4, 1>}, {pipeline_mode = #tpu.pipeline_mode<synchronous>, transform_indices = @transform_7, window_bounds = array<i64: 8, 36>}, {pipeline_mode = #tpu.pipeline_mode<synchronous>, transform_indices = @transform_8, window_bounds = array<i64: 8, 1>}, {pipeline_mode = #tpu.pipeline_mode<synchronous>, transform_indices = @transform_9, window_bounds = array<i64: 8, 1>}, {transform_indices = @transform_10, window_bounds = array<i64: 2, 8, 256>}]} {
    %c0 = arith.constant 0 : index
    %c0_0 = arith.constant 0 : index
    %c0_1 = arith.constant 0 : index
    %0 = vector.load %arg1[%c0, %c0_0, %c0_1] : memref<2x4x64xf32, #tpu.memory_space<vmem>>, vector<1x4x64xf32>
    %1 = vector.shape_cast %0 : vector<1x4x64xf32> to vector<4x64xf32>
    %cst = arith.constant 0.000000e+00 : f32
    %2 = vector.broadcast %cst : f32 to vector<4x192xf32>
    %3 = tpu.concatenate %1, %2 in 1 : vector<4x64xf32>, vector<4x192xf32> -> vector<4x256xf32>
    %c128_i32 = arith.constant 128 : i32
    %4 = tpu.dynamic_rotate %3 by %c128_i32 dim 1 : vector<4x256xf32>, i32 -> vector<4x256xf32>
    %c0_2 = arith.constant 0 : index
    %c0_3 = arith.constant 0 : index
    %5 = vector.load %arg3[%c0_2, %c0_3] : memref<10x256xf32, #tpu.memory_space<vmem>>, vector<1x256xf32>
    %cst_4 = arith.constant 0.000000e+00 : f32
    %6 = vector.broadcast %cst_4 : f32 to vector<1x256xf32>
    %7 = arith.cmpf one, %5, %6 : vector<1x256xf32>
    %8 = vector.shape_cast %7 : vector<1x256xi1> to vector<1x256xi1>
    %9 = vector.broadcast %8 : vector<1x256xi1> to vector<4x256xi1>
    %10 = arith.select %9, %4, %3 : vector<4x256xi1>, vector<4x256xf32>
    %c64_i32 = arith.constant 64 : i32
    %11 = tpu.dynamic_rotate %10 by %c64_i32 dim 1 : vector<4x256xf32>, i32 -> vector<4x256xf32>
    %c1 = arith.constant 1 : index
    %c0_5 = arith.constant 0 : index
    %12 = vector.load %arg3[%c1, %c0_5] : memref<10x256xf32, #tpu.memory_space<vmem>>, vector<1x256xf32>
    %cst_6 = arith.constant 0.000000e+00 : f32
    %13 = vector.broadcast %cst_6 : f32 to vector<1x256xf32>
    %14 = arith.cmpf one, %12, %13 : vector<1x256xf32>
    %15 = vector.shape_cast %14 : vector<1x256xi1> to vector<1x256xi1>
    %16 = vector.broadcast %15 : vector<1x256xi1> to vector<4x256xi1>
    %17 = arith.select %16, %11, %10 : vector<4x256xi1>, vector<4x256xf32>
    %c32_i32 = arith.constant 32 : i32
    %18 = tpu.dynamic_rotate %17 by %c32_i32 dim 1 : vector<4x256xf32>, i32 -> vector<4x256xf32>
    %c2 = arith.constant 2 : index
    %c0_7 = arith.constant 0 : index
    %19 = vector.load %arg3[%c2, %c0_7] : memref<10x256xf32, #tpu.memory_space<vmem>>, vector<1x256xf32>
    %cst_8 = arith.constant 0.000000e+00 : f32
    %20 = vector.broadcast %cst_8 : f32 to vector<1x256xf32>
    %21 = arith.cmpf one, %19, %20 : vector<1x256xf32>
    %22 = vector.shape_cast %21 : vector<1x256xi1> to vector<1x256xi1>
    %23 = vector.broadcast %22 : vector<1x256xi1> to vector<4x256xi1>
    %24 = arith.select %23, %18, %17 : vector<4x256xi1>, vector<4x256xf32>
    %c16_i32 = arith.constant 16 : i32
    %25 = tpu.dynamic_rotate %24 by %c16_i32 dim 1 : vector<4x256xf32>, i32 -> vector<4x256xf32>
    %c3 = arith.constant 3 : index
    %c0_9 = arith.constant 0 : index
    %26 = vector.load %arg3[%c3, %c0_9] : memref<10x256xf32, #tpu.memory_space<vmem>>, vector<1x256xf32>
    %cst_10 = arith.constant 0.000000e+00 : f32
    %27 = vector.broadcast %cst_10 : f32 to vector<1x256xf32>
    %28 = arith.cmpf one, %26, %27 : vector<1x256xf32>
    %29 = vector.shape_cast %28 : vector<1x256xi1> to vector<1x256xi1>
    %30 = vector.broadcast %29 : vector<1x256xi1> to vector<4x256xi1>
    %31 = arith.select %30, %25, %24 : vector<4x256xi1>, vector<4x256xf32>
    %c8_i32 = arith.constant 8 : i32
    %32 = tpu.dynamic_rotate %31 by %c8_i32 dim 1 : vector<4x256xf32>, i32 -> vector<4x256xf32>
    %c4 = arith.constant 4 : index
    %c0_11 = arith.constant 0 : index
    %33 = vector.load %arg3[%c4, %c0_11] : memref<10x256xf32, #tpu.memory_space<vmem>>, vector<1x256xf32>
    %cst_12 = arith.constant 0.000000e+00 : f32
    %34 = vector.broadcast %cst_12 : f32 to vector<1x256xf32>
    %35 = arith.cmpf one, %33, %34 : vector<1x256xf32>
    %36 = vector.shape_cast %35 : vector<1x256xi1> to vector<1x256xi1>
    %37 = vector.broadcast %36 : vector<1x256xi1> to vector<4x256xi1>
    %38 = arith.select %37, %32, %31 : vector<4x256xi1>, vector<4x256xf32>
    %c4_i32 = arith.constant 4 : i32
    %39 = tpu.dynamic_rotate %38 by %c4_i32 dim 1 : vector<4x256xf32>, i32 -> vector<4x256xf32>
    %c5 = arith.constant 5 : index
    %c0_13 = arith.constant 0 : index
    %40 = vector.load %arg3[%c5, %c0_13] : memref<10x256xf32, #tpu.memory_space<vmem>>, vector<1x256xf32>
    %cst_14 = arith.constant 0.000000e+00 : f32
    %41 = vector.broadcast %cst_14 : f32 to vector<1x256xf32>
    %42 = arith.cmpf one, %40, %41 : vector<1x256xf32>
    %43 = vector.shape_cast %42 : vector<1x256xi1> to vector<1x256xi1>
    %44 = vector.broadcast %43 : vector<1x256xi1> to vector<4x256xi1>
    %45 = arith.select %44, %39, %38 : vector<4x256xi1>, vector<4x256xf32>
    %c2_i32 = arith.constant 2 : i32
    %46 = tpu.dynamic_rotate %45 by %c2_i32 dim 1 : vector<4x256xf32>, i32 -> vector<4x256xf32>
    %c6 = arith.constant 6 : index
    %c0_15 = arith.constant 0 : index
    %47 = vector.load %arg3[%c6, %c0_15] : memref<10x256xf32, #tpu.memory_space<vmem>>, vector<1x256xf32>
    %cst_16 = arith.constant 0.000000e+00 : f32
    %48 = vector.broadcast %cst_16 : f32 to vector<1x256xf32>
    %49 = arith.cmpf one, %47, %48 : vector<1x256xf32>
    %50 = vector.shape_cast %49 : vector<1x256xi1> to vector<1x256xi1>
    %51 = vector.broadcast %50 : vector<1x256xi1> to vector<4x256xi1>
    %52 = arith.select %51, %46, %45 : vector<4x256xi1>, vector<4x256xf32>
    %c1_i32 = arith.constant 1 : i32
    %53 = tpu.dynamic_rotate %52 by %c1_i32 dim 1 : vector<4x256xf32>, i32 -> vector<4x256xf32>
    %c7 = arith.constant 7 : index
    %c0_17 = arith.constant 0 : index
    %54 = vector.load %arg3[%c7, %c0_17] : memref<10x256xf32, #tpu.memory_space<vmem>>, vector<1x256xf32>
    %cst_18 = arith.constant 0.000000e+00 : f32
    %55 = vector.broadcast %cst_18 : f32 to vector<1x256xf32>
    %56 = arith.cmpf one, %54, %55 : vector<1x256xf32>
    %57 = vector.shape_cast %56 : vector<1x256xi1> to vector<1x256xi1>
    %58 = vector.broadcast %57 : vector<1x256xi1> to vector<4x256xi1>
    %59 = arith.select %58, %53, %52 : vector<4x256xi1>, vector<4x256xf32>
    %c1_i32_19 = arith.constant 1 : i32
    %60 = tpu.dynamic_rotate %59 by %c1_i32_19 dim 1 : vector<4x256xf32>, i32 -> vector<4x256xf32>
    %c8 = arith.constant 8 : index
    %c0_20 = arith.constant 0 : index
    %61 = vector.load %arg3[%c8, %c0_20] : memref<10x256xf32, #tpu.memory_space<vmem>>, vector<1x256xf32>
    %cst_21 = arith.constant 0.000000e+00 : f32
    %62 = vector.broadcast %cst_21 : f32 to vector<1x256xf32>
    %63 = arith.cmpf one, %61, %62 : vector<1x256xf32>
    %64 = vector.shape_cast %63 : vector<1x256xi1> to vector<1x256xi1>
    %65 = vector.broadcast %64 : vector<1x256xi1> to vector<4x256xi1>
    %66 = arith.select %65, %60, %59 : vector<4x256xi1>, vector<4x256xf32>
    %c16_i32_22 = arith.constant 16 : i32
    %67 = tpu.dynamic_rotate %66 by %c16_i32_22 dim 1 : vector<4x256xf32>, i32 -> vector<4x256xf32>
    %c9 = arith.constant 9 : index
    %c0_23 = arith.constant 0 : index
    %68 = vector.load %arg3[%c9, %c0_23] : memref<10x256xf32, #tpu.memory_space<vmem>>, vector<1x256xf32>
    %cst_24 = arith.constant 0.000000e+00 : f32
    %69 = vector.broadcast %cst_24 : f32 to vector<1x256xf32>
    %70 = arith.cmpf one, %68, %69 : vector<1x256xf32>
    %71 = vector.shape_cast %70 : vector<1x256xi1> to vector<1x256xi1>
    %72 = vector.broadcast %71 : vector<1x256xi1> to vector<4x256xi1>
    %73 = arith.select %72, %67, %66 : vector<4x256xi1>, vector<4x256xf32>
    %c1_25 = arith.constant 1 : index
    %c0_26 = arith.constant 0 : index
    %c0_27 = arith.constant 0 : index
    %74 = vector.load %arg1[%c1_25, %c0_26, %c0_27] : memref<2x4x64xf32, #tpu.memory_space<vmem>>, vector<1x4x64xf32>
    %75 = vector.shape_cast %74 : vector<1x4x64xf32> to vector<4x64xf32>
    %cst_28 = arith.constant 0.000000e+00 : f32
    %76 = vector.broadcast %cst_28 : f32 to vector<4x192xf32>
    %77 = tpu.concatenate %75, %76 in 1 : vector<4x64xf32>, vector<4x192xf32> -> vector<4x256xf32>
    %c128_i32_29 = arith.constant 128 : i32
    %78 = tpu.dynamic_rotate %77 by %c128_i32_29 dim 1 : vector<4x256xf32>, i32 -> vector<4x256xf32>
    %c0_30 = arith.constant 0 : index
    %c0_31 = arith.constant 0 : index
    %79 = vector.load %arg3[%c0_30, %c0_31] : memref<10x256xf32, #tpu.memory_space<vmem>>, vector<1x256xf32>
    %cst_32 = arith.constant 0.000000e+00 : f32
    %80 = vector.broadcast %cst_32 : f32 to vector<1x256xf32>
    %81 = arith.cmpf one, %79, %80 : vector<1x256xf32>
    %82 = vector.shape_cast %81 : vector<1x256xi1> to vector<1x256xi1>
    %83 = vector.broadcast %82 : vector<1x256xi1> to vector<4x256xi1>
    %84 = arith.select %83, %78, %77 : vector<4x256xi1>, vector<4x256xf32>
    %c64_i32_33 = arith.constant 64 : i32
    %85 = tpu.dynamic_rotate %84 by %c64_i32_33 dim 1 : vector<4x256xf32>, i32 -> vector<4x256xf32>
    %c1_34 = arith.constant 1 : index
    %c0_35 = arith.constant 0 : index
    %86 = vector.load %arg3[%c1_34, %c0_35] : memref<10x256xf32, #tpu.memory_space<vmem>>, vector<1x256xf32>
    %cst_36 = arith.constant 0.000000e+00 : f32
    %87 = vector.broadcast %cst_36 : f32 to vector<1x256xf32>
    %88 = arith.cmpf one, %86, %87 : vector<1x256xf32>
    %89 = vector.shape_cast %88 : vector<1x256xi1> to vector<1x256xi1>
    %90 = vector.broadcast %89 : vector<1x256xi1> to vector<4x256xi1>
    %91 = arith.select %90, %85, %84 : vector<4x256xi1>, vector<4x256xf32>
    %c32_i32_37 = arith.constant 32 : i32
    %92 = tpu.dynamic_rotate %91 by %c32_i32_37 dim 1 : vector<4x256xf32>, i32 -> vector<4x256xf32>
    %c2_38 = arith.constant 2 : index
    %c0_39 = arith.constant 0 : index
    %93 = vector.load %arg3[%c2_38, %c0_39] : memref<10x256xf32, #tpu.memory_space<vmem>>, vector<1x256xf32>
    %cst_40 = arith.constant 0.000000e+00 : f32
    %94 = vector.broadcast %cst_40 : f32 to vector<1x256xf32>
    %95 = arith.cmpf one, %93, %94 : vector<1x256xf32>
    %96 = vector.shape_cast %95 : vector<1x256xi1> to vector<1x256xi1>
    %97 = vector.broadcast %96 : vector<1x256xi1> to vector<4x256xi1>
    %98 = arith.select %97, %92, %91 : vector<4x256xi1>, vector<4x256xf32>
    %c16_i32_41 = arith.constant 16 : i32
    %99 = tpu.dynamic_rotate %98 by %c16_i32_41 dim 1 : vector<4x256xf32>, i32 -> vector<4x256xf32>
    %c3_42 = arith.constant 3 : index
    %c0_43 = arith.constant 0 : index
    %100 = vector.load %arg3[%c3_42, %c0_43] : memref<10x256xf32, #tpu.memory_space<vmem>>, vector<1x256xf32>
    %cst_44 = arith.constant 0.000000e+00 : f32
    %101 = vector.broadcast %cst_44 : f32 to vector<1x256xf32>
    %102 = arith.cmpf one, %100, %101 : vector<1x256xf32>
    %103 = vector.shape_cast %102 : vector<1x256xi1> to vector<1x256xi1>
    %104 = vector.broadcast %103 : vector<1x256xi1> to vector<4x256xi1>
    %105 = arith.select %104, %99, %98 : vector<4x256xi1>, vector<4x256xf32>
    %c8_i32_45 = arith.constant 8 : i32
    %106 = tpu.dynamic_rotate %105 by %c8_i32_45 dim 1 : vector<4x256xf32>, i32 -> vector<4x256xf32>
    %c4_46 = arith.constant 4 : index
    %c0_47 = arith.constant 0 : index
    %107 = vector.load %arg3[%c4_46, %c0_47] : memref<10x256xf32, #tpu.memory_space<vmem>>, vector<1x256xf32>
    %cst_48 = arith.constant 0.000000e+00 : f32
    %108 = vector.broadcast %cst_48 : f32 to vector<1x256xf32>
    %109 = arith.cmpf one, %107, %108 : vector<1x256xf32>
    %110 = vector.shape_cast %109 : vector<1x256xi1> to vector<1x256xi1>
    %111 = vector.broadcast %110 : vector<1x256xi1> to vector<4x256xi1>
    %112 = arith.select %111, %106, %105 : vector<4x256xi1>, vector<4x256xf32>
    %c4_i32_49 = arith.constant 4 : i32
    %113 = tpu.dynamic_rotate %112 by %c4_i32_49 dim 1 : vector<4x256xf32>, i32 -> vector<4x256xf32>
    %c5_50 = arith.constant 5 : index
    %c0_51 = arith.constant 0 : index
    %114 = vector.load %arg3[%c5_50, %c0_51] : memref<10x256xf32, #tpu.memory_space<vmem>>, vector<1x256xf32>
    %cst_52 = arith.constant 0.000000e+00 : f32
    %115 = vector.broadcast %cst_52 : f32 to vector<1x256xf32>
    %116 = arith.cmpf one, %114, %115 : vector<1x256xf32>
    %117 = vector.shape_cast %116 : vector<1x256xi1> to vector<1x256xi1>
    %118 = vector.broadcast %117 : vector<1x256xi1> to vector<4x256xi1>
    %119 = arith.select %118, %113, %112 : vector<4x256xi1>, vector<4x256xf32>
    %c2_i32_53 = arith.constant 2 : i32
    %120 = tpu.dynamic_rotate %119 by %c2_i32_53 dim 1 : vector<4x256xf32>, i32 -> vector<4x256xf32>
    %c6_54 = arith.constant 6 : index
    %c0_55 = arith.constant 0 : index
    %121 = vector.load %arg3[%c6_54, %c0_55] : memref<10x256xf32, #tpu.memory_space<vmem>>, vector<1x256xf32>
    %cst_56 = arith.constant 0.000000e+00 : f32
    %122 = vector.broadcast %cst_56 : f32 to vector<1x256xf32>
    %123 = arith.cmpf one, %121, %122 : vector<1x256xf32>
    %124 = vector.shape_cast %123 : vector<1x256xi1> to vector<1x256xi1>
    %125 = vector.broadcast %124 : vector<1x256xi1> to vector<4x256xi1>
    %126 = arith.select %125, %120, %119 : vector<4x256xi1>, vector<4x256xf32>
    %c1_i32_57 = arith.constant 1 : i32
    %127 = tpu.dynamic_rotate %126 by %c1_i32_57 dim 1 : vector<4x256xf32>, i32 -> vector<4x256xf32>
    %c7_58 = arith.constant 7 : index
    %c0_59 = arith.constant 0 : index
    %128 = vector.load %arg3[%c7_58, %c0_59] : memref<10x256xf32, #tpu.memory_space<vmem>>, vector<1x256xf32>
    %cst_60 = arith.constant 0.000000e+00 : f32
    %129 = vector.broadcast %cst_60 : f32 to vector<1x256xf32>
    %130 = arith.cmpf one, %128, %129 : vector<1x256xf32>
    %131 = vector.shape_cast %130 : vector<1x256xi1> to vector<1x256xi1>
    %132 = vector.broadcast %131 : vector<1x256xi1> to vector<4x256xi1>
    %133 = arith.select %132, %127, %126 : vector<4x256xi1>, vector<4x256xf32>
    %c1_i32_61 = arith.constant 1 : i32
    %134 = tpu.dynamic_rotate %133 by %c1_i32_61 dim 1 : vector<4x256xf32>, i32 -> vector<4x256xf32>
    %c8_62 = arith.constant 8 : index
    %c0_63 = arith.constant 0 : index
    %135 = vector.load %arg3[%c8_62, %c0_63] : memref<10x256xf32, #tpu.memory_space<vmem>>, vector<1x256xf32>
    %cst_64 = arith.constant 0.000000e+00 : f32
    %136 = vector.broadcast %cst_64 : f32 to vector<1x256xf32>
    %137 = arith.cmpf one, %135, %136 : vector<1x256xf32>
    %138 = vector.shape_cast %137 : vector<1x256xi1> to vector<1x256xi1>
    %139 = vector.broadcast %138 : vector<1x256xi1> to vector<4x256xi1>
    %140 = arith.select %139, %134, %133 : vector<4x256xi1>, vector<4x256xf32>
    %c16_i32_65 = arith.constant 16 : i32
    %141 = tpu.dynamic_rotate %140 by %c16_i32_65 dim 1 : vector<4x256xf32>, i32 -> vector<4x256xf32>
    %c9_66 = arith.constant 9 : index
    %c0_67 = arith.constant 0 : index
    %142 = vector.load %arg3[%c9_66, %c0_67] : memref<10x256xf32, #tpu.memory_space<vmem>>, vector<1x256xf32>
    %cst_68 = arith.constant 0.000000e+00 : f32
    %143 = vector.broadcast %cst_68 : f32 to vector<1x256xf32>
    %144 = arith.cmpf one, %142, %143 : vector<1x256xf32>
    %145 = vector.shape_cast %144 : vector<1x256xi1> to vector<1x256xi1>
    %146 = vector.broadcast %145 : vector<1x256xi1> to vector<4x256xi1>
    %147 = arith.select %146, %141, %140 : vector<4x256xi1>, vector<4x256xf32>
    %148 = tpu.concatenate %73, %147 in 1 : vector<4x256xf32>, vector<4x256xf32> -> vector<4x512xf32>
    %c17_i32 = arith.constant 17 : i32
    %149 = tpu.dynamic_rotate %148 by %c17_i32 dim 1 : vector<4x512xf32>, i32 -> vector<4x512xf32>
    %c0_69 = arith.constant 0 : index
    %c0_70 = arith.constant 0 : index
    %150 = vector.load %arg4[%c0_69, %c0_70] : memref<9x512xf32, #tpu.memory_space<vmem>>, vector<1x512xf32>
    %151 = vector.broadcast %150 : vector<1x512xf32> to vector<4x512xf32>
    %152 = arith.mulf %149, %151 : vector<4x512xf32>
    %c16_i32_71 = arith.constant 16 : i32
    %153 = tpu.dynamic_rotate %148 by %c16_i32_71 dim 1 : vector<4x512xf32>, i32 -> vector<4x512xf32>
    %c1_72 = arith.constant 1 : index
    %c0_73 = arith.constant 0 : index
    %154 = vector.load %arg4[%c1_72, %c0_73] : memref<9x512xf32, #tpu.memory_space<vmem>>, vector<1x512xf32>
    %155 = vector.broadcast %154 : vector<1x512xf32> to vector<4x512xf32>
    %156 = arith.mulf %153, %155 : vector<4x512xf32>
    %c15_i32 = arith.constant 15 : i32
    %157 = tpu.dynamic_rotate %148 by %c15_i32 dim 1 : vector<4x512xf32>, i32 -> vector<4x512xf32>
    %c2_74 = arith.constant 2 : index
    %c0_75 = arith.constant 0 : index
    %158 = vector.load %arg4[%c2_74, %c0_75] : memref<9x512xf32, #tpu.memory_space<vmem>>, vector<1x512xf32>
    %159 = vector.broadcast %158 : vector<1x512xf32> to vector<4x512xf32>
    %160 = arith.mulf %157, %159 : vector<4x512xf32>
    %c1_i32_76 = arith.constant 1 : i32
    %161 = tpu.dynamic_rotate %148 by %c1_i32_76 dim 1 : vector<4x512xf32>, i32 -> vector<4x512xf32>
    %c3_77 = arith.constant 3 : index
    %c0_78 = arith.constant 0 : index
    %162 = vector.load %arg4[%c3_77, %c0_78] : memref<9x512xf32, #tpu.memory_space<vmem>>, vector<1x512xf32>
    %163 = vector.broadcast %162 : vector<1x512xf32> to vector<4x512xf32>
    %164 = arith.mulf %161, %163 : vector<4x512xf32>
    %c511_i32 = arith.constant 511 : i32
    %165 = tpu.dynamic_rotate %148 by %c511_i32 dim 1 : vector<4x512xf32>, i32 -> vector<4x512xf32>
    %c5_79 = arith.constant 5 : index
    %c0_80 = arith.constant 0 : index
    %166 = vector.load %arg4[%c5_79, %c0_80] : memref<9x512xf32, #tpu.memory_space<vmem>>, vector<1x512xf32>
    %167 = vector.broadcast %166 : vector<1x512xf32> to vector<4x512xf32>
    %168 = arith.mulf %165, %167 : vector<4x512xf32>
    %c497_i32 = arith.constant 497 : i32
    %169 = tpu.dynamic_rotate %148 by %c497_i32 dim 1 : vector<4x512xf32>, i32 -> vector<4x512xf32>
    %c6_81 = arith.constant 6 : index
    %c0_82 = arith.constant 0 : index
    %170 = vector.load %arg4[%c6_81, %c0_82] : memref<9x512xf32, #tpu.memory_space<vmem>>, vector<1x512xf32>
    %171 = vector.broadcast %170 : vector<1x512xf32> to vector<4x512xf32>
    %172 = arith.mulf %169, %171 : vector<4x512xf32>
    %c496_i32 = arith.constant 496 : i32
    %173 = tpu.dynamic_rotate %148 by %c496_i32 dim 1 : vector<4x512xf32>, i32 -> vector<4x512xf32>
    %c7_83 = arith.constant 7 : index
    %c0_84 = arith.constant 0 : index
    %174 = vector.load %arg4[%c7_83, %c0_84] : memref<9x512xf32, #tpu.memory_space<vmem>>, vector<1x512xf32>
    %175 = vector.broadcast %174 : vector<1x512xf32> to vector<4x512xf32>
    %176 = arith.mulf %173, %175 : vector<4x512xf32>
    %c495_i32 = arith.constant 495 : i32
    %177 = tpu.dynamic_rotate %148 by %c495_i32 dim 1 : vector<4x512xf32>, i32 -> vector<4x512xf32>
    %c8_85 = arith.constant 8 : index
    %c0_86 = arith.constant 0 : index
    %178 = vector.load %arg4[%c8_85, %c0_86] : memref<9x512xf32, #tpu.memory_space<vmem>>, vector<1x512xf32>
    %179 = vector.broadcast %178 : vector<1x512xf32> to vector<4x512xf32>
    %180 = arith.mulf %177, %179 : vector<4x512xf32>
    %c0_87 = arith.constant 0 : index
    %c0_88 = arith.constant 0 : index
    %181 = vector.load %arg5[%c0_87, %c0_88] : memref<4x36xbf16, #tpu.memory_space<vmem>>, vector<4x36xbf16>
    %182 = tpu.concatenate %152, %156, %160, %164, %148, %168, %172, %176, %180 in 0 : vector<4x512xf32>, vector<4x512xf32>, vector<4x512xf32>, vector<4x512xf32>, vector<4x512xf32>, vector<4x512xf32>, vector<4x512xf32>, vector<4x512xf32>, vector<4x512xf32> -> vector<36x512xf32>
    %183 = arith.truncf %182 : vector<36x512xf32> to vector<36x512xbf16>
    %cst_89 = arith.constant dense<0.000000e+00> : vector<4x512xf32>
    %184 = tpu.matmul %181, %183, %cst_89 {dimension_numbers = #tpu.dot_dimension_numbers<[1], [0], [0], [1], [0, 0, 1, 1], [], []>} : vector<4x36xbf16>, vector<36x512xbf16>, vector<4x512xf32> -> vector<4x512xf32>
    %c0_90 = arith.constant 0 : index
    %c0_91 = arith.constant 0 : index
    %185 = vector.load %arg6[%c0_90, %c0_91] : memref<4x1xf32, #tpu.memory_space<vmem>>, vector<4x1xf32>
    %186 = vector.broadcast %185 : vector<4x1xf32> to vector<4x512xf32>
    %187 = arith.mulf %184, %186 : vector<4x512xf32>
    %c0_92 = arith.constant 0 : index
    %c0_93 = arith.constant 0 : index
    %188 = vector.load %arg7[%c0_92, %c0_93] : memref<4x1xf32, #tpu.memory_space<vmem>>, vector<4x1xf32>
    %189 = vector.broadcast %188 : vector<4x1xf32> to vector<4x512xf32>
    %190 = arith.addf %187, %189 : vector<4x512xf32>
    %cst_94 = arith.constant 0.000000e+00 : f32
    %191 = vector.broadcast %cst_94 : f32 to vector<4x512xf32>
    %192 = arith.maximumf %190, %191 : vector<4x512xf32>
    %c0_95 = arith.constant 0 : index
    %c0_96 = arith.constant 0 : index
    %c0_97 = arith.constant 0 : index
    %193 = vector.load %arg2[%c0_95, %c0_96, %c0_97] : memref<2x4x256xf32, #tpu.memory_space<vmem>>, vector<1x4x256xf32>
    %194 = vector.shape_cast %193 : vector<1x4x256xf32> to vector<4x256xf32>
    %c1_98 = arith.constant 1 : index
    %c0_99 = arith.constant 0 : index
    %c0_100 = arith.constant 0 : index
    %195 = vector.load %arg2[%c1_98, %c0_99, %c0_100] : memref<2x4x256xf32, #tpu.memory_space<vmem>>, vector<1x4x256xf32>
    %196 = vector.shape_cast %195 : vector<1x4x256xf32> to vector<4x256xf32>
    %197 = tpu.concatenate %194, %196 in 1 : vector<4x256xf32>, vector<4x256xf32> -> vector<4x512xf32>
    %198 = arith.addf %192, %197 : vector<4x512xf32>
    %c17_i32_101 = arith.constant 17 : i32
    %199 = tpu.dynamic_rotate %198 by %c17_i32_101 dim 1 : vector<4x512xf32>, i32 -> vector<4x512xf32>
    %c0_102 = arith.constant 0 : index
    %c0_103 = arith.constant 0 : index
    %200 = vector.load %arg4[%c0_102, %c0_103] : memref<9x512xf32, #tpu.memory_space<vmem>>, vector<1x512xf32>
    %201 = vector.broadcast %200 : vector<1x512xf32> to vector<4x512xf32>
    %202 = arith.mulf %199, %201 : vector<4x512xf32>
    %c16_i32_104 = arith.constant 16 : i32
    %203 = tpu.dynamic_rotate %198 by %c16_i32_104 dim 1 : vector<4x512xf32>, i32 -> vector<4x512xf32>
    %c1_105 = arith.constant 1 : index
    %c0_106 = arith.constant 0 : index
    %204 = vector.load %arg4[%c1_105, %c0_106] : memref<9x512xf32, #tpu.memory_space<vmem>>, vector<1x512xf32>
    %205 = vector.broadcast %204 : vector<1x512xf32> to vector<4x512xf32>
    %206 = arith.mulf %203, %205 : vector<4x512xf32>
    %c15_i32_107 = arith.constant 15 : i32
    %207 = tpu.dynamic_rotate %198 by %c15_i32_107 dim 1 : vector<4x512xf32>, i32 -> vector<4x512xf32>
    %c2_108 = arith.constant 2 : index
    %c0_109 = arith.constant 0 : index
    %208 = vector.load %arg4[%c2_108, %c0_109] : memref<9x512xf32, #tpu.memory_space<vmem>>, vector<1x512xf32>
    %209 = vector.broadcast %208 : vector<1x512xf32> to vector<4x512xf32>
    %210 = arith.mulf %207, %209 : vector<4x512xf32>
    %c1_i32_110 = arith.constant 1 : i32
    %211 = tpu.dynamic_rotate %198 by %c1_i32_110 dim 1 : vector<4x512xf32>, i32 -> vector<4x512xf32>
    %c3_111 = arith.constant 3 : index
    %c0_112 = arith.constant 0 : index
    %212 = vector.load %arg4[%c3_111, %c0_112] : memref<9x512xf32, #tpu.memory_space<vmem>>, vector<1x512xf32>
    %213 = vector.broadcast %212 : vector<1x512xf32> to vector<4x512xf32>
    %214 = arith.mulf %211, %213 : vector<4x512xf32>
    %c511_i32_113 = arith.constant 511 : i32
    %215 = tpu.dynamic_rotate %198 by %c511_i32_113 dim 1 : vector<4x512xf32>, i32 -> vector<4x512xf32>
    %c5_114 = arith.constant 5 : index
    %c0_115 = arith.constant 0 : index
    %216 = vector.load %arg4[%c5_114, %c0_115] : memref<9x512xf32, #tpu.memory_space<vmem>>, vector<1x512xf32>
    %217 = vector.broadcast %216 : vector<1x512xf32> to vector<4x512xf32>
    %218 = arith.mulf %215, %217 : vector<4x512xf32>
    %c497_i32_116 = arith.constant 497 : i32
    %219 = tpu.dynamic_rotate %198 by %c497_i32_116 dim 1 : vector<4x512xf32>, i32 -> vector<4x512xf32>
    %c6_117 = arith.constant 6 : index
    %c0_118 = arith.constant 0 : index
    %220 = vector.load %arg4[%c6_117, %c0_118] : memref<9x512xf32, #tpu.memory_space<vmem>>, vector<1x512xf32>
    %221 = vector.broadcast %220 : vector<1x512xf32> to vector<4x512xf32>
    %222 = arith.mulf %219, %221 : vector<4x512xf32>
    %c496_i32_119 = arith.constant 496 : i32
    %223 = tpu.dynamic_rotate %198 by %c496_i32_119 dim 1 : vector<4x512xf32>, i32 -> vector<4x512xf32>
    %c7_120 = arith.constant 7 : index
    %c0_121 = arith.constant 0 : index
    %224 = vector.load %arg4[%c7_120, %c0_121] : memref<9x512xf32, #tpu.memory_space<vmem>>, vector<1x512xf32>
    %225 = vector.broadcast %224 : vector<1x512xf32> to vector<4x512xf32>
    %226 = arith.mulf %223, %225 : vector<4x512xf32>
    %c495_i32_122 = arith.constant 495 : i32
    %227 = tpu.dynamic_rotate %198 by %c495_i32_122 dim 1 : vector<4x512xf32>, i32 -> vector<4x512xf32>
    %c8_123 = arith.constant 8 : index
    %c0_124 = arith.constant 0 : index
    %228 = vector.load %arg4[%c8_123, %c0_124] : memref<9x512xf32, #tpu.memory_space<vmem>>, vector<1x512xf32>
    %229 = vector.broadcast %228 : vector<1x512xf32> to vector<4x512xf32>
    %230 = arith.mulf %227, %229 : vector<4x512xf32>
    %c0_125 = arith.constant 0 : index
    %c0_126 = arith.constant 0 : index
    %231 = vector.load %arg8[%c0_125, %c0_126] : memref<8x36xbf16, #tpu.memory_space<vmem>>, vector<8x36xbf16>
    %232 = tpu.concatenate %202, %206, %210, %214, %198, %218, %222, %226, %230 in 0 : vector<4x512xf32>, vector<4x512xf32>, vector<4x512xf32>, vector<4x512xf32>, vector<4x512xf32>, vector<4x512xf32>, vector<4x512xf32>, vector<4x512xf32>, vector<4x512xf32> -> vector<36x512xf32>
    %233 = arith.truncf %232 : vector<36x512xf32> to vector<36x512xbf16>
    %cst_127 = arith.constant dense<0.000000e+00> : vector<8x512xf32>
    %234 = tpu.matmul %231, %233, %cst_127 {dimension_numbers = #tpu.dot_dimension_numbers<[1], [0], [0], [1], [0, 0, 1, 1], [], []>} : vector<8x36xbf16>, vector<36x512xbf16>, vector<8x512xf32> -> vector<8x512xf32>
    %c0_128 = arith.constant 0 : index
    %c0_129 = arith.constant 0 : index
    %235 = vector.load %arg9[%c0_128, %c0_129] : memref<8x1xf32, #tpu.memory_space<vmem>>, vector<8x1xf32>
    %236 = vector.broadcast %235 : vector<8x1xf32> to vector<8x512xf32>
    %237 = arith.mulf %234, %236 : vector<8x512xf32>
    %c0_130 = arith.constant 0 : index
    %c0_131 = arith.constant 0 : index
    %238 = vector.load %arg10[%c0_130, %c0_131] : memref<8x1xf32, #tpu.memory_space<vmem>>, vector<8x1xf32>
    %239 = vector.broadcast %238 : vector<8x1xf32> to vector<8x512xf32>
    %240 = arith.addf %237, %239 : vector<8x512xf32>
    %cst_132 = arith.constant 0.000000e+00 : f32
    %241 = vector.broadcast %cst_132 : f32 to vector<8x512xf32>
    %242 = arith.maximumf %240, %241 : vector<8x512xf32>
    %243 = vector.extract_strided_slice %242 {offsets = [0, 0], sizes = [8, 256], strides = [1, 1]} : vector<8x512xf32> to vector<8x256xf32>
    %c0_133 = arith.constant 0 : index
    %c0_134 = arith.constant 0 : index
    %c0_135 = arith.constant 0 : index
    %244 = vector.load %arg11[%c0_133, %c0_134, %c0_135] : memref<2x8x256xf32, #tpu.memory_space<vmem>>, vector<1x8x256xf32>
    %245 = vector.shape_cast %244 : vector<1x8x256xf32> to vector<8x256xf32>
    %246 = vector.shape_cast %243 : vector<8x256xf32> to vector<1x8x256xf32>
    tpu.vector_store %arg11[%c0_133, %c0_134, %c0_135], %246 {strides = array<i32>} : memref<2x8x256xf32, #tpu.memory_space<vmem>>, vector<1x8x256xf32>,
    %247 = vector.extract_strided_slice %242 {offsets = [0, 256], sizes = [8, 256], strides = [1, 1]} : vector<8x512xf32> to vector<8x256xf32>
    %c1_136 = arith.constant 1 : index
    %c0_137 = arith.constant 0 : index
    %c0_138 = arith.constant 0 : index
    %248 = vector.load %arg11[%c1_136, %c0_137, %c0_138] : memref<2x8x256xf32, #tpu.memory_space<vmem>>, vector<1x8x256xf32>
    %249 = vector.shape_cast %248 : vector<1x8x256xf32> to vector<8x256xf32>
    %250 = vector.shape_cast %247 : vector<8x256xf32> to vector<1x8x256xf32>
    tpu.vector_store %arg11[%c1_136, %c0_137, %c0_138], %250 {strides = array<i32>} : memref<2x8x256xf32, #tpu.memory_space<vmem>>, vector<1x8x256xf32>,
    return
  }
  func.func @transform_0(%arg0: i32) -> (i32, i32, i32) {
    %c0_i32 = arith.constant 0 : i32
    %c0_i32_0 = arith.constant 0 : i32
    %c0_i32_1 = arith.constant 0 : i32
    return %arg0, %c0_i32, %c0_i32_0 : i32, i32, i32
  }
  func.func @transform_1(%arg0: i32) -> (i32, i32, i32) {
    %c0_i32 = arith.constant 0 : i32
    %c0_i32_0 = arith.constant 0 : i32
    %c0_i32_1 = arith.constant 0 : i32
    return %arg0, %c0_i32, %c0_i32_0 : i32, i32, i32
  }
  func.func @transform_2(%arg0: i32) -> (i32, i32) {
    %c0_i32 = arith.constant 0 : i32
    %c0_i32_0 = arith.constant 0 : i32
    %c0_i32_1 = arith.constant 0 : i32
    return %c0_i32, %c0_i32_0 : i32, i32
  }
  func.func @transform_3(%arg0: i32) -> (i32, i32) {
    %c0_i32 = arith.constant 0 : i32
    %c0_i32_0 = arith.constant 0 : i32
    %c0_i32_1 = arith.constant 0 : i32
    return %c0_i32, %c0_i32_0 : i32, i32
  }
  func.func @transform_4(%arg0: i32) -> (i32, i32) {
    %c0_i32 = arith.constant 0 : i32
    %c0_i32_0 = arith.constant 0 : i32
    %c0_i32_1 = arith.constant 0 : i32
    return %c0_i32, %c0_i32_0 : i32, i32
  }
  func.func @transform_5(%arg0: i32) -> (i32, i32) {
    %c0_i32 = arith.constant 0 : i32
    %c0_i32_0 = arith.constant 0 : i32
    %c0_i32_1 = arith.constant 0 : i32
    return %c0_i32, %c0_i32_0 : i32, i32
  }
  func.func @transform_6(%arg0: i32) -> (i32, i32) {
    %c0_i32 = arith.constant 0 : i32
    %c0_i32_0 = arith.constant 0 : i32
    %c0_i32_1 = arith.constant 0 : i32
    return %c0_i32, %c0_i32_0 : i32, i32
  }
  func.func @transform_7(%arg0: i32) -> (i32, i32) {
    %c0_i32 = arith.constant 0 : i32
    %c0_i32_0 = arith.constant 0 : i32
    %c0_i32_1 = arith.constant 0 : i32
    return %c0_i32, %c0_i32_0 : i32, i32
  }
  func.func @transform_8(%arg0: i32) -> (i32, i32) {
    %c0_i32 = arith.constant 0 : i32
    %c0_i32_0 = arith.constant 0 : i32
    %c0_i32_1 = arith.constant 0 : i32
    return %c0_i32, %c0_i32_0 : i32, i32
  }
  func.func @transform_9(%arg0: i32) -> (i32, i32) {
    %c0_i32 = arith.constant 0 : i32
    %c0_i32_0 = arith.constant 0 : i32
    %c0_i32_1 = arith.constant 0 : i32
    return %c0_i32, %c0_i32_0 : i32, i32
  }
  func.func @transform_10(%arg0: i32) -> (i32, i32, i32) {
    %c0_i32 = arith.constant 0 : i32
    %c0_i32_0 = arith.constant 0 : i32
    %c0_i32_1 = arith.constant 0 : i32
    return %arg0, %c0_i32, %c0_i32_0 : i32, i32, i32
  }
}

</mosaic_0001>

<bundles_post_ra>
// kernel: tpu_custom_call.1
= control target key start
LH: loop header
LB: loop body
LE: loop exit
PB: predicated region body
PF: predicated region fallthrough
CT: control target
= control target key end

     0   :  { %s2726_s0 = inlined_call_operand.vmem [shape: f32[4,4,64], index: 0, kind: input, shape index: {}]   ;;  %s2727_s1 = inlined_call_operand.hbm [shape: f32[4,4,256], index: 1, kind: input, shape index: {}]   ;;  %s2728_s2 = inlined_call_operand.hbm [shape: f32[10,256], index: 2, kind: input, shape index: {}]   ;;  %s2729_s3 = inlined_call_operand.hbm [shape: f32[9,512], index: 3, kind: input, shape index: {}]   ;;  %s2730_s4 = inlined_call_operand.vmem [shape: bf16[4,36], index: 4, kind: input, shape index: {}]   ;;  %s2731_s5 = inlined_call_operand.vmem [shape: f32[4,1], index: 5, kind: input, shape index: {}]   ;;  %s2732_s6 = inlined_call_operand.vmem [shape: f32[4,1], index: 6, kind: input, shape index: {}]   ;;  %s2733_s7 = inlined_call_operand.vmem [shape: bf16[8,36], index: 7, kind: input, shape index: {}]   ;;  %s2734_s8 = inlined_call_operand.vmem [shape: f32[8,1], index: 8, kind: input, shape index: {}]   ;;  %s2735_s9 = inlined_call_operand.vmem [shape: f32[8,1], index: 9, kind: input, shape index: {}]   ;;  %s2736_s10 = inlined_call_operand.hbm [shape: f32[4,8,256], index: 10, kind: output, shape index: {}]  }
   0x1   :  { %2745 = sst [smem:[#allocation14_spill]] %s2728_s2 }
   0x2   :  { %2746 = sst [smem:[#allocation15_spill]] %s2729_s3 }
   0x3   :  { %15 = vsyncpa [#allocation3], 0 }
   0x4   :  { %17 = vsyncpa [#allocation3 + $0x1], 0 }
   0x5   :  { %18 = vsyncpa [#allocation6], 0 }
   0x6   :  { %19 = vsyncpa [#allocation4], 0 }
   0x7   :  { %21 = vsyncpa [#allocation4 + $0x1], 0  ;;  %s1883_s13 = smov 0   ;;  %s1885_s14 = smov 0  }
   0x8   :  { %s1887_s15 = smov 0   ;;  %s1889_s16 = smov 0  }
   0x9 LB: > { %2747 = sst [smem:[#allocation12_spill]] %s1799_s15  ;;  %s1904_s17 = sadd.s32 4294967295, %s1803_s16   ;;  %s1803_s16 = sphi %s1889_s16, %s2767_s16   ;;  %s1799_s15 = sphi %s1887_s15, %s2764_s15   ;;  %s1795_s14 = sphi %s1885_s14, %s2766_s14   ;;  %s1791_s13 = sphi %s1883_s13, %s2765_s13  }
   0xa   : > { %s1514_s18 = sadd.s32 4294967294, %s1803_s16   ;;  %p73_p0 = scmp.ne.s32.totalorder %s1795_s14, %s1791_s13 }
   0xb   : > { %p74_p1 = scmp.eq.s32.totalorder %s1904_s17, 0  ;;  %p265_p2 = scmp.eq.s32.totalorder %s1904_s17, 1 }
   0xc   : > { %p271_p3 = scmp.eq.s32.totalorder %s1514_s18, 1  ;;  %p1515_p5 = scmp.ge.s32.totalorder %s1803_s16, 1 }
   0xd   : > { %p1913_p4 = por %p74_p1, %p73_p0  ;;  %p278_p7 = scmp.lt.s32.totalorder %s1803_s16, 3 }
   0xe   : > { %p1918_p6 = por %p271_p3, %p73_p0  ;;  %s2750_s2 = sld [smem:[#allocation14_spill]] }
   0xf   : > { %p1926_p8 = pnand %p1515_p5, %p278_p7  ;;  %s1805_s25 = smov [#allocation5]  }
  0x10   : > { %s291_s26 = sshll.u32 %s1805_s25, 4  ;;  %s2752_s3 = sld [smem:[#allocation15_spill]]  ;;  %s292_s26 = int_to_ptr.vmem [resolvable:$true] %s291_s26 }
  0x11   : > { %p1564_p9 = pneg %p1926_p8  ;;  %s1806_s30 = smov 256  }
  0x12   : > { %s1807_s11 = smov 16   ;;  %s1808_s12 = smov [#allocation7]  }
  0x13   : > { %p1565_p10 = pnand %p1564_p9, %p74_p1  ;;  %s305_s18 = sshll.u32 %s1808_s12, 4  ;;  %s306_s18 = int_to_ptr.vmem [resolvable:$true] %s305_s18 }
  0x14   : > { %s289_s23 = sshll.u32 %s2750_s2, 4  ;;  %s1809_s21 = smov 512   ;;  %s290_s23 = int_to_ptr.hbm [resolvable:$true] %s289_s23 }
  0x15   : > { %1567 = dma.hbm_to_vmem [thread:$0]  (!%p1565_p10), %s290_s23, 512, %s292_s26, [#allocation6], %s1806_s30, %s1806_s30, %s1807_s11  }
  0x16   : > { %s303_s29 = sshll.u32 %s2752_s3, 4  ;;  %s1810_s22 = smov 32   ;;  %s304_s29 = int_to_ptr.hbm [resolvable:$true] %s303_s29 }
  0x17   : > { %1570 = dma.hbm_to_vmem [thread:$0]  (!%p1565_p10), %s304_s29, 1024, %s306_s18, [#allocation6], %s1809_s21, %s1809_s21, %s1810_s22  }
  0x18   : > { %s1939_s25 = sadd.s32 1, %s1803_s16   ;;  %s60_s28 = sadd.s32 1, %s1799_s15 }
  0x19   : > { %s57_s27 = ssub.s32 %s1803_s16, %s1939_s25  ;;  %p67_p13 = scmp.ne.s32.totalorder %s1799_s15, %s1795_s14 }
  0x1a   : > { %p58_p12 = scmp.eq.s32.totalorder %s57_s27, 0  ;;  %p68_p0 = scmp.eq.s32.totalorder %s1803_s16, 0 }
  0x1b   : > { %p1952_p5 = por %p265_p2, %p67_p13  ;;  %p1581_p7 = scmp.lt.s32.totalorder %s1803_s16, 2 }
  0x1c   : > { %s1948_s2 = scalar_select %p58_p12, %s1799_s15, %s60_s28  }
  0x1d   : > { %p69_p3 = por %p68_p0, %p67_p13  ;;  %s346_s26 = sand.u32 1, %s1799_s15  }
  0x1e   : > { %2753 = sst [smem:[#allocation13_spill]] %s1948_s2  ;;  %s1519_s30 = sshll.u32 %s346_s26, 4 }
  0x1f   : > { %s1549_s29 = sshll.u32 %s1803_s16, 4  ;;  %s350_s21 = scalar_lea.vmem [#allocation2], %s1519_s30 }
  0x20   : > { %s356_s18 = scalar_lea.hbm %s2727_s1, %s1549_s29  ;;  %s359_s22 = sshll.u32 %s350_s21, 4  ;;  %s360_s22 = int_to_ptr.vmem [resolvable:$true] %s359_s22 }
  0x21   : > { %s357_s27 = sshll.u32 %s356_s18, 4  ;;  %p1962_p9 = pnand %p1581_p7, %p69_p3  ;;  %s358_s27 = int_to_ptr.hbm [resolvable:$true] %s357_s27 }
  0x22   : > { %s347_s3 = scalar_lea.sflag [#allocation3], %s346_s26  ;;  %s1703_s2 = sshra.s32 %s358_s27, 4  ;;  %s1704_s2 = int_to_ptr.hbm [resolvable:$true] %s1703_s2 }
  0x23   : > { %s1705_s15 = scalar_lea.hbm %s1704_s2, 16  ;;  %p1707_p10 = pneg %p1962_p9 }
  0x24   : > { %p1706_p2 = scmp.ne.s32.totalorder %s1704_s2, %s1705_s15  ;;  %s1710_s11 = scalar_lea.hbm %s2727_s1, 32 }
  0x25   : > { %p1711_p0 = scmp.lt.s32.totalorder %s1704_s2, %s2727_s1  ;;  %p1712_p3 = scmp.lt.s32.totalorder %s1710_s11, %s1705_s15 }
  0x26   : > { %p1708_p12 = pnand %p1707_p10, %p1706_p2 }
  0x27   : > { %p1713_p7 = por %p1712_p3, %p1711_p0 }
  0x28   : > { %p1709_p13 = pneg %p1708_p12 }
  0x2a   : > { %p1714_p11 = pnand %p1713_p7, %p1709_p13 }
  0x2c   : > { %1717 = shalt.err (!%p1714_p11)
}
  0x2d   : > { %s1811_s26 = smov 128   ;;  %s1812_s21 = smov 8  }
  0x2e   : > { %1574 = dma.hbm_to_vmem [thread:$0]  (!%p1962_p9), %s358_s27, 256, %s360_s22, %s347_s3, %s1811_s26, %s1811_s26, %s1812_s21  }
  0x2f   : > { %371 = sbr.rel (%p1926_p8) target bundleno = 1807 (0x70f), region = 60  ;;  %s1979_s29 = sand.u32 (!%p1926_p8), 1, %s1795_s14  }
  0x30   : > { %s1524_s30 = sshll.u32 (!%p1926_p8), %s1979_s29, 4  ;;  %s374_s2 = scalar_lea.sflag (!%p1926_p8), [#allocation3], %s1979_s29 }
  0x31   : > { %s1983_s15 = scalar_lea.vmem (!%p1926_p8), [#allocation2], %s1524_s30 }
  0x34   : > { %1778 = dma.done.wait (%p1913_p4), %s374_s2, 256  }
  0x35   : > { %1780 = vsyncadd (%p1913_p4), %s374_s2, 4294967040 }
  0x36   : > { %1782 = dma.done.wait (%p74_p1), [#allocation6], 1536  }
  0x37   : > { %1784 = vsyncadd (%p74_p1), [#allocation6], 4294965760  ;;  %s1528_s3 = sshll.u32 %s1904_s17, 1  ;;  %v1813_v0 = vmov 0   ;;  %vm440_vm0 = vcmask 523264   ;;  %s1814_s28 = smov 64   ;;  %v455_v14 = vlaneseq }
  0x38   : > { %p431_p8 = scmp.lt.s32.totalorder %s1528_s3, 3  ;;  %1641 = vset.pattern.permute.xlu0 %v1813_v0  ;;  %1640 = vset.pattern.permute.xlu2 %v1813_v0  ;;  %v442_v1 = vld [vmem:[#allocation5] ss:$8 sm:$0x3]  ;;  %s1815_s11 = smov 32  }
  0x39   : > { %1642 = vset.pattern.permute.xlu1 %v1813_v0  ;;  %vm443_vm1 = vcmp.ne.f32.partialorder %v442_v1, 0.0  ;;  %v461_v13 = vld [vmem:[#allocation5 + $0x1] ss:$8 sm:$0x3]  ;;  %v2002_v18 = vand.u32 127, %v455_v14  ;;  %s1816_s12 = smov 16  }
  0x3a   : > { %s2769_s3 = smov (!%p431_p8, %s1528_s3), 3  ;;  %v444_v4 = vsel %vm443_vm1, 1, %v1813_v0  ;;  %vm462_vm4 = vcmp.ne.f32.partialorder %v461_v13, 0.0  ;;  %v478_v31 = vld [vmem:[#allocation5 + $0x2] ss:$8 sm:$0x3] }
  0x3b   : > { %s1529_s24 = sshll.u32 %s2769_s3, 2  ;;  %v445_v5 = vperm.slane %v444_v4, 0  ;;  %v446_v8 = vperm.slane %v444_v4, 1  ;;  %v463_v17 = vsel %vm462_vm4, 1, %v1813_v0  ;;  %vm457_vm5 = vcmp.lt.s32.totalorder %v2002_v18, 64  ;;  %s1817_s18 = smov 8  }
  0x3c   : > { %s434_s27 = scalar_lea.vmem %s2726_s0, %s1529_s24  ;;  %v465_v19 = vperm.slane %v463_v17, 1  ;;  %v464_v20 = vperm.slane %v463_v17, 0  ;;  %vm479_vm8 = vcmp.ne.f32.partialorder %v478_v31, 0.0  ;;  %vm474_vm9 = vcmp.lt.s32.totalorder %v2002_v18, 32  ;;  %s1818_s26 = smov 4  }
  0x3d   : > { %v1530_v2 = vld [vmem:[%s434_s27 + $0x4] sm:$0xf]  ;;  %v439_v3 = vld [vmem:[%s434_s27] sm:$0xf]  ;;  %vm447_vm2 = vcmp.eq.s32.totalorder %v445_v5, 1  ;;  %vm448_vm3 = vcmp.eq.s32.totalorder %v446_v8, 1 }
  0x3e   : > { %v606_v6 = vsel %vm440_vm0, %v1530_v2, 0.0  ;;  %v441_v7 = vsel %vm440_vm0, %v439_v3, 0.0  ;;  %vm467_vm6 = vcmp.eq.s32.totalorder %v465_v19, 1  ;;  %vm466_vm7 = vcmp.eq.s32.totalorder %v464_v20, 1  ;;  %s1819_s21 = smov 2   ;;  %s2738_s30 = smov 1  }
  0x3f   : > { %v607_v9 = vsel %vm447_vm2, 0.0, %v606_v6  ;;  %v449_v10 = vsel %vm447_vm2, 0.0, %v441_v7  ;;  %v608_v11 = vsel %vm448_vm3, %v606_v6, 0.0  ;;  %v450_v12 = vsel %vm448_vm3, %v441_v7, 0.0  ;;  %s1821_s2 = smov 111   ;;  %s1822_s3 = smov 127  }
  0x40   : > { %609 = vrot.lane.b32.xlu1 %v607_v9, %s1814_s28  ;;  %451 = vrot.lane.b32.xlu0 %v449_v10, %s1814_s28  ;;  %v480_v33 = vsel %vm479_vm8, 1, %v1813_v0  ;;  %v495_v47 = vld [vmem:[#allocation5 + $0x3] ss:$8 sm:$0x3]  ;;  %vm491_vm13 = vcmp.lt.s32.totalorder %v2002_v18, 16  ;;  %vm508_vm1 = vcmp.lt.s32.totalorder %v2002_v18, 8 }
  0x41   : > { %v481_v34 = vperm.slane %v480_v33, 0  ;;  %v482_v35 = vperm.slane %v480_v33, 1  ;;  %vm496_vm12 = vcmp.ne.f32.partialorder %v495_v47, 0.0  ;;  %v512_v63 = vld [vmem:[#allocation5 + $0x4] ss:$8 sm:$0x3] }
  0x42   : > { %v497_v48 = vsel %vm496_vm12, 1, %v1813_v0  ;;  %vm513_vm0 = vcmp.ne.f32.partialorder %v512_v63, 0.0  ;;  %v546_v33 = vld [vmem:[#allocation5 + $0x6] ss:$8 sm:$0x3]  ;;  %s1823_s24 = smov 112  }
  0x43   : > { %vm483_vm10 = vcmp.eq.s32.totalorder %v481_v34, 1  ;;  %vm484_vm11 = vcmp.eq.s32.totalorder %v482_v35, 1  ;;  %v498_v49 = vperm.slane %v497_v48, 0  ;;  %v499_v50 = vperm.slane %v497_v48, 1  ;;  %s1824_s19 = smov 113   ;;  %s1825_s22 = smov 17  }
  0x44   : > { %v514_v1 = vsel %vm513_vm0, 1, %v1813_v0  ;;  %vm547_vm8 = vcmp.ne.f32.partialorder %v546_v33, 0.0  ;;  %s1826_s27 = smov 15  }
  0x45   : > { %vm500_vm14 = vcmp.eq.s32.totalorder %v498_v49, 1  ;;  %vm501_vm15 = vcmp.eq.s32.totalorder %v499_v50, 1  ;;  %v515_v2 = vperm.slane %v514_v1, 0  ;;  %v516_v3 = vperm.slane %v514_v1, 1 }
  0x46   : > { %v548_v34 = vsel %vm547_vm8, 1, %v1813_v0  ;;  %v563_v49 = vld [vmem:[#allocation5 + $0x7] ss:$8 sm:$0x3]  ;;  %vm984_vm8 = vcmask 1041408  }
  0x47   : > { %vm517_vm2 = vcmp.eq.s32.totalorder %v515_v2, 1  ;;  %vm518_vm3 = vcmp.eq.s32.totalorder %v516_v3, 1  ;;  %v549_v35 = vperm.slane %v548_v34, 0  ;;  %vm564_vm12 = vcmp.ne.f32.partialorder %v563_v49, 0.0 }
  0x48   : > { %611 = vrot.lane.b32.xlu1 %v608_v11, %s1814_s28  ;;  %453 = vrot.lane.b32.xlu0 %v450_v12, %s1814_s28  ;;  %v565_v50 = vsel %vm564_vm12, 1, %v1813_v0  ;;  %v579_v2 = vld [vmem:[#allocation5 + $0x10] ss:$8 sm:$0x3]  ;;  %vm951_vm12 = vcmask 1043456   ;;  %s1551_s28 = sshll.u32 %s1904_s17, 5 }
  0xb2   : > { %v610_v15 = vpop.permute.xlu1 %609  ;;  %v452_v16 = vpop.permute.xlu0 %451 }
  0xba   : > { %v612_v21 = vpop.permute.xlu1 %611  ;;  %v454_v22 = vpop.permute.xlu0 %453 }
  0xbb   : > { %v613_v23 = vsel %vm457_vm5, %v610_v15, %v612_v21  ;;  %v614_v24 = vsel %vm457_vm5, %v612_v21, %v610_v15  ;;  %v459_v25 = vsel %vm457_vm5, %v454_v22, %v452_v16  ;;  %v458_v29 = vsel %vm457_vm5, %v452_v16, %v454_v22  ;;  %v529_v16 = vld [vmem:[#allocation5 + $0x5] ss:$8 sm:$0x3] }
  0xbc   : > { %v616_v26 = vsel %vm467_vm6, %v613_v23, %v608_v11  ;;  %v615_v27 = vsel %vm466_vm7, %v614_v24, %v607_v9  ;;  %v468_v28 = vsel %vm466_vm7, %v459_v25, %v449_v10  ;;  %v469_v30 = vsel %vm467_vm6, %v458_v29, %v450_v12 }
  0xbd   : > { %619 = vrot.lane.b32.xlu1 %v616_v26, %s1815_s11  ;;  %617 = vrot.lane.b32.xlu0 %v615_v27, %s1815_s11  ;;  %vm530_vm4 = vcmp.ne.f32.partialorder %v529_v16, 0.0  ;;  %vm525_vm5 = vcmp.lt.s32.totalorder %v2002_v18, 4 }
  0xbe   : > { %470 = vrot.lane.b32.xlu2 %v468_v28, %s1815_s11  ;;  %v531_v17 = vsel %vm530_vm4, 1, %v1813_v0 }
  0xbf   : > { %v532_v19 = vperm.slane %v531_v17, 0  ;;  %v533_v20 = vperm.slane %v531_v17, 1 }
  0xc1   : > { %vm534_vm6 = vcmp.eq.s32.totalorder %v532_v19, 1  ;;  %vm535_vm7 = vcmp.eq.s32.totalorder %v533_v20, 1  ;;  %v595_v19 = vld [vmem:[#allocation5 + $0x11] ss:$8 sm:$0x3] }
  0xc2   : > { %vm596_vm4 = vcmp.ne.f32.partialorder %v595_v19, 0.0 }
  0xc3   : > { %v597_v20 = vsel %vm596_vm4, 1, %v1813_v0 }
  0xc6   : > { %472 = vrot.lane.b32.xlu2 %v469_v30, %s1815_s11 }
 0x118   : > { %v471_v32 = vpop.permute.xlu2 %470 }
 0x120   : > { %v473_v36 = vpop.permute.xlu2 %472 }
 0x121   : > { %v475_v37 = vsel %vm474_vm9, %v471_v32, %v473_v36  ;;  %v476_v38 = vsel %vm474_vm9, %v473_v36, %v471_v32  ;;  %v550_v36 = vperm.slane %v548_v34, 1 }
 0x122   : > { %v485_v39 = vsel %vm483_vm10, %v476_v38, %v468_v28  ;;  %v486_v40 = vsel %vm484_vm11, %v475_v37, %v469_v30 }
 0x123   : > { %487 = vrot.lane.b32.xlu2 %v485_v39, %s1816_s12  ;;  %489 = vrot.lane.b32.xlu0 %v486_v40, %s1816_s12 }
 0x12f   : > { %v620_v41 = vpop.permute.xlu1 %619  ;;  %v618_v42 = vpop.permute.xlu0 %617 }
 0x130   : > { %v621_v43 = vsel %vm474_vm9, %v618_v42, %v620_v41  ;;  %v622_v44 = vsel %vm474_vm9, %v620_v41, %v618_v42  ;;  %vm542_vm9 = vcmp.lt.s32.totalorder %v2002_v18, 2 }
 0x131   : > { %v623_v45 = vsel %vm483_vm10, %v622_v44, %v615_v27  ;;  %v624_v46 = vsel %vm484_vm11, %v621_v43, %v616_v26  ;;  %vm551_vm10 = vcmp.eq.s32.totalorder %v549_v35, 1  ;;  %vm552_vm11 = vcmp.eq.s32.totalorder %v550_v36, 1  ;;  %v2139_v35 = vld [vmem:[#allocation7 + $0x20] ss:$8 sm:$0xf] }
 0x132   : > { %625 = vrot.lane.b32.xlu1 %v623_v45, %s1816_s12  ;;  %627 = vrot.lane.b32.xlu2 %v624_v46, %s1816_s12  ;;  %v893_v36 = vperm.slane %v2139_v35, 3 }
 0x17d   : > { %v488_v51 = vpop.permute.xlu2 %487 }
 0x18c   : > { %v628_v57 = vpop.permute.xlu2 %627 }
 0x195   : > { %v490_v52 = vpop.permute.xlu0 %489 }
 0x196   : > { %v492_v53 = vsel %vm491_vm13, %v488_v51, %v490_v52  ;;  %v493_v54 = vsel %vm491_vm13, %v490_v52, %v488_v51  ;;  %v566_v51 = vperm.slane %v565_v50, 0  ;;  %v567_v52 = vperm.slane %v565_v50, 1 }
 0x197   : > { %v502_v55 = vsel %vm500_vm14, %v493_v54, %v485_v39  ;;  %v503_v56 = vsel %vm501_vm15, %v492_v53, %v486_v40 }
 0x198   : > { %504 = vrot.lane.b32.xlu0 %v502_v55, %s1817_s18  ;;  %506 = vrot.lane.b32.xlu1 %v503_v56, %s1817_s18  ;;  %vm569_vm0 = vcmp.eq.s32.totalorder %v567_v52, 1 }
 0x1a4   : > { %v626_v58 = vpop.permute.xlu1 %625 }
 0x1a5   : > { %v629_v59 = vsel %vm491_vm13, %v626_v58, %v628_v57  ;;  %v630_v60 = vsel %vm491_vm13, %v628_v57, %v626_v58 }
 0x1a6   : > { %v631_v61 = vsel %vm500_vm14, %v630_v60, %v623_v45  ;;  %v632_v62 = vsel %vm501_vm15, %v629_v59, %v624_v46  ;;  %vm559_vm14 = vcmp.lt.s32.totalorder %v2002_v18, 1  ;;  %vm568_vm15 = vcmp.eq.s32.totalorder %v566_v51, 1 }
 0x1a7   : > { %633 = vrot.lane.b32.xlu2 %v631_v61, %s1817_s18  ;;  %635 = vrot.lane.b32.xlu0 %v632_v62, %s1817_s18 }
 0x201   : > { %v634_v10 = vpop.permute.xlu2 %633 }
 0x20a   : > { %v505_v4 = vpop.permute.xlu0 %504  ;;  %v507_v5 = vpop.permute.xlu1 %506 }
 0x20b   : > { %v509_v6 = vsel %vm508_vm1, %v505_v4, %v507_v5  ;;  %v510_v7 = vsel %vm508_vm1, %v507_v5, %v505_v4 }
 0x20c   : > { %v519_v8 = vsel %vm517_vm2, %v510_v7, %v502_v55  ;;  %v520_v9 = vsel %vm518_vm3, %v509_v6, %v503_v56 }
 0x20d   : > { %521 = vrot.lane.b32.xlu1 %v519_v8, %s1818_s26  ;;  %523 = vrot.lane.b32.xlu2 %v520_v9, %s1818_s26 }
 0x219   : > { %v636_v11 = vpop.permute.xlu0 %635 }
 0x21a   : > { %v637_v12 = vsel %vm508_vm1, %v634_v10, %v636_v11  ;;  %v638_v13 = vsel %vm508_vm1, %v636_v11, %v634_v10  ;;  %vm580_vm1 = vcmp.ne.f32.partialorder %v579_v2, 0.0 }
 0x21b   : > { %v639_v14 = vsel %vm517_vm2, %v638_v13, %v631_v61  ;;  %v640_v15 = vsel %vm518_vm3, %v637_v12, %v632_v62  ;;  %v581_v3 = vsel %vm580_vm1, 1, %v1813_v0  ;;  %vm980_vm1 = vcmask 293888  }
 0x21c   : > { %641 = vrot.lane.b32.xlu0 %v639_v14, %s1818_s26  ;;  %643 = vrot.lane.b32.xlu1 %v640_v15, %s1818_s26  ;;  %v582_v4 = vperm.slane %v581_v3, 0  ;;  %v583_v5 = vperm.slane %v581_v3, 1  ;;  %s1406_s26 = scalar_lea.hbm %s2736_s10, %s1551_s28 }
 0x21d   : > { %s1409_s17 = sshll.u32 %s1406_s26, 4  ;;  %s1410_s17 = int_to_ptr.hbm [resolvable:$true] %s1409_s17 }
 0x21e   : > { %vm584_vm2 = vcmp.eq.s32.totalorder %v582_v4, 1  ;;  %vm585_vm3 = vcmp.eq.s32.totalorder %v583_v5, 1 }
 0x267   : > { %v524_v21 = vpop.permute.xlu2 %523 }
 0x27f   : > { %v522_v22 = vpop.permute.xlu1 %521 }
 0x280   : > { %v526_v23 = vsel %vm525_vm5, %v522_v22, %v524_v21  ;;  %v527_v24 = vsel %vm525_vm5, %v524_v21, %v522_v22  ;;  %v598_v21 = vperm.slane %v597_v20, 0 }
 0x281   : > { %v536_v25 = vsel %vm534_vm6, %v527_v24, %v519_v8  ;;  %v537_v26 = vsel %vm535_vm7, %v526_v23, %v520_v9 }
 0x282   : > { %538 = vrot.lane.b32.xlu2 %v536_v25, %s1819_s21  ;;  %540 = vrot.lane.b32.xlu0 %v537_v26, %s1819_s21 }
 0x28e   : > { %v642_v27 = vpop.permute.xlu0 %641  ;;  %v644_v28 = vpop.permute.xlu1 %643 }
 0x28f   : > { %v645_v29 = vsel %vm525_vm5, %v642_v27, %v644_v28  ;;  %v646_v30 = vsel %vm525_vm5, %v644_v28, %v642_v27  ;;  %vm600_vm5 = vcmp.eq.s32.totalorder %v598_v21, 1 }
 0x290   : > { %v647_v31 = vsel %vm534_vm6, %v646_v30, %v639_v14  ;;  %v648_v32 = vsel %vm535_vm7, %v645_v29, %v640_v15  ;;  %vm882_vm7 = vcmp.lt.s32.totalorder %v2002_v18, 111 }
 0x291   : > { %649 = vrot.lane.b32.xlu1 %v647_v31, %s1819_s21  ;;  %651 = vrot.lane.b32.xlu2 %v648_v32, %s1819_s21 }
 0x2dc   : > { %v539_v37 = vpop.permute.xlu2 %538 }
 0x2eb   : > { %v652_v43 = vpop.permute.xlu2 %651 }
 0x2f4   : > { %v541_v38 = vpop.permute.xlu0 %540 }
 0x2f5   : > { %v543_v39 = vsel %vm542_vm9, %v539_v37, %v541_v38  ;;  %v544_v40 = vsel %vm542_vm9, %v541_v38, %v539_v37 }
 0x2f6   : > { %v553_v41 = vsel %vm551_vm10, %v544_v40, %v536_v25  ;;  %v554_v42 = vsel %vm552_vm11, %v543_v39, %v537_v26  ;;  %v599_v26 = vperm.slane %v597_v20, 1 }
 0x2f7   : > { %555 = vrot.lane.b32.xlu0 %v553_v41, %s2738_s30  ;;  %557 = vrot.lane.b32.xlu1 %v554_v42, %s2738_s30 }
 0x2f8   : > { %vm601_vm6 = vcmp.eq.s32.totalorder %v599_v26, 1 }
 0x303   : > { %v650_v44 = vpop.permute.xlu1 %649 }
 0x304   : > { %v653_v45 = vsel %vm542_vm9, %v650_v44, %v652_v43  ;;  %v654_v46 = vsel %vm542_vm9, %v652_v43, %v650_v44  ;;  %vm798_vm9 = vcmp.lt.s32.totalorder %v2002_v18, 127 }
 0x305   : > { %v655_v47 = vsel %vm551_vm10, %v654_v46, %v647_v31  ;;  %v656_v48 = vsel %vm552_vm11, %v653_v45, %v648_v32  ;;  %v2153_v45 = vld [vmem:[#allocation7 + $0x5] ss:$8 sm:$0xf]  ;;  %v892_v46 = vperm.slane %v2139_v35, 2  ;;  %vm854_vm10 = vcmp.lt.s32.totalorder %v2002_v18, 112 }
 0x306   : > { %657 = vrot.lane.b32.xlu2 %v655_v47, %s2738_s30  ;;  %659 = vrot.lane.b32.xlu0 %v656_v48, %s2738_s30  ;;  %v809_v49 = vperm.slane %v2153_v45, 3  ;;  %vm826_vm11 = vcmp.lt.s32.totalorder %v2002_v18, 113 }
 0x360   : > { %v658_v59 = vpop.permute.xlu2 %657 }
 0x369   : > { %v556_v53 = vpop.permute.xlu0 %555  ;;  %v558_v54 = vpop.permute.xlu1 %557 }
 0x36a   : > { %v560_v55 = vsel %vm559_vm14, %v556_v53, %v558_v54  ;;  %v561_v56 = vsel %vm559_vm14, %v558_v54, %v556_v53 }
 0x36b   : > { %v570_v57 = vsel %vm568_vm15, %v561_v56, %v553_v41  ;;  %v571_v58 = vsel %vm569_vm0, %v560_v55, %v554_v42 }
 0x36c   : > { %572 = vrot.lane.b32.xlu1 %v570_v57, %s2738_s30  ;;  %574 = vrot.lane.b32.xlu2 %v571_v58, %s2738_s30 }
 0x378   : > { %v660_v60 = vpop.permute.xlu0 %659 }
 0x379   : > { %v661_v61 = vsel %vm559_vm14, %v658_v59, %v660_v60  ;;  %v662_v62 = vsel %vm559_vm14, %v660_v60, %v658_v59 }
 0x37a   : > { %v663_v63 = vsel %vm568_vm15, %v662_v62, %v655_v47  ;;  %v664_v1 = vsel %vm569_vm0, %v661_v61, %v656_v48  ;;  %v2157_v48 = vld [vmem:[#allocation7 + $0x7] ss:$8 sm:$0xf]  ;;  %vm689_vm15 = vcmp.lt.s32.totalorder %v2002_v18, 17  ;;  %vm743_vm0 = vcmp.lt.s32.totalorder %v2002_v18, 15 }
 0x37b   : > { %665 = vrot.lane.b32.xlu0 %v663_v63, %s2738_s30  ;;  %667 = vrot.lane.b32.xlu1 %v664_v1, %s2738_s30  ;;  %v865_v54 = vperm.slane %v2157_v48, 3 }
 0x3c6   : > { %v575_v6 = vpop.permute.xlu2 %574 }
 0x3de   : > { %v573_v7 = vpop.permute.xlu1 %572 }
 0x3df   : > { %v576_v8 = vsel %vm559_vm14, %v573_v7, %v575_v6  ;;  %v577_v9 = vsel %vm559_vm14, %v575_v6, %v573_v7 }
 0x3e0   : > { %v586_v10 = vsel %vm584_vm2, %v577_v9, %v570_v57  ;;  %v587_v11 = vsel %vm585_vm3, %v576_v8, %v571_v58  ;;  %v2174_v57 = vld [vmem:[#allocation7 + $0x6] ss:$8 sm:$0xf]  ;;  %v808_v9 = vperm.slane %v2153_v45, 2 }
 0x3e1   : > { %588 = vrot.lane.b32.xlu2 %v586_v10, %s1816_s12  ;;  %590 = vrot.lane.b32.xlu0 %v587_v11, %s1816_s12  ;;  %v837_v61 = vperm.slane %v2174_v57, 3  ;;  %v836_v19 = vperm.slane %v2174_v57, 2 }
 0x3ed   : > { %v666_v12 = vpop.permute.xlu0 %665  ;;  %v668_v13 = vpop.permute.xlu1 %667 }
 0x3ee   : > { %v669_v14 = vsel %vm559_vm14, %v666_v12, %v668_v13  ;;  %v670_v15 = vsel %vm559_vm14, %v668_v13, %v666_v12 }
 0x3ef   : > { %v671_v16 = vsel %vm584_vm2, %v670_v15, %v663_v63  ;;  %v672_v17 = vsel %vm585_vm3, %v669_v14, %v664_v1  ;;  %v864_v14 = vperm.slane %v2157_v48, 2 }
 0x3f0   : > { %673 = vrot.lane.b32.xlu1 %v671_v16, %s1816_s12  ;;  %675 = vrot.lane.b32.xlu2 %v672_v17, %s1816_s12 }
 0x43b   : > { %v589_v22 = vpop.permute.xlu2 %588 }
 0x44a   : > { %v676_v27 = vpop.permute.xlu2 %675 }
 0x453   : > { %v591_v23 = vpop.permute.xlu0 %590 }
 0x454   : > { %v593_v24 = vsel %vm491_vm13, %v591_v23, %v589_v22  ;;  %v592_v32 = vsel %vm491_vm13, %v589_v22, %v591_v23 }
 0x455   : > { %v2061_v25 = vsel %vm600_vm5, %v593_v24, %v586_v10  ;;  %v2089_v33 = vsel %vm601_vm6, %v592_v32, %v587_v11  ;;  %v891_v32 = vperm.slane %v2139_v35, 1 }
 0x456   : > { %874 = vrot.lane.b32.xlu0 %v2061_v25, %s1821_s2 }
 0x45e   : > { %790 = vrot.lane.b32.xlu0 %v2061_v25, %s1822_s3 }
 0x462   : > { %v674_v0 = vpop.permute.xlu1 %673 }
 0x463   : > { %v677_v28 = vsel %vm491_vm13, %v674_v0, %v676_v27  ;;  %v678_v29 = vsel %vm491_vm13, %v676_v27, %v674_v0 }
 0x464   : > { %v2071_v30 = vsel %vm600_vm5, %v678_v29, %v671_v16  ;;  %v2073_v31 = vsel %vm601_vm6, %v677_v28, %v672_v17 }
 0x465   : > { %878 = vrot.lane.b32.xlu1 %v2071_v30, %s1821_s2  ;;  %880 = vrot.lane.b32.xlu2 %v2073_v31, %s1821_s2 }
 0x466   : > { %846 = vrot.lane.b32.xlu0 %v2061_v25, %s1823_s24 }
 0x46d   : > { %794 = vrot.lane.b32.xlu1 %v2071_v30, %s1822_s3  ;;  %796 = vrot.lane.b32.xlu2 %v2073_v31, %s1822_s3 }
 0x46e   : > { %818 = vrot.lane.b32.xlu0 %v2061_v25, %s1824_s19 }
 0x475   : > { %850 = vrot.lane.b32.xlu1 %v2071_v30, %s1823_s24  ;;  %852 = vrot.lane.b32.xlu2 %v2073_v31, %s1823_s24 }
 0x476   : > { %710 = vrot.lane.b32.xlu0 %v2089_v33, %s1816_s12 }
 0x47d   : > { %822 = vrot.lane.b32.xlu1 %v2071_v30, %s1824_s19  ;;  %824 = vrot.lane.b32.xlu2 %v2073_v31, %s1824_s19 }
 0x47e   : > { %765 = vrot.lane.b32.xlu0 %v2089_v33, %s2738_s30 }
 0x485   : > { %712 = vrot.lane.b32.xlu1 %v2071_v30, %s1816_s12  ;;  %714 = vrot.lane.b32.xlu2 %v2073_v31, %s1816_s12 }
 0x486   : > { %876 = vrot.lane.b32.xlu0 %v2089_v33, %s1821_s2 }
 0x48d   : > { %767 = vrot.lane.b32.xlu1 %v2071_v30, %s2738_s30  ;;  %769 = vrot.lane.b32.xlu2 %v2073_v31, %s2738_s30 }
 0x48e   : > { %687 = vrot.lane.b32.xlu0 %v2073_v31, %s1825_s22 }
 0x495   : > { %685 = vrot.lane.b32.xlu2 %v2071_v30, %s1825_s22  ;;  %683 = vrot.lane.b32.xlu1 %v2089_v33, %s1825_s22 }
 0x496   : > { %741 = vrot.lane.b32.xlu0 %v2073_v31, %s1826_s27 }
 0x49d   : > { %739 = vrot.lane.b32.xlu2 %v2071_v30, %s1826_s27  ;;  %737 = vrot.lane.b32.xlu1 %v2089_v33, %s1826_s27 }
 0x49e   : > { %820 = vrot.lane.b32.xlu0 %v2089_v33, %s1824_s19 }
 0x4a5   : > { %848 = vrot.lane.b32.xlu2 %v2089_v33, %s1823_s24  ;;  %792 = vrot.lane.b32.xlu1 %v2089_v33, %s1822_s3 }
 0x4a6   : > { %681 = vrot.lane.b32.xlu0 %v2061_v25, %s1825_s22 }
 0x4ad   : > { %763 = vrot.lane.b32.xlu2 %v2061_v25, %s2738_s30  ;;  %708 = vrot.lane.b32.xlu1 %v2061_v25, %s1816_s12  ;;  %s1394_s30 = scalar_lea.sflag [#allocation4], %s1979_s29 }
 0x4b5   : > { %735 = vrot.lane.b32.xlu1 %v2061_v25, %s1826_s27 }
 0x4bf   : > { %v881_v34 = vpop.permute.xlu2 %880 }
 0x4c7   : > { %v797_v40 = vpop.permute.xlu2 %796 }
 0x4c8   : > { %v2143_v37 = vpop.permute.xlu0 %874 }
 0x4c9   : > { %v886_v38 = vsel %vm882_vm7, %v881_v34, %v2143_v37 }
 0x4ca   : > { %v901_v39 = vmul.f32 %v893_v36, %v886_v38 }
 0x4cc   : > { %v979_v41 = vpack.c.bf16 %v901_v39, %v901_v39 }
 0x4ce   : > { %v995_v42 = vsel %vm984_vm8, %v979_v41, 0 }
 0x4cf   : > { %1041 = vmatpush.bf16.msra.mxu3 %v995_v42  ;;  %v853_v44 = vpop.permute.xlu2 %852 }
 0x4d0   : > { %v2151_v43 = vpop.permute.xlu0 %790 }
 0x4d1   : > { %v802_v52 = vsel %vm798_vm9, %v797_v40, %v2151_v43 }
 0x4d2   : > { %v817_v58 = vmul.f32 %v809_v49, %v802_v52 }
 0x4d4   : > { %v934_v1 = vrot.slane %v817_v58, 4  ;;  %v2247_v58 = vld [vmem:[#allocation7] ss:$8 sm:$0xf] }
 0x4d6   : > { %v963_v6 = vsel %vm951_vm12, %v2073_v31, %v934_v1  ;;  %v890_v31 = vperm.slane %v2139_v35, 0 }
 0x4d7   : > { %v879_v47 = vpop.permute.xlu1 %878  ;;  %v825_v62 = vpop.permute.xlu2 %824 }
 0x4d8   : > { %v883_v50 = vsel %vm882_vm7, %v879_v47, %v881_v34  ;;  %v2163_v51 = vpop.permute.xlu0 %846 }
 0x4d9   : > { %v900_v53 = vmul.f32 %v892_v46, %v883_v50  ;;  %v858_v55 = vsel %vm854_vm10, %v853_v44, %v2163_v51 }
 0x4da   : > { %v873_v60 = vmul.f32 %v865_v54, %v858_v55  ;;  %v2241_v55 = vld [vmem:[#allocation7 + $0x1] ss:$8 sm:$0xf] }
 0x4db   : > { %v978_v56 = vpack.c.bf16 %v900_v53, %v900_v53 }
 0x4dc   : > { %v946_v4 = vrot.slane %v873_v60, 4 }
 0x4dd   : > { %v992_v59 = vsel %vm984_vm8, %v978_v56, 0 }
 0x4de   : > { %1028 = vmatpush.bf16.msra.mxu2 %v992_v59  ;;  %v726_v59 = vperm.slane %v2241_v55, 3 }
 0x4df   : > { %v2183_v63 = vpop.permute.xlu1 %794  ;;  %v2203_v13 = vpop.permute.xlu2 %714 }
 0x4e0   : > { %v2185_v2 = vpop.permute.xlu0 %818  ;;  %v799_v11 = vsel %vm798_vm9, %v2183_v63, %v797_v40 }
 0x4e1   : > { %v830_v3 = vsel %vm826_vm11, %v825_v62, %v2185_v2  ;;  %v816_v16 = vmul.f32 %v808_v9, %v799_v11 }
 0x4e2   : > { %v845_v5 = vmul.f32 %v837_v61, %v830_v3  ;;  %v2258_v3 = vld [vmem:[#allocation7 + $0x2] ss:$8 sm:$0xf] }
 0x4e3   : > { %v933_v20 = vrot.slane %v816_v16, 4  ;;  %v2761_v18 = vperm.slane %v2258_v3, 1 }
 0x4e4   : > { %v967_v7 = vsel %vm951_vm12, %v845_v5, %v946_v4  ;;  %v699_v4 = vperm.slane %v2247_v58, 3 }
 0x4e5   : > { %v975_v8 = vpack.c.bf16 %v967_v7, %v963_v6  ;;  %v962_v0 = vsel %vm951_vm12, %v2071_v30, %v933_v20  ;;  %v725_v20 = vperm.slane %v2241_v55, 2 }
 0x4e7   : > { %1042 = vmatpush.bf16.msra.mxu3 %v975_v8  ;;  %v2196_v10 = vpop.permute.xlu1 %850  ;;  %v2223_v27 = vpop.permute.xlu2 %769  ;;  %v754_v8 = vperm.slane %v2258_v3, 3 }
 0x4e8   : > { %v2201_v12 = vpop.permute.xlu0 %710  ;;  %v855_v15 = vsel %vm854_vm10, %v2196_v10, %v853_v44 }
 0x4e9   : > { %v872_v17 = vmul.f32 %v864_v14, %v855_v15 }
 0x4eb   : > { %v945_v24 = vrot.slane %v872_v17, 4 }
 0x4ef   : > { %v2214_v21 = vpop.permute.xlu1 %822  ;;  %v686_v50 = vpop.permute.xlu2 %685 }
 0x4f0   : > { %v827_v22 = vsel %vm826_vm11, %v2214_v21, %v825_v62  ;;  %v2219_v23 = vpop.permute.xlu0 %765 }
 0x4f1   : > { %v844_v26 = vmul.f32 %v836_v19, %v827_v22 }
 0x4f3   : > { %v966_v28 = vsel %vm951_vm12, %v844_v26, %v945_v24 }
 0x4f4   : > { %v974_v29 = vpack.c.bf16 %v966_v28, %v962_v0 }
 0x4f6   : > { %1029 = vmatpush.bf16.msra.mxu2 %v974_v29 }
 0x4f7   : > { %v713_v34 = vpop.permute.xlu1 %712  ;;  %v740_v11 = vpop.permute.xlu2 %739 }
 0x4f8   : > { %v877_v38 = vpop.permute.xlu0 %876  ;;  %v716_v62 = vsel %vm491_vm13, %v713_v34, %v2203_v13  ;;  %v717_v22 = vsel %vm491_vm13, %v2201_v12, %v713_v34 }
 0x4f9   : > { %v884_v39 = vsel %vm882_vm7, %v877_v38, %v879_v47  ;;  %v885_v40 = vsel %vm882_vm7, %v2143_v37, %v877_v38  ;;  %v2243_v47 = vld [vmem:[#allocation7 + $0x3] ss:$8 sm:$0xf]  ;;  %v734_v6 = vmul.f32 %v726_v59, %v716_v62 }
 0x4fa   : > { %v898_v30 = vmul.f32 %v890_v31, %v885_v40  ;;  %v899_v41 = vmul.f32 %v891_v32, %v884_v39  ;;  %v781_v60 = vperm.slane %v2243_v47, 3  ;;  %v780_v24 = vperm.slane %v2243_v47, 2 }
 0x4fb   : > { %v910_v0 = vrot.slane %v734_v6, 4  ;;  %v698_v39 = vperm.slane %v2247_v58, 2 }
 0x4fc   : > { %v976_v42 = vpack.c.bf16 %v898_v30, %v898_v30  ;;  %v977_v44 = vpack.c.bf16 %v899_v41, %v899_v41  ;;  %v733_v41 = vmul.f32 %v725_v20, %v717_v22  ;;  %v1049_v22 = vld [vmem:[%s2731_s5] sm:$0xf] }
 0x4fd   : > { %1052 = vperm.xlu2 %1640, %v1049_v22  }
 0x4fe   : > { %v986_v52 = vsel %vm984_vm8, %v976_v42, 0  ;;  %v989_v53 = vsel %vm984_vm8, %v977_v44, 0 }
 0x4ff   : > { %1002 = vmatpush.bf16.msra.mxu0 %v986_v52  ;;  %1015 = vmatpush.bf16.msra.mxu1 %v989_v53  ;;  %v768_v37 = vpop.permute.xlu1 %767  ;;  %v753_v52 = vperm.slane %v2258_v3, 2  ;;  %v849_v6 = vpop.permute.xlu2 %848 }
 0x500   : > { %v2245_v56 = vpop.permute.xlu0 %687  ;;  %v771_v1 = vsel %vm559_vm14, %v768_v37, %v2223_v27  ;;  %v772_v28 = vsel %vm559_vm14, %v2219_v23, %v768_v37 }
 0x501   : > { %v690_v5 = vsel %vm689_vm15, %v686_v50, %v2245_v56  ;;  %v789_v7 = vmul.f32 %v781_v60, %v771_v1  ;;  %v788_v42 = vmul.f32 %v780_v24, %v772_v28  ;;  %v909_v1 = vrot.slane %v733_v41, 4 }
 0x502   : > { %v707_v16 = vmul.f32 %v699_v4, %v690_v5  ;;  %v835_v41 = vperm.slane %v2174_v57, 1 }
 0x503   : > { %v922_v29 = vrot.slane %v789_v7, 4  ;;  %v921_v5 = vrot.slane %v788_v42, 4  ;;  %v806_v42 = vperm.slane %v2153_v45, 0 }
 0x504   : > { %v955_v40 = vsel %vm951_vm12, %v707_v16, %v910_v0  ;;  %v1059_v16 = vld [vmem:[%s2732_s6] sm:$0xf] }
 0x505   : > { %1062 = vperm.xlu0 %1641, %v1059_v16  }
 0x507   : > { %v2270_v15 = vpop.permute.xlu1 %683 }
 0x508   : > { %v2274_v17 = vpop.permute.xlu0 %741  ;;  %v691_v34 = vsel %vm689_vm15, %v2270_v15, %v686_v50  ;;  %v2307_v50 = vld [vmem:[%s2730_s4] sm:$0x3] }
 0x509   : > { %v744_v26 = vsel %vm743_vm0, %v740_v11, %v2274_v17  ;;  %v706_v53 = vmul.f32 %v698_v39, %v691_v34  ;;  %v857_v34 = vsel %vm854_vm10, %v2163_v51, %v849_v6 }
 0x50a   : > { %v762_v38 = vmul.f32 %v754_v8, %v744_v26  ;;  %v863_v26 = vperm.slane %v2157_v48, 1 }
 0x50b   : > { %v954_v28 = vsel %vm951_vm12, %v706_v53, %v909_v1 }
 0x50c   : > { %v959_v30 = vsel %vm951_vm12, %v762_v38, %v922_v29  ;;  %v856_v38 = vsel %vm854_vm10, %v849_v6, %v2196_v10 }
 0x50d   : > { %v971_v44 = vpack.c.bf16 %v959_v30, %v955_v40  ;;  %v834_v30 = vperm.slane %v2174_v57, 0 }
 0x50f   : > { %1043 = vmatpush.bf16.msra.mxu3 %v971_v44  ;;  %v2302_v37 = vpop.permute.xlu1 %737  ;;  %v807_v44 = vperm.slane %v2153_v45, 1 }
 0x510   : > { %v745_v62 = vsel %vm743_vm0, %v2302_v37, %v740_v11  ;;  %v862_v11 = vperm.slane %v2157_v48, 0  ;;  %v821_v0 = vpop.permute.xlu0 %820 }
 0x511   : > { %v761_v7 = vmul.f32 %v753_v52, %v745_v62  ;;  %v828_v53 = vsel %vm826_vm11, %v821_v0, %v2214_v21  ;;  %v829_v10 = vsel %vm826_vm11, %v2185_v2, %v821_v0  ;;  %v871_v62 = vmul.f32 %v863_v26, %v856_v38 }
 0x512   : > { %1534 = vmatmul.msk.bf16.vlgmr.msra.gmra.mxu3 %vm980_vm1, %v2307_v50  ;;  %v870_v51 = vmul.f32 %v862_v11, %v857_v34  ;;  %v842_v6 = vmul.f32 %v834_v30, %v829_v10  ;;  %v843_v2 = vmul.f32 %v835_v41, %v828_v53 }
 0x513   : > { %v958_v29 = vsel %vm951_vm12, %v761_v7, %v921_v5  ;;  %v944_v22 = vrot.slane %v871_v62, 4 }
 0x514   : > { %v970_v40 = vpack.c.bf16 %v958_v29, %v954_v28 }
 0x515   : > { %v965_v34 = vsel %vm951_vm12, %v843_v2, %v944_v22  ;;  %v2744_v22 = vperm.slane %v2247_v58, 0 }
 0x516   : > { %1030 = vmatpush.bf16.msra.mxu2 %v970_v40  ;;  %v764_v40 = vpop.permute.xlu2 %763 }
 0x517   : > { %v793_v1 = vpop.permute.xlu1 %792  ;;  %v774_v2 = vsel %vm559_vm14, %v2223_v27, %v764_v40  ;;  %v2740_v27 = vperm.slane %v2258_v3, 1 }
 0x518   : > { %v800_v5 = vsel %vm798_vm9, %v793_v1, %v2183_v63  ;;  %v801_v21 = vsel %vm798_vm9, %v2151_v43, %v793_v1  ;;  %v943_v63 = vrot.slane %v870_v51, 4  ;;  %v723_v1 = vperm.slane %v2241_v55, 0 }
 0x519   : > { %v814_v7 = vmul.f32 %v806_v42, %v801_v21  ;;  %v815_v16 = vmul.f32 %v807_v44, %v800_v5  ;;  %1533 = vmatmul.msk.bf16.vlgmr.msra.gmra.mxu2 %vm980_vm1, %v2307_v50  ;;  %v724_v51 = vperm.slane %v2241_v55, 1  ;;  %v2743_v5 = vperm.slane %v2243_v47, 0 }
 0x51a   : > { %v964_v29 = vsel %vm951_vm12, %v842_v6, %v943_v63  ;;  %v2742_v21 = vperm.slane %v2243_v47, 1  ;;  %v773_v6 = vsel %vm559_vm14, %v764_v40, %v2219_v23  ;;  %v697_v23 = vperm.slane %v2247_v58, 1 }
 0x51b   : > { %v931_v0 = vrot.slane %v814_v7, 4  ;;  %v932_v28 = vrot.slane %v815_v16, 4  ;;  %v682_v7 = vpop.permute.xlu0 %681 }
 0x51c   : > { %v787_v63 = vmul.f32 %v2742_v21, %v773_v6 }
 0x51d   : > { %v960_v43 = vsel %vm951_vm12, %v2061_v25, %v931_v0  ;;  %v961_v38 = vsel %vm951_vm12, %v2089_v33, %v932_v28  ;;  %v2741_v0 = vperm.slane %v2258_v3, 0  ;;  %v692_v28 = vsel %vm689_vm15, %v682_v7, %v2270_v15 }
 0x51e   : > { %v972_v53 = vpack.c.bf16 %v964_v29, %v960_v43  ;;  %v973_v10 = vpack.c.bf16 %v965_v34, %v961_v38  ;;  %v693_v43 = vsel %vm689_vm15, %v2245_v56, %v682_v7  ;;  %v705_v56 = vmul.f32 %v697_v23, %v692_v28 }
 0x51f   : > { %v709_v62 = vpop.permute.xlu1 %708  ;;  %v704_v15 = vmul.f32 %v2744_v22, %v693_v43 }
 0x520   : > { %v718_v25 = vsel %vm491_vm13, %v709_v62, %v2201_v12  ;;  %v719_v33 = vsel %vm491_vm13, %v2203_v13, %v709_v62  ;;  %1003 = vmatpush.bf16.msra.mxu0 %v972_v53  ;;  %1016 = vmatpush.bf16.msra.mxu1 %v973_v10  ;;  %v786_v13 = vmul.f32 %v2743_v5, %v774_v2  ;;  %v920_v53 = vrot.slane %v787_v63, 4 }
 0x521   : > { %v731_v16 = vmul.f32 %v723_v1, %v719_v33  ;;  %v732_v12 = vmul.f32 %v724_v51, %v718_v25 }
 0x522   : > { %v919_v40 = vrot.slane %v786_v13, 4  ;;  %v1535_v13 = vld [vmem:[%s1983_s15 + $0x8] sm:$0xff] }
 0x523   : > { %v907_v29 = vrot.slane %v731_v16, 4  ;;  %v908_v38 = vrot.slane %v732_v12, 4  ;;  %v1073_v12 = vld [vmem:[%s1983_s15] sm:$0xff]  ;;  %s2756_s15 = smov 1  }
 0x524   : > { %1077 = vst [vmem:[#allocation1] ss:$2 sm:$0xff] %v1073_v12 }
 0x525   : > { %v953_v2 = vsel %vm951_vm12, %v705_v56, %v908_v38 }
 0x527   : > { %v736_v34 = vpop.permute.xlu1 %735 }
 0x528   : > { %v746_v10 = vsel %vm743_vm0, %v736_v34, %v2302_v37  ;;  %v747_v62 = vsel %vm743_vm0, %v2274_v17, %v736_v34  ;;  %v952_v37 = vsel %vm951_vm12, %v704_v15, %v907_v29 }
 0x529   : > { %v759_v25 = vmul.f32 %v2741_v0, %v747_v62  ;;  %v760_v33 = vmul.f32 %v2740_v27, %v746_v10 }
 0x52b   : > { %v956_v6 = vsel %vm951_vm12, %v759_v25, %v919_v40  ;;  %v957_v17 = vsel %vm951_vm12, %v760_v33, %v920_v53  ;;  %v1078_v63 = vld.sshfl [vmem:[#allocation1] sm:$0xff pattern:$0x75316420]  ;;  %v1079_v28 = vld.sshfl [vmem:[#allocation1 + $0x8] sm:$0xff pattern:$0x75316420] }
 0x52c   : > { %v968_v7 = vpack.c.bf16 %v956_v6, %v952_v37  ;;  %v969_v16 = vpack.c.bf16 %v957_v17, %v953_v2  ;;  %1083 = vst [vmem:[#allocation1] ss:$2 sm:$0xff] %v1535_v13 }
 0x52e   : > { %1004 = vmatpush.bf16.msra.mxu0 %v968_v7  ;;  %1017 = vmatpush.bf16.msra.mxu1 %v969_v16 }
 0x531   : > { %1531 = vmatmul.msk.bf16.vlgmr.msra.gmra.mxu0 %vm980_vm1, %v2307_v50  ;;  %1532 = vmatmul.msk.bf16.vlgmr.msra.gmra.mxu1 %vm980_vm1, %v2307_v50 }
 0x557   : > { %v1053_v40 = vpop.permute.xlu2 %1052 }
 0x577   : > { %v1063_v53 = vpop.permute.xlu0 %1062 }
 0x595   : > { %v1045_v43 = vpop.f32.mrf.mxu3 }
 0x596   : > { %v1058_v16 = vmul.f32 %v1053_v40, %v1045_v43 }
 0x598   : > { %v1068_v12 = vadd.f32 %v1063_v53, %v1058_v16 }
 0x59a   : > { %v1072_v13 = vmax.f32 %v1068_v12, 0.0 }
 0x59c   : > { %v1032_v29 = vpop.f32.mrf.mxu2 }
 0x59d   : > { %v1047_v38 = vpop.f32.mrf.mxu3  ;;  %v1057_v43 = vmul.f32 %v1053_v40, %v1032_v29  ;;  %v1374_v29 = vld [vmem:[%s2735_s9] sm:$0xff] }
 0x59f   : > { %v1067_v38 = vadd.f32 %v1063_v53, %v1057_v43 }
 0x5a4   : > { %v1034_v34 = vpop.f32.mrf.mxu2 }
 0x5a5   : > { %v1071_v34 = vmax.f32 %v1067_v38, 0.0 }
 0x5ae   : > { %v1006_v10 = vpop.f32.mrf.mxu0  ;;  %v1019_v62 = vpop.f32.mrf.mxu1 }
 0x5af   : > { %v1055_v15 = vmul.f32 %v1053_v40, %v1006_v10  ;;  %v1056_v56 = vmul.f32 %v1053_v40, %v1019_v62  ;;  %v1084_v10 = vld.sshfl [vmem:[#allocation1] sm:$0xff pattern:$0x75316420] }
 0x5b0   : > { %v2456_v62 = vadd.f32 %v1084_v10, %v1071_v34 }
 0x5b1   : > { %v1065_v25 = vadd.f32 %v1063_v53, %v1055_v15  ;;  %v1066_v33 = vadd.f32 %v1063_v53, %v1056_v56 }
 0x5b3   : > { %v1069_v37 = vmax.f32 %v1065_v25, 0.0  ;;  %v1070_v50 = vmax.f32 %v1066_v33, 0.0 }
 0x5b5   : > { %v2426_v6 = vadd.f32 %v1078_v63, %v1069_v37  ;;  %v2428_v2 = vadd.f32 %v1079_v28, %v1070_v50  ;;  %v1085_v63 = vld.sshfl [vmem:[#allocation1 + $0x8] sm:$0xff pattern:$0x75316420] }
 0x5b6   : > { %v1008_v17 = vpop.f32.mrf.mxu0  ;;  %v1021_v7 = vpop.f32.mrf.mxu1  ;;  %v2442_v28 = vadd.f32 %v1085_v63, %v1072_v13 }
 0x5b7   : > { %1094 = vrot.lane.b32.xlu0 %v2428_v2, %s1825_s22  ;;  %1156 = vrot.lane.b32.xlu2 %v2426_v6, %s1822_s3 }
 0x5b8   : > { %1204 = vrot.lane.b32.xlu1 %v2426_v6, %s1821_s2 }
 0x5bf   : > { %1126 = vrot.lane.b32.xlu0 %v2428_v2, %s1826_s27  ;;  %1188 = vrot.lane.b32.xlu2 %v2426_v6, %s1823_s24 }
 0x5c0   : > { %1190 = vrot.lane.b32.xlu1 %v2428_v2, %s1823_s24 }
 0x5c7   : > { %1158 = vrot.lane.b32.xlu0 %v2428_v2, %s1822_s3  ;;  %1172 = vrot.lane.b32.xlu2 %v2426_v6, %s1824_s19 }
 0x5c8   : > { %1210 = vrot.lane.b32.xlu1 %v2442_v28, %s1821_s2 }
 0x5cf   : > { %1108 = vrot.lane.b32.xlu0 %v2426_v6, %s1816_s12  ;;  %1110 = vrot.lane.b32.xlu2 %v2428_v2, %s1816_s12 }
 0x5d0   : > { %1162 = vrot.lane.b32.xlu1 %v2442_v28, %s1822_s3 }
 0x5d7   : > { %1160 = vrot.lane.b32.xlu0 %v2456_v62, %s1822_s3  ;;  %1142 = vrot.lane.b32.xlu2 %v2428_v2, %s2756_s15 }
 0x5d8   : > { %1194 = vrot.lane.b32.xlu1 %v2442_v28, %s1823_s24 }
 0x5df   : > { %1192 = vrot.lane.b32.xlu0 %v2456_v62, %s1823_s24  ;;  %1206 = vrot.lane.b32.xlu2 %v2428_v2, %s1821_s2 }
 0x5e0   : > { %1178 = vrot.lane.b32.xlu1 %v2442_v28, %s1824_s19 }
 0x5e7   : > { %1176 = vrot.lane.b32.xlu0 %v2456_v62, %s1824_s19  ;;  %1174 = vrot.lane.b32.xlu2 %v2428_v2, %s1824_s19 }
 0x5e8   : > { %1114 = vrot.lane.b32.xlu1 %v2442_v28, %s1816_s12 }
 0x5ef   : > { %1112 = vrot.lane.b32.xlu0 %v2456_v62, %s1816_s12  ;;  %1208 = vrot.lane.b32.xlu2 %v2456_v62, %s1821_s2  ;;  %s1747_s2 = sshra.s32 %s1410_s17, 4  ;;  %s1748_s2 = int_to_ptr.hbm [resolvable:$true] %s1747_s2 }
 0x5f0   : > { %1146 = vrot.lane.b32.xlu1 %v2442_v28, %s2756_s15  ;;  %s1749_s3 = scalar_lea.hbm %s1748_s2, 32  ;;  %p1754_p9 = scmp.lt.s32.totalorder %s1748_s2, %s2736_s10 }
 0x5f1   : > { %p1750_p1 = scmp.ne.s32.totalorder %s1748_s2, %s1749_s3 }
 0x5f3   : > { %p1751_p4 = pnand %p1750_p1, %p1952_p5 }
 0x5f5   : > { %p1752_p11 = pneg %p1751_p4 }
 0x5f7   : > { %1144 = vrot.lane.b32.xlu0 %v2456_v62, %s2756_s15  ;;  %1098 = vrot.lane.b32.xlu2 %v2442_v28, %s1825_s22 }
 0x5f8   : > { %1096 = vrot.lane.b32.xlu1 %v2456_v62, %s1825_s22 }
 0x5ff   : > { %1124 = vrot.lane.b32.xlu0 %v2426_v6, %s1826_s27  ;;  %1130 = vrot.lane.b32.xlu2 %v2442_v28, %s1826_s27 }
 0x600   : > { %1128 = vrot.lane.b32.xlu1 %v2456_v62, %s1826_s27  ;;  %s1527_s27 = sshll.u32 %s1979_s29, 5 }
 0x601   : > { %s429_s21 = scalar_lea.vmem [#allocation8], %s1527_s27 }
 0x607   : > { %1092 = vrot.lane.b32.xlu2 %v2426_v6, %s1825_s22  ;;  %s1753_s22 = scalar_lea.hbm %s2736_s10, 64 }
 0x608   : > { %1140 = vrot.lane.b32.xlu1 %v2426_v6, %s2756_s15  ;;  %s1407_s15 = sshll.u32 %s429_s21, 4  ;;  %p1755_p2 = scmp.lt.s32.totalorder %s1753_s22, %s1749_s3  ;;  %s1408_s15 = int_to_ptr.vmem [resolvable:$true] %s1407_s15 }
 0x60a   : > { %p1756_p10 = por %p1755_p2, %p1754_p9 }
 0x60c   : > { %p1757_p12 = pnand %p1756_p10, %p1752_p11 }
 0x60f   : > { %1377 = vperm.xlu2 %1640, %v1374_v29  }
 0x611   : > { %v1157_v40 = vpop.permute.xlu2 %1156 }
 0x619   : > { %v1189_v53 = vpop.permute.xlu2 %1188 }
 0x621   : > { %v1173_v15 = vpop.permute.xlu2 %1172 }
 0x629   : > { %v2501_v56 = vpop.permute.xlu0 %1094  ;;  %v2503_v25 = vpop.permute.xlu2 %1110 }
 0x62a   : > { %v1205_v33 = vpop.permute.xlu1 %1204 }
 0x631   : > { %v2505_v37 = vpop.permute.xlu0 %1126  ;;  %v2507_v50 = vpop.permute.xlu2 %1142 }
 0x632   : > { %v1191_v17 = vpop.permute.xlu1 %1190 }
 0x633   : > { %v1198_v34 = vsel %vm854_vm10, %v1189_v53, %v1191_v17 }
 0x634   : > { %v1200_v21 = vmul.f32 %v1198_v34, %v862_v11 }
 0x639   : > { %v1159_v7 = vpop.permute.xlu0 %1158  ;;  %v1207_v16 = vpop.permute.xlu2 %1206 }
 0x63a   : > { %v1166_v12 = vsel %vm798_vm9, %v1157_v40, %v1159_v7  ;;  %v1214_v13 = vsel %vm882_vm7, %v1205_v33, %v1207_v16  ;;  %v1211_v63 = vpop.permute.xlu1 %1210 }
 0x63b   : > { %v1216_v43 = vmul.f32 %v1214_v13, %v890_v31  ;;  %v1215_v38 = vsel %vm882_vm7, %v1211_v63, %v1205_v33  ;;  %v1168_v29 = vmul.f32 %v1166_v12, %v806_v42  ;;  %v1261_v42 = vrot.slane %v1200_v21, 4 }
 0x63c   : > { %v1219_v10 = vmul.f32 %v1215_v38, %v893_v36 }
 0x63d   : > { %v1293_v27 = vpack.c.bf16 %v1216_v43, %v1216_v43  ;;  %v1249_v33 = vrot.slane %v1168_v29, 4 }
 0x63e   : > { %v1296_v0 = vpack.c.bf16 %v1219_v10, %v1219_v10 }
 0x63f   : > { %v1301_v5 = vsel %vm984_vm8, %v1293_v27, 0  ;;  %v1277_v11 = vsel %vm951_vm12, %v2426_v6, %v1249_v33 }
 0x640   : > { %1317 = vmatpush.bf16.msrb.mxu0 %v1301_v5  ;;  %v1310_v31 = vsel %vm984_vm8, %v1296_v0, 0 }
 0x641   : > { %1356 = vmatpush.bf16.msrb.mxu3 %v1310_v31  ;;  %v2527_v13 = vpop.permute.xlu0 %1108  ;;  %v1175_v22 = vpop.permute.xlu2 %1174 }
 0x642   : > { %v1182_v36 = vsel %vm826_vm11, %v1173_v15, %v1175_v22  ;;  %v1163_v38 = vpop.permute.xlu1 %1162 }
 0x643   : > { %v1184_v12 = vmul.f32 %v1182_v36, %v834_v30  ;;  %v1167_v21 = vsel %vm798_vm9, %v1163_v38, %v1157_v40 }
 0x645   : > { %v1281_v5 = vsel %vm951_vm12, %v1184_v12, %v1261_v42 }
 0x646   : > { %v1289_v27 = vpack.c.bf16 %v1281_v5, %v1277_v11 }
 0x648   : > { %1318 = vmatpush.bf16.msrb.mxu0 %v1289_v27 }
 0x649   : > { %v1161_v0 = vpop.permute.xlu0 %1160  ;;  %v1209_v43 = vpop.permute.xlu2 %1208 }
 0x64a   : > { %v1212_v34 = vsel %vm882_vm7, %v1209_v43, %v1211_v63  ;;  %v1213_v10 = vsel %vm882_vm7, %v1207_v16, %v1209_v43  ;;  %v1195_v29 = vpop.permute.xlu1 %1194  ;;  %v1171_v63 = vmul.f32 %v1167_v21, %v809_v49  ;;  %v1165_v49 = vsel %vm798_vm9, %v1159_v7, %v1161_v0 }
 0x64b   : > { %v1217_v30 = vmul.f32 %v1213_v10, %v891_v32  ;;  %v1218_v6 = vmul.f32 %v1212_v34, %v892_v46  ;;  %v1199_v31 = vsel %vm854_vm10, %v1195_v29, %v1189_v53  ;;  %v1164_v53 = vsel %vm798_vm9, %v1161_v0, %v1163_v38 }
 0x64c   : > { %v1203_v42 = vmul.f32 %v1199_v31, %v865_v54  ;;  %v1252_v46 = vrot.slane %v1171_v63, 4  ;;  %v1169_v38 = vmul.f32 %v1165_v49, %v807_v44  ;;  %v1170_v7 = vmul.f32 %v1164_v53, %v808_v9 }
 0x64d   : > { %v1294_v33 = vpack.c.bf16 %v1217_v30, %v1217_v30  ;;  %v1295_v36 = vpack.c.bf16 %v1218_v6, %v1218_v6 }
 0x64e   : > { %v1264_v5 = vrot.slane %v1203_v42, 4  ;;  %v1280_v0 = vsel %vm951_vm12, %v2442_v28, %v1252_v46 }
 0x64f   : > { %v1304_v16 = vsel %vm984_vm8, %v1294_v33, 0  ;;  %v1307_v40 = vsel %vm984_vm8, %v1295_v36, 0 }
 0x650   : > { %1330 = vmatpush.bf16.msrb.mxu1 %v1304_v16  ;;  %1343 = vmatpush.bf16.msrb.mxu2 %v1307_v40 }
 0x651   : > { %v1193_v32 = vpop.permute.xlu0 %1192  ;;  %v2554_v35 = vpop.permute.xlu2 %1098 }
 0x652   : > { %v1179_v12 = vpop.permute.xlu1 %1178  ;;  %v1196_v54 = vsel %vm854_vm10, %v1193_v32, %v1195_v29  ;;  %v1197_v27 = vsel %vm854_vm10, %v1191_v17, %v1193_v32  ;;  %v1250_v29 = vrot.slane %v1169_v38, 4 }
 0x653   : > { %v1183_v11 = vsel %vm826_vm11, %v1179_v12, %v1173_v15  ;;  %v1201_v34 = vmul.f32 %v1197_v27, %v863_v26  ;;  %v1202_v17 = vmul.f32 %v1196_v54, %v864_v14  ;;  %v1118_v26 = vsel %vm491_vm13, %v2527_v13, %v2503_v25 }
 0x654   : > { %v1187_v43 = vmul.f32 %v1183_v11, %v837_v61  ;;  %v1251_v61 = vrot.slane %v1170_v7, 4  ;;  %v1278_v31 = vsel %vm951_vm12, %v2428_v2, %v1250_v29  ;;  %v1121_v57 = vmul.f32 %v1118_v26, %v724_v51  ;;  %v1364_v51 = vld [vmem:[%s2734_s8] sm:$0xff] }
 0x655   : > { %v1262_v30 = vrot.slane %v1201_v34, 4  ;;  %v1263_v6 = vrot.slane %v1202_v17, 4  ;;  %1367 = vperm.xlu1 %1642, %v1364_v51   ;;  %v2758_v26 = vperm.slane %v2243_v47, 0 }
 0x656   : > { %v1284_v15 = vsel %vm951_vm12, %v1187_v43, %v1264_v5  ;;  %v1226_v40 = vrot.slane %v1121_v57, 4 }
 0x657   : > { %v1292_v10 = vpack.c.bf16 %v1284_v15, %v1280_v0 }
 0x659   : > { %1357 = vmatpush.bf16.msrb.mxu3 %v1292_v10  ;;  %v1177_v21 = vpop.permute.xlu0 %1176  ;;  %v2579_v44 = vpop.permute.xlu2 %1130 }
 0x65a   : > { %v1180_v45 = vsel %vm826_vm11, %v1177_v21, %v1179_v12  ;;  %v1181_v9 = vsel %vm826_vm11, %v1175_v22, %v1177_v21  ;;  %v1115_v28 = vpop.permute.xlu1 %1114  ;;  %v1279_v22 = vsel %vm951_vm12, %v2456_v62, %v1251_v61 }
 0x65b   : > { %v1185_v48 = vmul.f32 %v1181_v9, %v835_v41  ;;  %v1186_v14 = vmul.f32 %v1180_v45, %v836_v19 }
 0x65d   : > { %v1282_v33 = vsel %vm951_vm12, %v1185_v48, %v1262_v30  ;;  %v1283_v63 = vsel %vm951_vm12, %v1186_v14, %v1263_v6  ;;  %v2757_v48 = vperm.slane %v2247_v58, 0 }
 0x65e   : > { %v1290_v36 = vpack.c.bf16 %v1282_v33, %v1278_v31  ;;  %v1291_v41 = vpack.c.bf16 %v1283_v63, %v1279_v22  ;;  %v2759_v33 = vperm.slane %v2243_v47, 1  ;;  %v2760_v22 = vperm.slane %v2258_v3, 0 }
 0x660   : > { %1331 = vmatpush.bf16.msrb.mxu1 %v1290_v36  ;;  %1344 = vmatpush.bf16.msrb.mxu2 %v1291_v41 }
 0x661   : > { %v1113_v19 = vpop.permute.xlu0 %1112  ;;  %v1093_v16 = vpop.permute.xlu2 %1092 }
 0x662   : > { %v1102_v2 = vsel %vm689_vm15, %v1093_v16, %v2501_v56  ;;  %v1147_v42 = vpop.permute.xlu1 %1146  ;;  %v1117_v32 = vsel %vm491_vm13, %v2503_v25, %v1113_v19  ;;  %v1116_v11 = vsel %vm491_vm13, %v1113_v19, %v1115_v28 }
 0x663   : > { %v1105_v62 = vmul.f32 %v1102_v2, %v697_v23  ;;  %v1122_v53 = vmul.f32 %v1117_v32, %v725_v20  ;;  %v1123_v43 = vmul.f32 %v1116_v11, %v726_v59 }
 0x665   : > { %v1270_v46 = vsel %vm951_vm12, %v1105_v62, %v1226_v40  ;;  %v1227_v25 = vrot.slane %v1122_v53, 4  ;;  %v1228_v15 = vrot.slane %v1123_v43, 4 }
 0x669   : > { %v1145_v49 = vpop.permute.xlu0 %1144  ;;  %v1378_v32 = vpop.permute.xlu2 %1377 }
 0x66a   : > { %v1097_v12 = vpop.permute.xlu1 %1096  ;;  %v1148_v54 = vsel %vm559_vm14, %v1145_v49, %v1147_v42  ;;  %v1149_v20 = vsel %vm559_vm14, %v2507_v50, %v1145_v49 }
 0x66b   : > { %v1101_v23 = vsel %vm689_vm15, %v2501_v56, %v1097_v12  ;;  %v1100_v56 = vsel %vm689_vm15, %v1097_v12, %v2554_v35  ;;  %v1154_v38 = vmul.f32 %v1149_v20, %v780_v24 }
 0x66c   : > { %v1106_v5 = vmul.f32 %v1101_v23, %v698_v39  ;;  %v1155_v39 = vmul.f32 %v1148_v54, %v781_v60  ;;  %v1107_v7 = vmul.f32 %v1100_v56, %v699_v4  ;;  %v1119_v4 = vsel %vm491_vm13, %v1115_v28, %v2527_v13 }
 0x66d   : > { %v1239_v17 = vrot.slane %v1154_v38, 4  ;;  %v1120_v6 = vmul.f32 %v1119_v4, %v723_v1 }
 0x66e   : > { %v1271_v27 = vsel %vm951_vm12, %v1106_v5, %v1227_v25  ;;  %v1240_v10 = vrot.slane %v1155_v39, 4  ;;  %v1272_v61 = vsel %vm951_vm12, %v1107_v7, %v1228_v15 }
 0x671   : > { %v1125_v30 = vpop.permute.xlu0 %1124 }
 0x672   : > { %v1129_v0 = vpop.permute.xlu1 %1128  ;;  %v1134_v28 = vsel %vm743_vm0, %v1125_v30, %v2505_v37  ;;  %v1135_v55 = vsel %vm743_vm0, %v2579_v44, %v1125_v30 }
 0x673   : > { %v1132_v34 = vsel %vm743_vm0, %v1129_v0, %v2579_v44  ;;  %v1133_v59 = vsel %vm743_vm0, %v2505_v37, %v1129_v0  ;;  %v1225_v44 = vrot.slane %v1120_v6, 4  ;;  %v1137_v63 = vmul.f32 %v1134_v28, %v2761_v18 }
 0x674   : > { %v1138_v24 = vmul.f32 %v1133_v59, %v753_v52  ;;  %v1139_v60 = vmul.f32 %v1132_v34, %v754_v8  ;;  %v1103_v8 = vsel %vm689_vm15, %v2554_v35, %v1093_v16  ;;  %v1220_v52 = vld [vmem:[%s2733_s7] sm:$0xf] }
 0x675   : > { %v1104_v14 = vmul.f32 %v1103_v8, %v2757_v48 }
 0x676   : > { %v1275_v29 = vsel %vm951_vm12, %v1138_v24, %v1239_v17  ;;  %v1276_v21 = vsel %vm951_vm12, %v1139_v60, %v1240_v10 }
 0x677   : > { %v1287_v45 = vpack.c.bf16 %v1275_v29, %v1271_v27  ;;  %v1288_v9 = vpack.c.bf16 %v1276_v21, %v1272_v61  ;;  %v1269_v41 = vsel %vm951_vm12, %v1104_v14, %v1225_v44 }
 0x679   : > { %1345 = vmatpush.bf16.msrb.mxu2 %v1287_v45  ;;  %1358 = vmatpush.bf16.msrb.mxu3 %v1288_v9 }
 0x67a   : > { %v1141_v13 = vpop.permute.xlu1 %1140 }
 0x67b   : > { %v1150_v1 = vsel %vm559_vm14, %v1141_v13, %v2507_v50  ;;  %v1151_v35 = vsel %vm559_vm14, %v1147_v42, %v1141_v13  ;;  %v1136_v50 = vmul.f32 %v1135_v55, %v2760_v22 }
 0x67c   : > { %v1152_v31 = vmul.f32 %v1151_v35, %v2758_v26  ;;  %v1153_v37 = vmul.f32 %v1150_v1, %v2759_v33  ;;  %1538 = vmatmul.msk.bf16.vlgmr.msrb.gmra.mxu2 %vm980_vm1, %v1220_v52  ;;  %1539 = vmatmul.msk.bf16.vlgmr.msrb.gmra.mxu3 %vm980_vm1, %v1220_v52 }
 0x67e   : > { %v1237_v58 = vrot.slane %v1152_v31, 4  ;;  %v1238_v36 = vrot.slane %v1153_v37, 4 }
 0x680   : > { %v1273_v47 = vsel %vm951_vm12, %v1136_v50, %v1237_v58  ;;  %v1274_v57 = vsel %vm951_vm12, %v1137_v63, %v1238_v36 }
 0x681   : > { %v1285_v19 = vpack.c.bf16 %v1273_v47, %v1269_v41  ;;  %v1286_v16 = vpack.c.bf16 %v1274_v57, %v1270_v46 }
 0x683   : > { %1319 = vmatpush.bf16.msrb.mxu0 %v1285_v19  ;;  %1332 = vmatpush.bf16.msrb.mxu1 %v1286_v16 }
 0x686   : > { %1536 = vmatmul.msk.bf16.vlgmr.msrb.gmra.mxu0 %vm980_vm1, %v1220_v52  ;;  %1537 = vmatmul.msk.bf16.vlgmr.msrb.gmra.mxu1 %vm980_vm1, %v1220_v52 }
 0x6c7   : > { %v1368_v3 = vpop.permute.xlu1 %1367 }
 0x6ff   : > { %v1347_v2 = vpop.f32.mrf.mxu2  ;;  %v1360_v42 = vpop.f32.mrf.mxu3 }
 0x700   : > { %v1372_v40 = vmul.f32 %v1368_v3, %v1347_v2  ;;  %v1373_v62 = vmul.f32 %v1368_v3, %v1360_v42 }
 0x702   : > { %v1382_v51 = vadd.f32 %v1378_v32, %v1372_v40  ;;  %v1383_v53 = vadd.f32 %v1378_v32, %v1373_v62 }
 0x703   : > { %v1321_v49 = vpop.f32.mrf.mxu0  ;;  %v1334_v12 = vpop.f32.mrf.mxu1 }
 0x704   : > { %v1386_v46 = vmax.f32 %v1382_v51, 0.0  ;;  %v1387_v23 = vmax.f32 %v1383_v53, 0.0  ;;  %v1370_v11 = vmul.f32 %v1368_v3, %v1321_v49  ;;  %v1371_v25 = vmul.f32 %v1368_v3, %v1334_v12 }
 0x706   : > { %1540 = vst [vmem:[%s429_s21 + $0x10] sm:$0xff] %v1386_v46  ;;  %v1380_v5 = vadd.f32 %v1378_v32, %v1370_v11  ;;  %v1381_v54 = vadd.f32 %v1378_v32, %v1371_v25 }
 0x707   : > { %1541 = vst [vmem:[%s429_s21 + $0x18] sm:$0xff] %v1387_v23  ;;  %v1349_v20 = vpop.f32.mrf.mxu2  ;;  %v1362_v27 = vpop.f32.mrf.mxu3 }
 0x708   : > { %v1384_v43 = vmax.f32 %v1380_v5, 0.0  ;;  %v1385_v56 = vmax.f32 %v1381_v54, 0.0 }
 0x70a   : > { %1388 = vst [vmem:[%s429_s21] sm:$0xff] %v1384_v43 }
 0x70b   : > { %1389 = vst [vmem:[%s429_s21 + $0x8] sm:$0xff] %v1385_v56  ;;  %v1323_v38 = vpop.f32.mrf.mxu0  ;;  %v1336_v39 = vpop.f32.mrf.mxu1 }
 0x70c   : > { %1760 = shalt.err (!%p1757_p12)
}
 0x70d   : > { %s1827_s29 = smov 256  }
 0x70e   : > { %1562 = dma.vmem_to_hbm [thread:$0]  (%p1952_p5), %s1408_s15, 512, %s1410_s17, %s1394_s30, %s1827_s29, %s1827_s29, %s1816_s12  }
 0x70f PF: > { %s1424_s11 = sand.u32 1, %s1791_s13   ;;  %p2762_p13 = scmp.ge.s32.totalorder %s1803_s16, 2 }
 0x710   : > { %s1425_s18 = scalar_lea.sflag [#allocation4], %s1424_s11 }
 0x711   : > { %p1576_p0 = pnand %p2762_p13, %p1918_p6 }
 0x713   : > { %p1577_p3 = pneg %p1576_p0 }
 0x715   : > { %1786 = dma.done.wait (%p1577_p3), %s1425_s18, 512  }
 0x716   : > { %1788 = vsyncadd (%p1577_p3), %s1425_s18, 4294966784  ;;  %s2763_s26 = sld [smem:[#allocation12_spill]]  ;;  %p24_p7 = scmp.ge.s32.totalorder %s1939_s25, 4  }
 0x717   : > { %s2764_s15 = sld [smem:[#allocation13_spill]]  ;;  %s2765_s13 = smov %s1795_s14 }
 0x718   : > { %s2767_s16 = smov %s1939_s25  ;;  %26 = sbr.rel (!%p24_p7) target bundleno = 9 (0x9), region = 135 }
 0x71c   : > { %s2766_s14 = smov %s2763_s26 }
 0x71d   :  { %1431 = vsyncpa [#allocation3], 1 }
 0x71e   :  { %1433 = vsyncpa [#allocation3 + $0x1], 1 }
 0x71f   :  { %1434 = vsyncpa [#allocation6], 1 }
 0x720   :  { %1435 = vsyncpa [#allocation4], 1 }
 0x721   :  { %1437 = vsyncpa [#allocation4 + $0x1], 1 }

// kernel: tpu_custom_call.1
= control target key start
LH: loop header
LB: loop body
LE: loop exit
PB: predicated region body
PF: predicated region fallthrough
CT: control target
= control target key end

     0   :  { %s2726_s0 = inlined_call_operand.vmem [shape: f32[4,4,64], index: 0, kind: input, shape index: {}]   ;;  %s2727_s1 = inlined_call_operand.hbm [shape: f32[4,4,256], index: 1, kind: input, shape index: {}]   ;;  %s2728_s2 = inlined_call_operand.hbm [shape: f32[10,256], index: 2, kind: input, shape index: {}]   ;;  %s2729_s3 = inlined_call_operand.hbm [shape: f32[9,512], index: 3, kind: input, shape index: {}]   ;;  %s2730_s4 = inlined_call_operand.vmem [shape: bf16[4,36], index: 4, kind: input, shape index: {}]   ;;  %s2731_s5 = inlined_call_operand.vmem [shape: f32[4,1], index: 5, kind: input, shape index: {}]   ;;  %s2732_s6 = inlined_call_operand.vmem [shape: f32[4,1], index: 6, kind: input, shape index: {}]   ;;  %s2733_s7 = inlined_call_operand.vmem [shape: bf16[8,36], index: 7, kind: input, shape index: {}]   ;;  %s2734_s8 = inlined_call_operand.vmem [shape: f32[8,1], index: 8, kind: input, shape index: {}]   ;;  %s2735_s9 = inlined_call_operand.vmem [shape: f32[8,1], index: 9, kind: input, shape index: {}]   ;;  %s2736_s10 = inlined_call_operand.hbm [shape: f32[4,8,256], index: 10, kind: output, shape index: {}]  }
   0x1   :  { %2745 = sst [smem:[#allocation14_spill]] %s2728_s2 }
   0x2   :  { %2746 = sst [smem:[#allocation15_spill]] %s2729_s3 }
   0x3   :  { %15 = vsyncpa [#allocation3], 0 }
   0x4   :  { %17 = vsyncpa [#allocation3 + $0x1], 0 }
   0x5   :  { %18 = vsyncpa [#allocation6], 0 }
   0x6   :  { %19 = vsyncpa [#allocation4], 0 }
   0x7   :  { %21 = vsyncpa [#allocation4 + $0x1], 0  ;;  %s1883_s13 = smov 0   ;;  %s1885_s14 = smov 0  }
   0x8   :  { %s1887_s15 = smov 0   ;;  %s1889_s16 = smov 0  }
   0x9 LB: > { %2747 = sst [smem:[#allocation12_spill]] %s1799_s15  ;;  %s1904_s17 = sadd.s32 4294967295, %s1803_s16   ;;  %s1803_s16 = sphi %s1889_s16, %s2767_s16   ;;  %s1799_s15 = sphi %s1887_s15, %s2764_s15   ;;  %s1795_s14 = sphi %s1885_s14, %s2766_s14   ;;  %s1791_s13 = sphi %s1883_s13, %s2765_s13  }
   0xa   : > { %s1514_s18 = sadd.s32 4294967294, %s1803_s16   ;;  %p73_p0 = scmp.ne.s32.totalorder %s1795_s14, %s1791_s13 }
   0xb   : > { %p74_p1 = scmp.eq.s32.totalorder %s1904_s17, 0  ;;  %p265_p2 = scmp.eq.s32.totalorder %s1904_s17, 1 }
   0xc   : > { %p271_p3 = scmp.eq.s32.totalorder %s1514_s18, 1  ;;  %p1515_p5 = scmp.ge.s32.totalorder %s1803_s16, 1 }
   0xd   : > { %p1913_p4 = por %p74_p1, %p73_p0  ;;  %p278_p7 = scmp.lt.s32.totalorder %s1803_s16, 3 }
   0xe   : > { %p1918_p6 = por %p271_p3, %p73_p0  ;;  %s2750_s2 = sld [smem:[#allocation14_spill]] }
   0xf   : > { %p1926_p8 = pnand %p1515_p5, %p278_p7  ;;  %s1805_s25 = smov [#allocation5]  }
  0x10   : > { %s291_s26 = sshll.u32 %s1805_s25, 4  ;;  %s2752_s3 = sld [smem:[#allocation15_spill]]  ;;  %s292_s26 = int_to_ptr.vmem [resolvable:$true] %s291_s26 }
  0x11   : > { %p1564_p9 = pneg %p1926_p8  ;;  %s1806_s30 = smov 256  }
  0x12   : > { %s1807_s11 = smov 16   ;;  %s1808_s12 = smov [#allocation7]  }
  0x13   : > { %p1565_p10 = pnand %p1564_p9, %p74_p1  ;;  %s305_s18 = sshll.u32 %s1808_s12, 4  ;;  %s306_s18 = int_to_ptr.vmem [resolvable:$true] %s305_s18 }
  0x14   : > { %s289_s23 = sshll.u32 %s2750_s2, 4  ;;  %s1809_s21 = smov 512   ;;  %s290_s23 = int_to_ptr.hbm [resolvable:$true] %s289_s23 }
  0x15   : > { %1567 = dma.hbm_to_vmem [thread:$0]  (!%p1565_p10), %s290_s23, 512, %s292_s26, [#allocation6], %s1806_s30, %s1806_s30, %s1807_s11  }
  0x16   : > { %s303_s29 = sshll.u32 %s2752_s3, 4  ;;  %s1810_s22 = smov 32   ;;  %s304_s29 = int_to_ptr.hbm [resolvable:$true] %s303_s29 }
  0x17   : > { %1570 = dma.hbm_to_vmem [thread:$0]  (!%p1565_p10), %s304_s29, 1024, %s306_s18, [#allocation6], %s1809_s21, %s1809_s21, %s1810_s22  }
  0x18   : > { %s1939_s25 = sadd.s32 1, %s1803_s16   ;;  %s60_s28 = sadd.s32 1, %s1799_s15 }
  0x19   : > { %s57_s27 = ssub.s32 %s1803_s16, %s1939_s25  ;;  %p67_p13 = scmp.ne.s32.totalorder %s1799_s15, %s1795_s14 }
  0x1a   : > { %p58_p12 = scmp.eq.s32.totalorder %s57_s27, 0  ;;  %p68_p0 = scmp.eq.s32.totalorder %s1803_s16, 0 }
  0x1b   : > { %p1952_p5 = por %p265_p2, %p67_p13  ;;  %p1581_p7 = scmp.lt.s32.totalorder %s1803_s16, 2 }
  0x1c   : > { %s1948_s2 = scalar_select %p58_p12, %s1799_s15, %s60_s28  }
  0x1d   : > { %p69_p3 = por %p68_p0, %p67_p13  ;;  %s346_s26 = sand.u32 1, %s1799_s15  }
  0x1e   : > { %2753 = sst [smem:[#allocation13_spill]] %s1948_s2  ;;  %s1519_s30 = sshll.u32 %s346_s26, 4 }
  0x1f   : > { %s1549_s29 = sshll.u32 %s1803_s16, 4  ;;  %s350_s21 = scalar_lea.vmem [#allocation2], %s1519_s30 }
  0x20   : > { %s356_s18 = scalar_lea.hbm %s2727_s1, %s1549_s29  ;;  %s359_s22 = sshll.u32 %s350_s21, 4  ;;  %s360_s22 = int_to_ptr.vmem [resolvable:$true] %s359_s22 }
  0x21   : > { %s357_s27 = sshll.u32 %s356_s18, 4  ;;  %p1962_p9 = pnand %p1581_p7, %p69_p3  ;;  %s358_s27 = int_to_ptr.hbm [resolvable:$true] %s357_s27 }
  0x22   : > { %s347_s3 = scalar_lea.sflag [#allocation3], %s346_s26  ;;  %s1703_s2 = sshra.s32 %s358_s27, 4  ;;  %s1704_s2 = int_to_ptr.hbm [resolvable:$true] %s1703_s2 }
  0x23   : > { %s1705_s15 = scalar_lea.hbm %s1704_s2, 16  ;;  %p1707_p10 = pneg %p1962_p9 }
  0x24   : > { %p1706_p2 = scmp.ne.s32.totalorder %s1704_s2, %s1705_s15  ;;  %s1710_s11 = scalar_lea.hbm %s2727_s1, 32 }
  0x25   : > { %p1711_p0 = scmp.lt.s32.totalorder %s1704_s2, %s2727_s1  ;;  %p1712_p3 = scmp.lt.s32.totalorder %s1710_s11, %s1705_s15 }
  0x26   : > { %p1708_p12 = pnand %p1707_p10, %p1706_p2 }
  0x27   : > { %p1713_p7 = por %p1712_p3, %p1711_p0 }
  0x28   : > { %p1709_p13 = pneg %p1708_p12 }
  0x2a   : > { %p1714_p11 = pnand %p1713_p7, %p1709_p13 }
  0x2c   : > { %1717 = shalt.err (!%p1714_p11)
}
  0x2d   : > { %s1811_s26 = smov 128   ;;  %s1812_s21 = smov 8  }
  0x2e   : > { %1574 = dma.hbm_to_vmem [thread:$0]  (!%p1962_p9), %s358_s27, 256, %s360_s22, %s347_s3, %s1811_s26, %s1811_s26, %s1812_s21  }
  0x2f   : > { %371 = sbr.rel (%p1926_p8) target bundleno = 1807 (0x70f), region = 60  ;;  %s1979_s29 = sand.u32 (!%p1926_p8), 1, %s1795_s14  }
  0x30   : > { %s1524_s30 = sshll.u32 (!%p1926_p8), %s1979_s29, 4  ;;  %s374_s2 = scalar_lea.sflag (!%p1926_p8), [#allocation3], %s1979_s29 }
  0x31   : > { %s1983_s15 = scalar_lea.vmem (!%p1926_p8), [#allocation2], %s1524_s30 }
  0x34   : > { %1778 = dma.done.wait (%p1913_p4), %s374_s2, 256  }
  0x35   : > { %1780 = vsyncadd (%p1913_p4), %s374_s2, 4294967040 }
  0x36   : > { %1782 = dma.done.wait (%p74_p1), [#allocation6], 1536  }
  0x37   : > { %1784 = vsyncadd (%p74_p1), [#allocation6], 4294965760  ;;  %s1528_s3 = sshll.u32 %s1904_s17, 1  ;;  %v1813_v0 = vmov 0   ;;  %vm440_vm0 = vcmask 523264   ;;  %s1814_s28 = smov 64   ;;  %v455_v14 = vlaneseq }
  0x38   : > { %p431_p8 = scmp.lt.s32.totalorder %s1528_s3, 3  ;;  %1641 = vset.pattern.permute.xlu0 %v1813_v0  ;;  %1640 = vset.pattern.permute.xlu2 %v1813_v0  ;;  %v442_v1 = vld [vmem:[#allocation5] ss:$8 sm:$0x3]  ;;  %s1815_s11 = smov 32  }
  0x39   : > { %1642 = vset.pattern.permute.xlu1 %v1813_v0  ;;  %vm443_vm1 = vcmp.ne.f32.partialorder %v442_v1, 0.0  ;;  %v461_v13 = vld [vmem:[#allocation5 + $0x1] ss:$8 sm:$0x3]  ;;  %v2002_v18 = vand.u32 127, %v455_v14  ;;  %s1816_s12 = smov 16  }
  0x3a   : > { %s2769_s3 = smov (!%p431_p8, %s1528_s3), 3  ;;  %v444_v4 = vsel %vm443_vm1, 1, %v1813_v0  ;;  %vm462_vm4 = vcmp.ne.f32.partialorder %v461_v13, 0.0  ;;  %v478_v31 = vld [vmem:[#allocation5 + $0x2] ss:$8 sm:$0x3] }
  0x3b   : > { %s1529_s24 = sshll.u32 %s2769_s3, 2  ;;  %v445_v5 = vperm.slane %v444_v4, 0  ;;  %v446_v8 = vperm.slane %v444_v4, 1  ;;  %v463_v17 = vsel %vm462_vm4, 1, %v1813_v0  ;;  %vm457_vm5 = vcmp.lt.s32.totalorder %v2002_v18, 64  ;;  %s1817_s18 = smov 8  }
  0x3c   : > { %s434_s27 = scalar_lea.vmem %s2726_s0, %s1529_s24  ;;  %v465_v19 = vperm.slane %v463_v17, 1  ;;  %v464_v20 = vperm.slane %v463_v17, 0  ;;  %vm479_vm8 = vcmp.ne.f32.partialorder %v478_v31, 0.0  ;;  %vm474_vm9 = vcmp.lt.s32.totalorder %v2002_v18, 32  ;;  %s1818_s26 = smov 4  }
  0x3d   : > { %v1530_v2 = vld [vmem:[%s434_s27 + $0x4] sm:$0xf]  ;;  %v439_v3 = vld [vmem:[%s434_s27] sm:$0xf]  ;;  %vm447_vm2 = vcmp.eq.s32.totalorder %v445_v5, 1  ;;  %vm448_vm3 = vcmp.eq.s32.totalorder %v446_v8, 1 }
  0x3e   : > { %v606_v6 = vsel %vm440_vm0, %v1530_v2, 0.0  ;;  %v441_v7 = vsel %vm440_vm0, %v439_v3, 0.0  ;;  %vm467_vm6 = vcmp.eq.s32.totalorder %v465_v19, 1  ;;  %vm466_vm7 = vcmp.eq.s32.totalorder %v464_v20, 1  ;;  %s1819_s21 = smov 2   ;;  %s2738_s30 = smov 1  }
  0x3f   : > { %v607_v9 = vsel %vm447_vm2, 0.0, %v606_v6  ;;  %v449_v10 = vsel %vm447_vm2, 0.0, %v441_v7  ;;  %v608_v11 = vsel %vm448_vm3, %v606_v6, 0.0  ;;  %v450_v12 = vsel %vm448_vm3, %v441_v7, 0.0  ;;  %s1821_s2 = smov 111   ;;  %s1822_s3 = smov 127  }
  0x40   : > { %609 = vrot.lane.b32.xlu1 %v607_v9, %s1814_s28  ;;  %451 = vrot.lane.b32.xlu0 %v449_v10, %s1814_s28  ;;  %v480_v33 = vsel %vm479_vm8, 1, %v1813_v0  ;;  %v495_v47 = vld [vmem:[#allocation5 + $0x3] ss:$8 sm:$0x3]  ;;  %vm491_vm13 = vcmp.lt.s32.totalorder %v2002_v18, 16  ;;  %vm508_vm1 = vcmp.lt.s32.totalorder %v2002_v18, 8 }
  0x41   : > { %v481_v34 = vperm.slane %v480_v33, 0  ;;  %v482_v35 = vperm.slane %v480_v33, 1  ;;  %vm496_vm12 = vcmp.ne.f32.partialorder %v495_v47, 0.0  ;;  %v512_v63 = vld [vmem:[#allocation5 + $0x4] ss:$8 sm:$0x3] }
  0x42   : > { %v497_v48 = vsel %vm496_vm12, 1, %v1813_v0  ;;  %vm513_vm0 = vcmp.ne.f32.partialorder %v512_v63, 0.0  ;;  %v546_v33 = vld [vmem:[#allocation5 + $0x6] ss:$8 sm:$0x3]  ;;  %s1823_s24 = smov 112  }
  0x43   : > { %vm483_vm10 = vcmp.eq.s32.totalorder %v481_v34, 1  ;;  %vm484_vm11 = vcmp.eq.s32.totalorder %v482_v35, 1  ;;  %v498_v49 = vperm.slane %v497_v48, 0  ;;  %v499_v50 = vperm.slane %v497_v48, 1  ;;  %s1824_s19 = smov 113   ;;  %s1825_s22 = smov 17  }
  0x44   : > { %v514_v1 = vsel %vm513_vm0, 1, %v1813_v0  ;;  %vm547_vm8 = vcmp.ne.f32.partialorder %v546_v33, 0.0  ;;  %s1826_s27 = smov 15  }
  0x45   : > { %vm500_vm14 = vcmp.eq.s32.totalorder %v498_v49, 1  ;;  %vm501_vm15 = vcmp.eq.s32.totalorder %v499_v50, 1  ;;  %v515_v2 = vperm.slane %v514_v1, 0  ;;  %v516_v3 = vperm.slane %v514_v1, 1 }
  0x46   : > { %v548_v34 = vsel %vm547_vm8, 1, %v1813_v0  ;;  %v563_v49 = vld [vmem:[#allocation5 + $0x7] ss:$8 sm:$0x3]  ;;  %vm984_vm8 = vcmask 1041408  }
  0x47   : > { %vm517_vm2 = vcmp.eq.s32.totalorder %v515_v2, 1  ;;  %vm518_vm3 = vcmp.eq.s32.totalorder %v516_v3, 1  ;;  %v549_v35 = vperm.slane %v548_v34, 0  ;;  %vm564_vm12 = vcmp.ne.f32.partialorder %v563_v49, 0.0 }
  0x48   : > { %611 = vrot.lane.b32.xlu1 %v608_v11, %s1814_s28  ;;  %453 = vrot.lane.b32.xlu0 %v450_v12, %s1814_s28  ;;  %v565_v50 = vsel %vm564_vm12, 1, %v1813_v0  ;;  %v579_v2 = vld [vmem:[#allocation5 + $0x10] ss:$8 sm:$0x3]  ;;  %vm951_vm12 = vcmask 1043456   ;;  %s1551_s28 = sshll.u32 %s1904_s17, 5 }
  0xb2   : > { %v610_v15 = vpop.permute.xlu1 %609  ;;  %v452_v16 = vpop.permute.xlu0 %451 }
  0xba   : > { %v612_v21 = vpop.permute.xlu1 %611  ;;  %v454_v22 = vpop.permute.xlu0 %453 }
  0xbb   : > { %v613_v23 = vsel %vm457_vm5, %v610_v15, %v612_v21  ;;  %v614_v24 = vsel %vm457_vm5, %v612_v21, %v610_v15  ;;  %v459_v25 = vsel %vm457_vm5, %v454_v22, %v452_v16  ;;  %v458_v29 = vsel %vm457_vm5, %v452_v16, %v454_v22  ;;  %v529_v16 = vld [vmem:[#allocation5 + $0x5] ss:$8 sm:$0x3] }
  0xbc   : > { %v616_v26 = vsel %vm467_vm6, %v613_v23, %v608_v11  ;;  %v615_v27 = vsel %vm466_vm7, %v614_v24, %v607_v9  ;;  %v468_v28 = vsel %vm466_vm7, %v459_v25, %v449_v10  ;;  %v469_v30 = vsel %vm467_vm6, %v458_v29, %v450_v12 }
  0xbd   : > { %619 = vrot.lane.b32.xlu1 %v616_v26, %s1815_s11  ;;  %617 = vrot.lane.b32.xlu0 %v615_v27, %s1815_s11  ;;  %vm530_vm4 = vcmp.ne.f32.partialorder %v529_v16, 0.0  ;;  %vm525_vm5 = vcmp.lt.s32.totalorder %v2002_v18, 4 }
  0xbe   : > { %470 = vrot.lane.b32.xlu2 %v468_v28, %s1815_s11  ;;  %v531_v17 = vsel %vm530_vm4, 1, %v1813_v0 }
  0xbf   : > { %v532_v19 = vperm.slane %v531_v17, 0  ;;  %v533_v20 = vperm.slane %v531_v17, 1 }
  0xc1   : > { %vm534_vm6 = vcmp.eq.s32.totalorder %v532_v19, 1  ;;  %vm535_vm7 = vcmp.eq.s32.totalorder %v533_v20, 1  ;;  %v595_v19 = vld [vmem:[#allocation5 + $0x11] ss:$8 sm:$0x3] }
  0xc2   : > { %vm596_vm4 = vcmp.ne.f32.partialorder %v595_v19, 0.0 }
  0xc3   : > { %v597_v20 = vsel %vm596_vm4, 1, %v1813_v0 }
  0xc6   : > { %472 = vrot.lane.b32.xlu2 %v469_v30, %s1815_s11 }
 0x118   : > { %v471_v32 = vpop.permute.xlu2 %470 }
 0x120   : > { %v473_v36 = vpop.permute.xlu2 %472 }
 0x121   : > { %v475_v37 = vsel %vm474_vm9, %v471_v32, %v473_v36  ;;  %v476_v38 = vsel %vm474_vm9, %v473_v36, %v471_v32  ;;  %v550_v36 = vperm.slane %v548_v34, 1 }
 0x122   : > { %v485_v39 = vsel %vm483_vm10, %v476_v38, %v468_v28  ;;  %v486_v40 = vsel %vm484_vm11, %v475_v37, %v469_v30 }
 0x123   : > { %487 = vrot.lane.b32.xlu2 %v485_v39, %s1816_s12  ;;  %489 = vrot.lane.b32.xlu0 %v486_v40, %s1816_s12 }
 0x12f   : > { %v620_v41 = vpop.permute.xlu1 %619  ;;  %v618_v42 = vpop.permute.xlu0 %617 }
 0x130   : > { %v621_v43 = vsel %vm474_vm9, %v618_v42, %v620_v41  ;;  %v622_v44 = vsel %vm474_vm9, %v620_v41, %v618_v42  ;;  %vm542_vm9 = vcmp.lt.s32.totalorder %v2002_v18, 2 }
 0x131   : > { %v623_v45 = vsel %vm483_vm10, %v622_v44, %v615_v27  ;;  %v624_v46 = vsel %vm484_vm11, %v621_v43, %v616_v26  ;;  %vm551_vm10 = vcmp.eq.s32.totalorder %v549_v35, 1  ;;  %vm552_vm11 = vcmp.eq.s32.totalorder %v550_v36, 1  ;;  %v2139_v35 = vld [vmem:[#allocation7 + $0x20] ss:$8 sm:$0xf] }
 0x132   : > { %625 = vrot.lane.b32.xlu1 %v623_v45, %s1816_s12  ;;  %627 = vrot.lane.b32.xlu2 %v624_v46, %s1816_s12  ;;  %v893_v36 = vperm.slane %v2139_v35, 3 }
 0x17d   : > { %v488_v51 = vpop.permute.xlu2 %487 }
 0x18c   : > { %v628_v57 = vpop.permute.xlu2 %627 }
 0x195   : > { %v490_v52 = vpop.permute.xlu0 %489 }
 0x196   : > { %v492_v53 = vsel %vm491_vm13, %v488_v51, %v490_v52  ;;  %v493_v54 = vsel %vm491_vm13, %v490_v52, %v488_v51  ;;  %v566_v51 = vperm.slane %v565_v50, 0  ;;  %v567_v52 = vperm.slane %v565_v50, 1 }
 0x197   : > { %v502_v55 = vsel %vm500_vm14, %v493_v54, %v485_v39  ;;  %v503_v56 = vsel %vm501_vm15, %v492_v53, %v486_v40 }
 0x198   : > { %504 = vrot.lane.b32.xlu0 %v502_v55, %s1817_s18  ;;  %506 = vrot.lane.b32.xlu1 %v503_v56, %s1817_s18  ;;  %vm569_vm0 = vcmp.eq.s32.totalorder %v567_v52, 1 }
 0x1a4   : > { %v626_v58 = vpop.permute.xlu1 %625 }
 0x1a5   : > { %v629_v59 = vsel %vm491_vm13, %v626_v58, %v628_v57  ;;  %v630_v60 = vsel %vm491_vm13, %v628_v57, %v626_v58 }
 0x1a6   : > { %v631_v61 = vsel %vm500_vm14, %v630_v60, %v623_v45  ;;  %v632_v62 = vsel %vm501_vm15, %v629_v59, %v624_v46  ;;  %vm559_vm14 = vcmp.lt.s32.totalorder %v2002_v18, 1  ;;  %vm568_vm15 = vcmp.eq.s32.totalorder %v566_v51, 1 }
 0x1a7   : > { %633 = vrot.lane.b32.xlu2 %v631_v61, %s1817_s18  ;;  %635 = vrot.lane.b32.xlu0 %v632_v62, %s1817_s18 }
 0x201   : > { %v634_v10 = vpop.permute.xlu2 %633 }
 0x20a   : > { %v505_v4 = vpop.permute.xlu0 %504  ;;  %v507_v5 = vpop.permute.xlu1 %506 }
 0x20b   : > { %v509_v6 = vsel %vm508_vm1, %v505_v4, %v507_v5  ;;  %v510_v7 = vsel %vm508_vm1, %v507_v5, %v505_v4 }
 0x20c   : > { %v519_v8 = vsel %vm517_vm2, %v510_v7, %v502_v55  ;;  %v520_v9 = vsel %vm518_vm3, %v509_v6, %v503_v56 }
 0x20d   : > { %521 = vrot.lane.b32.xlu1 %v519_v8, %s1818_s26  ;;  %523 = vrot.lane.b32.xlu2 %v520_v9, %s1818_s26 }
 0x219   : > { %v636_v11 = vpop.permute.xlu0 %635 }
 0x21a   : > { %v637_v12 = vsel %vm508_vm1, %v634_v10, %v636_v11  ;;  %v638_v13 = vsel %vm508_vm1, %v636_v11, %v634_v10  ;;  %vm580_vm1 = vcmp.ne.f32.partialorder %v579_v2, 0.0 }
 0x21b   : > { %v639_v14 = vsel %vm517_vm2, %v638_v13, %v631_v61  ;;  %v640_v15 = vsel %vm518_vm3, %v637_v12, %v632_v62  ;;  %v581_v3 = vsel %vm580_vm1, 1, %v1813_v0  ;;  %vm980_vm1 = vcmask 293888  }
 0x21c   : > { %641 = vrot.lane.b32.xlu0 %v639_v14, %s1818_s26  ;;  %643 = vrot.lane.b32.xlu1 %v640_v15, %s1818_s26  ;;  %v582_v4 = vperm.slane %v581_v3, 0  ;;  %v583_v5 = vperm.slane %v581_v3, 1  ;;  %s1406_s26 = scalar_lea.hbm %s2736_s10, %s1551_s28 }
 0x21d   : > { %s1409_s17 = sshll.u32 %s1406_s26, 4  ;;  %s1410_s17 = int_to_ptr.hbm [resolvable:$true] %s1409_s17 }
 0x21e   : > { %vm584_vm2 = vcmp.eq.s32.totalorder %v582_v4, 1  ;;  %vm585_vm3 = vcmp.eq.s32.totalorder %v583_v5, 1 }
 0x267   : > { %v524_v21 = vpop.permute.xlu2 %523 }
 0x27f   : > { %v522_v22 = vpop.permute.xlu1 %521 }
 0x280   : > { %v526_v23 = vsel %vm525_vm5, %v522_v22, %v524_v21  ;;  %v527_v24 = vsel %vm525_vm5, %v524_v21, %v522_v22  ;;  %v598_v21 = vperm.slane %v597_v20, 0 }
 0x281   : > { %v536_v25 = vsel %vm534_vm6, %v527_v24, %v519_v8  ;;  %v537_v26 = vsel %vm535_vm7, %v526_v23, %v520_v9 }
 0x282   : > { %538 = vrot.lane.b32.xlu2 %v536_v25, %s1819_s21  ;;  %540 = vrot.lane.b32.xlu0 %v537_v26, %s1819_s21 }
 0x28e   : > { %v642_v27 = vpop.permute.xlu0 %641  ;;  %v644_v28 = vpop.permute.xlu1 %643 }
 0x28f   : > { %v645_v29 = vsel %vm525_vm5, %v642_v27, %v644_v28  ;;  %v646_v30 = vsel %vm525_vm5, %v644_v28, %v642_v27  ;;  %vm600_vm5 = vcmp.eq.s32.totalorder %v598_v21, 1 }
 0x290   : > { %v647_v31 = vsel %vm534_vm6, %v646_v30, %v639_v14  ;;  %v648_v32 = vsel %vm535_vm7, %v645_v29, %v640_v15  ;;  %vm882_vm7 = vcmp.lt.s32.totalorder %v2002_v18, 111 }
 0x291   : > { %649 = vrot.lane.b32.xlu1 %v647_v31, %s1819_s21  ;;  %651 = vrot.lane.b32.xlu2 %v648_v32, %s1819_s21 }
 0x2dc   : > { %v539_v37 = vpop.permute.xlu2 %538 }
 0x2eb   : > { %v652_v43 = vpop.permute.xlu2 %651 }
 0x2f4   : > { %v541_v38 = vpop.permute.xlu0 %540 }
 0x2f5   : > { %v543_v39 = vsel %vm542_vm9, %v539_v37, %v541_v38  ;;  %v544_v40 = vsel %vm542_vm9, %v541_v38, %v539_v37 }
 0x2f6   : > { %v553_v41 = vsel %vm551_vm10, %v544_v40, %v536_v25  ;;  %v554_v42 = vsel %vm552_vm11, %v543_v39, %v537_v26  ;;  %v599_v26 = vperm.slane %v597_v20, 1 }
 0x2f7   : > { %555 = vrot.lane.b32.xlu0 %v553_v41, %s2738_s30  ;;  %557 = vrot.lane.b32.xlu1 %v554_v42, %s2738_s30 }
 0x2f8   : > { %vm601_vm6 = vcmp.eq.s32.totalorder %v599_v26, 1 }
 0x303   : > { %v650_v44 = vpop.permute.xlu1 %649 }
 0x304   : > { %v653_v45 = vsel %vm542_vm9, %v650_v44, %v652_v43  ;;  %v654_v46 = vsel %vm542_vm9, %v652_v43, %v650_v44  ;;  %vm798_vm9 = vcmp.lt.s32.totalorder %v2002_v18, 127 }
 0x305   : > { %v655_v47 = vsel %vm551_vm10, %v654_v46, %v647_v31  ;;  %v656_v48 = vsel %vm552_vm11, %v653_v45, %v648_v32  ;;  %v2153_v45 = vld [vmem:[#allocation7 + $0x5] ss:$8 sm:$0xf]  ;;  %v892_v46 = vperm.slane %v2139_v35, 2  ;;  %vm854_vm10 = vcmp.lt.s32.totalorder %v2002_v18, 112 }
 0x306   : > { %657 = vrot.lane.b32.xlu2 %v655_v47, %s2738_s30  ;;  %659 = vrot.lane.b32.xlu0 %v656_v48, %s2738_s30  ;;  %v809_v49 = vperm.slane %v2153_v45, 3  ;;  %vm826_vm11 = vcmp.lt.s32.totalorder %v2002_v18, 113 }
 0x360   : > { %v658_v59 = vpop.permute.xlu2 %657 }
 0x369   : > { %v556_v53 = vpop.permute.xlu0 %555  ;;  %v558_v54 = vpop.permute.xlu1 %557 }
 0x36a   : > { %v560_v55 = vsel %vm559_vm14, %v556_v53, %v558_v54  ;;  %v561_v56 = vsel %vm559_vm14, %v558_v54, %v556_v53 }
 0x36b   : > { %v570_v57 = vsel %vm568_vm15, %v561_v56, %v553_v41  ;;  %v571_v58 = vsel %vm569_vm0, %v560_v55, %v554_v42 }
 0x36c   : > { %572 = vrot.lane.b32.xlu1 %v570_v57, %s2738_s30  ;;  %574 = vrot.lane.b32.xlu2 %v571_v58, %s2738_s30 }
 0x378   : > { %v660_v60 = vpop.permute.xlu0 %659 }
 0x379   : > { %v661_v61 = vsel %vm559_vm14, %v658_v59, %v660_v60  ;;  %v662_v62 = vsel %vm559_vm14, %v660_v60, %v658_v59 }
 0x37a   : > { %v663_v63 = vsel %vm568_vm15, %v662_v62, %v655_v47  ;;  %v664_v1 = vsel %vm569_vm0, %v661_v61, %v656_v48  ;;  %v2157_v48 = vld [vmem:[#allocation7 + $0x7] ss:$8 sm:$0xf]  ;;  %vm689_vm15 = vcmp.lt.s32.totalorder %v2002_v18, 17  ;;  %vm743_vm0 = vcmp.lt.s32.totalorder %v2002_v18, 15 }
 0x37b   : > { %665 = vrot.lane.b32.xlu0 %v663_v63, %s2738_s30  ;;  %667 = vrot.lane.b32.xlu1 %v664_v1, %s2738_s30  ;;  %v865_v54 = vperm.slane %v2157_v48, 3 }
 0x3c6   : > { %v575_v6 = vpop.permute.xlu2 %574 }
 0x3de   : > { %v573_v7 = vpop.permute.xlu1 %572 }
 0x3df   : > { %v576_v8 = vsel %vm559_vm14, %v573_v7, %v575_v6  ;;  %v577_v9 = vsel %vm559_vm14, %v575_v6, %v573_v7 }
 0x3e0   : > { %v586_v10 = vsel %vm584_vm2, %v577_v9, %v570_v57  ;;  %v587_v11 = vsel %vm585_vm3, %v576_v8, %v571_v58  ;;  %v2174_v57 = vld [vmem:[#allocation7 + $0x6] ss:$8 sm:$0xf]  ;;  %v808_v9 = vperm.slane %v2153_v45, 2 }
 0x3e1   : > { %588 = vrot.lane.b32.xlu2 %v586_v10, %s1816_s12  ;;  %590 = vrot.lane.b32.xlu0 %v587_v11, %s1816_s12  ;;  %v837_v61 = vperm.slane %v2174_v57, 3  ;;  %v836_v19 = vperm.slane %v2174_v57, 2 }
 0x3ed   : > { %v666_v12 = vpop.permute.xlu0 %665  ;;  %v668_v13 = vpop.permute.xlu1 %667 }
 0x3ee   : > { %v669_v14 = vsel %vm559_vm14, %v666_v12, %v668_v13  ;;  %v670_v15 = vsel %vm559_vm14, %v668_v13, %v666_v12 }
 0x3ef   : > { %v671_v16 = vsel %vm584_vm2, %v670_v15, %v663_v63  ;;  %v672_v17 = vsel %vm585_vm3, %v669_v14, %v664_v1  ;;  %v864_v14 = vperm.slane %v2157_v48, 2 }
 0x3f0   : > { %673 = vrot.lane.b32.xlu1 %v671_v16, %s1816_s12  ;;  %675 = vrot.lane.b32.xlu2 %v672_v17, %s1816_s12 }
 0x43b   : > { %v589_v22 = vpop.permute.xlu2 %588 }
 0x44a   : > { %v676_v27 = vpop.permute.xlu2 %675 }
 0x453   : > { %v591_v23 = vpop.permute.xlu0 %590 }
 0x454   : > { %v593_v24 = vsel %vm491_vm13, %v591_v23, %v589_v22  ;;  %v592_v32 = vsel %vm491_vm13, %v589_v22, %v591_v23 }
 0x455   : > { %v2061_v25 = vsel %vm600_vm5, %v593_v24, %v586_v10  ;;  %v2089_v33 = vsel %vm601_vm6, %v592_v32, %v587_v11  ;;  %v891_v32 = vperm.slane %v2139_v35, 1 }
 0x456   : > { %874 = vrot.lane.b32.xlu0 %v2061_v25, %s1821_s2 }
 0x45e   : > { %790 = vrot.lane.b32.xlu0 %v2061_v25, %s1822_s3 }
 0x462   : > { %v674_v0 = vpop.permute.xlu1 %673 }
 0x463   : > { %v677_v28 = vsel %vm491_vm13, %v674_v0, %v676_v27  ;;  %v678_v29 = vsel %vm491_vm13, %v676_v27, %v674_v0 }
 0x464   : > { %v2071_v30 = vsel %vm600_vm5, %v678_v29, %v671_v16  ;;  %v2073_v31 = vsel %vm601_vm6, %v677_v28, %v672_v17 }
 0x465   : > { %878 = vrot.lane.b32.xlu1 %v2071_v30, %s1821_s2  ;;  %880 = vrot.lane.b32.xlu2 %v2073_v31, %s1821_s2 }
 0x466   : > { %846 = vrot.lane.b32.xlu0 %v2061_v25, %s1823_s24 }
 0x46d   : > { %794 = vrot.lane.b32.xlu1 %v2071_v30, %s1822_s3  ;;  %796 = vrot.lane.b32.xlu2 %v2073_v31, %s1822_s3 }
 0x46e   : > { %818 = vrot.lane.b32.xlu0 %v2061_v25, %s1824_s19 }
 0x475   : > { %850 = vrot.lane.b32.xlu1 %v2071_v30, %s1823_s24  ;;  %852 = vrot.lane.b32.xlu2 %v2073_v31, %s1823_s24 }
 0x476   : > { %710 = vrot.lane.b32.xlu0 %v2089_v33, %s1816_s12 }
 0x47d   : > { %822 = vrot.lane.b32.xlu1 %v2071_v30, %s1824_s19  ;;  %824 = vrot.lane.b32.xlu2 %v2073_v31, %s1824_s19 }
 0x47e   : > { %765 = vrot.lane.b32.xlu0 %v2089_v33, %s2738_s30 }
 0x485   : > { %712 = vrot.lane.b32.xlu1 %v2071_v30, %s1816_s12  ;;  %714 = vrot.lane.b32.xlu2 %v2073_v31, %s1816_s12 }
 0x486   : > { %876 = vrot.lane.b32.xlu0 %v2089_v33, %s1821_s2 }
 0x48d   : > { %767 = vrot.lane.b32.xlu1 %v2071_v30, %s2738_s30  ;;  %769 = vrot.lane.b32.xlu2 %v2073_v31, %s2738_s30 }
 0x48e   : > { %687 = vrot.lane.b32.xlu0 %v2073_v31, %s1825_s22 }
 0x495   : > { %685 = vrot.lane.b32.xlu2 %v2071_v30, %s1825_s22  ;;  %683 = vrot.lane.b32.xlu1 %v2089_v33, %s1825_s22 }
 0x496   : > { %741 = vrot.lane.b32.xlu0 %v2073_v31, %s1826_s27 }
 0x49d   : > { %739 = vrot.lane.b32.xlu2 %v2071_v30, %s1826_s27  ;;  %737 = vrot.lane.b32.xlu1 %v2089_v33, %s1826_s27 }
 0x49e   : > { %820 = vrot.lane.b32.xlu0 %v2089_v33, %s1824_s19 }
 0x4a5   : > { %848 = vrot.lane.b32.xlu2 %v2089_v33, %s1823_s24  ;;  %792 = vrot.lane.b32.xlu1 %v2089_v33, %s1822_s3 }
 0x4a6   : > { %681 = vrot.lane.b32.xlu0 %v2061_v25, %s1825_s22 }
 0x4ad   : > { %763 = vrot.lane.b32.xlu2 %v2061_v25, %s2738_s30  ;;  %708 = vrot.lane.b32.xlu1 %v2061_v25, %s1816_s12  ;;  %s1394_s30 = scalar_lea.sflag [#allocation4], %s1979_s29 }
 0x4b5   : > { %735 = vrot.lane.b32.xlu1 %v2061_v25, %s1826_s27 }
 0x4bf   : > { %v881_v34 = vpop.permute.xlu2 %880 }
 0x4c7   : > { %v797_v40 = vpop.permute.xlu2 %796 }
 0x4c8   : > { %v2143_v37 = vpop.permute.xlu0 %874 }
 0x4c9   : > { %v886_v38 = vsel %vm882_vm7, %v881_v34, %v2143_v37 }
 0x4ca   : > { %v901_v39 = vmul.f32 %v893_v36, %v886_v38 }
 0x4cc   : > { %v979_v41 = vpack.c.bf16 %v901_v39, %v901_v39 }
 0x4ce   : > { %v995_v42 = vsel %vm984_vm8, %v979_v41, 0 }
 0x4cf   : > { %1041 = vmatpush.bf16.msra.mxu3 %v995_v42  ;;  %v853_v44 = vpop.permute.xlu2 %852 }
 0x4d0   : > { %v2151_v43 = vpop.permute.xlu0 %790 }
 0x4d1   : > { %v802_v52 = vsel %vm798_vm9, %v797_v40, %v2151_v43 }
 0x4d2   : > { %v817_v58 = vmul.f32 %v809_v49, %v802_v52 }
 0x4d4   : > { %v934_v1 = vrot.slane %v817_v58, 4  ;;  %v2247_v58 = vld [vmem:[#allocation7] ss:$8 sm:$0xf] }
 0x4d6   : > { %v963_v6 = vsel %vm951_vm12, %v2073_v31, %v934_v1  ;;  %v890_v31 = vperm.slane %v2139_v35, 0 }
 0x4d7   : > { %v879_v47 = vpop.permute.xlu1 %878  ;;  %v825_v62 = vpop.permute.xlu2 %824 }
 0x4d8   : > { %v883_v50 = vsel %vm882_vm7, %v879_v47, %v881_v34  ;;  %v2163_v51 = vpop.permute.xlu0 %846 }
 0x4d9   : > { %v900_v53 = vmul.f32 %v892_v46, %v883_v50  ;;  %v858_v55 = vsel %vm854_vm10, %v853_v44, %v2163_v51 }
 0x4da   : > { %v873_v60 = vmul.f32 %v865_v54, %v858_v55  ;;  %v2241_v55 = vld [vmem:[#allocation7 + $0x1] ss:$8 sm:$0xf] }
 0x4db   : > { %v978_v56 = vpack.c.bf16 %v900_v53, %v900_v53 }
 0x4dc   : > { %v946_v4 = vrot.slane %v873_v60, 4 }
 0x4dd   : > { %v992_v59 = vsel %vm984_vm8, %v978_v56, 0 }
 0x4de   : > { %1028 = vmatpush.bf16.msra.mxu2 %v992_v59  ;;  %v726_v59 = vperm.slane %v2241_v55, 3 }
 0x4df   : > { %v2183_v63 = vpop.permute.xlu1 %794  ;;  %v2203_v13 = vpop.permute.xlu2 %714 }
 0x4e0   : > { %v2185_v2 = vpop.permute.xlu0 %818  ;;  %v799_v11 = vsel %vm798_vm9, %v2183_v63, %v797_v40 }
 0x4e1   : > { %v830_v3 = vsel %vm826_vm11, %v825_v62, %v2185_v2  ;;  %v816_v16 = vmul.f32 %v808_v9, %v799_v11 }
 0x4e2   : > { %v845_v5 = vmul.f32 %v837_v61, %v830_v3  ;;  %v2258_v3 = vld [vmem:[#allocation7 + $0x2] ss:$8 sm:$0xf] }
 0x4e3   : > { %v933_v20 = vrot.slane %v816_v16, 4  ;;  %v2761_v18 = vperm.slane %v2258_v3, 1 }
 0x4e4   : > { %v967_v7 = vsel %vm951_vm12, %v845_v5, %v946_v4  ;;  %v699_v4 = vperm.slane %v2247_v58, 3 }
 0x4e5   : > { %v975_v8 = vpack.c.bf16 %v967_v7, %v963_v6  ;;  %v962_v0 = vsel %vm951_vm12, %v2071_v30, %v933_v20  ;;  %v725_v20 = vperm.slane %v2241_v55, 2 }
 0x4e7   : > { %1042 = vmatpush.bf16.msra.mxu3 %v975_v8  ;;  %v2196_v10 = vpop.permute.xlu1 %850  ;;  %v2223_v27 = vpop.permute.xlu2 %769  ;;  %v754_v8 = vperm.slane %v2258_v3, 3 }
 0x4e8   : > { %v2201_v12 = vpop.permute.xlu0 %710  ;;  %v855_v15 = vsel %vm854_vm10, %v2196_v10, %v853_v44 }
 0x4e9   : > { %v872_v17 = vmul.f32 %v864_v14, %v855_v15 }
 0x4eb   : > { %v945_v24 = vrot.slane %v872_v17, 4 }
 0x4ef   : > { %v2214_v21 = vpop.permute.xlu1 %822  ;;  %v686_v50 = vpop.permute.xlu2 %685 }
 0x4f0   : > { %v827_v22 = vsel %vm826_vm11, %v2214_v21, %v825_v62  ;;  %v2219_v23 = vpop.permute.xlu0 %765 }
 0x4f1   : > { %v844_v26 = vmul.f32 %v836_v19, %v827_v22 }
 0x4f3   : > { %v966_v28 = vsel %vm951_vm12, %v844_v26, %v945_v24 }
 0x4f4   : > { %v974_v29 = vpack.c.bf16 %v966_v28, %v962_v0 }
 0x4f6   : > { %1029 = vmatpush.bf16.msra.mxu2 %v974_v29 }
 0x4f7   : > { %v713_v34 = vpop.permute.xlu1 %712  ;;  %v740_v11 = vpop.permute.xlu2 %739 }
 0x4f8   : > { %v877_v38 = vpop.permute.xlu0 %876  ;;  %v716_v62 = vsel %vm491_vm13, %v713_v34, %v2203_v13  ;;  %v717_v22 = vsel %vm491_vm13, %v2201_v12, %v713_v34 }
 0x4f9   : > { %v884_v39 = vsel %vm882_vm7, %v877_v38, %v879_v47  ;;  %v885_v40 = vsel %vm882_vm7, %v2143_v37, %v877_v38  ;;  %v2243_v47 = vld [vmem:[#allocation7 + $0x3] ss:$8 sm:$0xf]  ;;  %v734_v6 = vmul.f32 %v726_v59, %v716_v62 }
 0x4fa   : > { %v898_v30 = vmul.f32 %v890_v31, %v885_v40  ;;  %v899_v41 = vmul.f32 %v891_v32, %v884_v39  ;;  %v781_v60 = vperm.slane %v2243_v47, 3  ;;  %v780_v24 = vperm.slane %v2243_v47, 2 }
 0x4fb   : > { %v910_v0 = vrot.slane %v734_v6, 4  ;;  %v698_v39 = vperm.slane %v2247_v58, 2 }
 0x4fc   : > { %v976_v42 = vpack.c.bf16 %v898_v30, %v898_v30  ;;  %v977_v44 = vpack.c.bf16 %v899_v41, %v899_v41  ;;  %v733_v41 = vmul.f32 %v725_v20, %v717_v22  ;;  %v1049_v22 = vld [vmem:[%s2731_s5] sm:$0xf] }
 0x4fd   : > { %1052 = vperm.xlu2 %1640, %v1049_v22  }
 0x4fe   : > { %v986_v52 = vsel %vm984_vm8, %v976_v42, 0  ;;  %v989_v53 = vsel %vm984_vm8, %v977_v44, 0 }
 0x4ff   : > { %1002 = vmatpush.bf16.msra.mxu0 %v986_v52  ;;  %1015 = vmatpush.bf16.msra.mxu1 %v989_v53  ;;  %v768_v37 = vpop.permute.xlu1 %767  ;;  %v753_v52 = vperm.slane %v2258_v3, 2  ;;  %v849_v6 = vpop.permute.xlu2 %848 }
 0x500   : > { %v2245_v56 = vpop.permute.xlu0 %687  ;;  %v771_v1 = vsel %vm559_vm14, %v768_v37, %v2223_v27  ;;  %v772_v28 = vsel %vm559_vm14, %v2219_v23, %v768_v37 }
 0x501   : > { %v690_v5 = vsel %vm689_vm15, %v686_v50, %v2245_v56  ;;  %v789_v7 = vmul.f32 %v781_v60, %v771_v1  ;;  %v788_v42 = vmul.f32 %v780_v24, %v772_v28  ;;  %v909_v1 = vrot.slane %v733_v41, 4 }
 0x502   : > { %v707_v16 = vmul.f32 %v699_v4, %v690_v5  ;;  %v835_v41 = vperm.slane %v2174_v57, 1 }
 0x503   : > { %v922_v29 = vrot.slane %v789_v7, 4  ;;  %v921_v5 = vrot.slane %v788_v42, 4  ;;  %v806_v42 = vperm.slane %v2153_v45, 0 }
 0x504   : > { %v955_v40 = vsel %vm951_vm12, %v707_v16, %v910_v0  ;;  %v1059_v16 = vld [vmem:[%s2732_s6] sm:$0xf] }
 0x505   : > { %1062 = vperm.xlu0 %1641, %v1059_v16  }
 0x507   : > { %v2270_v15 = vpop.permute.xlu1 %683 }
 0x508   : > { %v2274_v17 = vpop.permute.xlu0 %741  ;;  %v691_v34 = vsel %vm689_vm15, %v2270_v15, %v686_v50  ;;  %v2307_v50 = vld [vmem:[%s2730_s4] sm:$0x3] }
 0x509   : > { %v744_v26 = vsel %vm743_vm0, %v740_v11, %v2274_v17  ;;  %v706_v53 = vmul.f32 %v698_v39, %v691_v34  ;;  %v857_v34 = vsel %vm854_vm10, %v2163_v51, %v849_v6 }
 0x50a   : > { %v762_v38 = vmul.f32 %v754_v8, %v744_v26  ;;  %v863_v26 = vperm.slane %v2157_v48, 1 }
 0x50b   : > { %v954_v28 = vsel %vm951_vm12, %v706_v53, %v909_v1 }
 0x50c   : > { %v959_v30 = vsel %vm951_vm12, %v762_v38, %v922_v29  ;;  %v856_v38 = vsel %vm854_vm10, %v849_v6, %v2196_v10 }
 0x50d   : > { %v971_v44 = vpack.c.bf16 %v959_v30, %v955_v40  ;;  %v834_v30 = vperm.slane %v2174_v57, 0 }
 0x50f   : > { %1043 = vmatpush.bf16.msra.mxu3 %v971_v44  ;;  %v2302_v37 = vpop.permute.xlu1 %737  ;;  %v807_v44 = vperm.slane %v2153_v45, 1 }
 0x510   : > { %v745_v62 = vsel %vm743_vm0, %v2302_v37, %v740_v11  ;;  %v862_v11 = vperm.slane %v2157_v48, 0  ;;  %v821_v0 = vpop.permute.xlu0 %820 }
 0x511   : > { %v761_v7 = vmul.f32 %v753_v52, %v745_v62  ;;  %v828_v53 = vsel %vm826_vm11, %v821_v0, %v2214_v21  ;;  %v829_v10 = vsel %vm826_vm11, %v2185_v2, %v821_v0  ;;  %v871_v62 = vmul.f32 %v863_v26, %v856_v38 }
 0x512   : > { %1534 = vmatmul.msk.bf16.vlgmr.msra.gmra.mxu3 %vm980_vm1, %v2307_v50  ;;  %v870_v51 = vmul.f32 %v862_v11, %v857_v34  ;;  %v842_v6 = vmul.f32 %v834_v30, %v829_v10  ;;  %v843_v2 = vmul.f32 %v835_v41, %v828_v53 }
 0x513   : > { %v958_v29 = vsel %vm951_vm12, %v761_v7, %v921_v5  ;;  %v944_v22 = vrot.slane %v871_v62, 4 }
 0x514   : > { %v970_v40 = vpack.c.bf16 %v958_v29, %v954_v28 }
 0x515   : > { %v965_v34 = vsel %vm951_vm12, %v843_v2, %v944_v22  ;;  %v2744_v22 = vperm.slane %v2247_v58, 0 }
 0x516   : > { %1030 = vmatpush.bf16.msra.mxu2 %v970_v40  ;;  %v764_v40 = vpop.permute.xlu2 %763 }
 0x517   : > { %v793_v1 = vpop.permute.xlu1 %792  ;;  %v774_v2 = vsel %vm559_vm14, %v2223_v27, %v764_v40  ;;  %v2740_v27 = vperm.slane %v2258_v3, 1 }
 0x518   : > { %v800_v5 = vsel %vm798_vm9, %v793_v1, %v2183_v63  ;;  %v801_v21 = vsel %vm798_vm9, %v2151_v43, %v793_v1  ;;  %v943_v63 = vrot.slane %v870_v51, 4  ;;  %v723_v1 = vperm.slane %v2241_v55, 0 }
 0x519   : > { %v814_v7 = vmul.f32 %v806_v42, %v801_v21  ;;  %v815_v16 = vmul.f32 %v807_v44, %v800_v5  ;;  %1533 = vmatmul.msk.bf16.vlgmr.msra.gmra.mxu2 %vm980_vm1, %v2307_v50  ;;  %v724_v51 = vperm.slane %v2241_v55, 1  ;;  %v2743_v5 = vperm.slane %v2243_v47, 0 }
 0x51a   : > { %v964_v29 = vsel %vm951_vm12, %v842_v6, %v943_v63  ;;  %v2742_v21 = vperm.slane %v2243_v47, 1  ;;  %v773_v6 = vsel %vm559_vm14, %v764_v40, %v2219_v23  ;;  %v697_v23 = vperm.slane %v2247_v58, 1 }
 0x51b   : > { %v931_v0 = vrot.slane %v814_v7, 4  ;;  %v932_v28 = vrot.slane %v815_v16, 4  ;;  %v682_v7 = vpop.permute.xlu0 %681 }
 0x51c   : > { %v787_v63 = vmul.f32 %v2742_v21, %v773_v6 }
 0x51d   : > { %v960_v43 = vsel %vm951_vm12, %v2061_v25, %v931_v0  ;;  %v961_v38 = vsel %vm951_vm12, %v2089_v33, %v932_v28  ;;  %v2741_v0 = vperm.slane %v2258_v3, 0  ;;  %v692_v28 = vsel %vm689_vm15, %v682_v7, %v2270_v15 }
 0x51e   : > { %v972_v53 = vpack.c.bf16 %v964_v29, %v960_v43  ;;  %v973_v10 = vpack.c.bf16 %v965_v34, %v961_v38  ;;  %v693_v43 = vsel %vm689_vm15, %v2245_v56, %v682_v7  ;;  %v705_v56 = vmul.f32 %v697_v23, %v692_v28 }
 0x51f   : > { %v709_v62 = vpop.permute.xlu1 %708  ;;  %v704_v15 = vmul.f32 %v2744_v22, %v693_v43 }
 0x520   : > { %v718_v25 = vsel %vm491_vm13, %v709_v62, %v2201_v12  ;;  %v719_v33 = vsel %vm491_vm13, %v2203_v13, %v709_v62  ;;  %1003 = vmatpush.bf16.msra.mxu0 %v972_v53  ;;  %1016 = vmatpush.bf16.msra.mxu1 %v973_v10  ;;  %v786_v13 = vmul.f32 %v2743_v5, %v774_v2  ;;  %v920_v53 = vrot.slane %v787_v63, 4 }
 0x521   : > { %v731_v16 = vmul.f32 %v723_v1, %v719_v33  ;;  %v732_v12 = vmul.f32 %v724_v51, %v718_v25 }
 0x522   : > { %v919_v40 = vrot.slane %v786_v13, 4  ;;  %v1535_v13 = vld [vmem:[%s1983_s15 + $0x8] sm:$0xff] }
 0x523   : > { %v907_v29 = vrot.slane %v731_v16, 4  ;;  %v908_v38 = vrot.slane %v732_v12, 4  ;;  %v1073_v12 = vld [vmem:[%s1983_s15] sm:$0xff]  ;;  %s2756_s15 = smov 1  }
 0x524   : > { %1077 = vst [vmem:[#allocation1] ss:$2 sm:$0xff] %v1073_v12 }
 0x525   : > { %v953_v2 = vsel %vm951_vm12, %v705_v56, %v908_v38 }
 0x527   : > { %v736_v34 = vpop.permute.xlu1 %735 }
 0x528   : > { %v746_v10 = vsel %vm743_vm0, %v736_v34, %v2302_v37  ;;  %v747_v62 = vsel %vm743_vm0, %v2274_v17, %v736_v34  ;;  %v952_v37 = vsel %vm951_vm12, %v704_v15, %v907_v29 }
 0x529   : > { %v759_v25 = vmul.f32 %v2741_v0, %v747_v62  ;;  %v760_v33 = vmul.f32 %v2740_v27, %v746_v10 }
 0x52b   : > { %v956_v6 = vsel %vm951_vm12, %v759_v25, %v919_v40  ;;  %v957_v17 = vsel %vm951_vm12, %v760_v33, %v920_v53  ;;  %v1078_v63 = vld.sshfl [vmem:[#allocation1] sm:$0xff pattern:$0x75316420]  ;;  %v1079_v28 = vld.sshfl [vmem:[#allocation1 + $0x8] sm:$0xff pattern:$0x75316420] }
 0x52c   : > { %v968_v7 = vpack.c.bf16 %v956_v6, %v952_v37  ;;  %v969_v16 = vpack.c.bf16 %v957_v17, %v953_v2  ;;  %1083 = vst [vmem:[#allocation1] ss:$2 sm:$0xff] %v1535_v13 }
 0x52e   : > { %1004 = vmatpush.bf16.msra.mxu0 %v968_v7  ;;  %1017 = vmatpush.bf16.msra.mxu1 %v969_v16 }
 0x531   : > { %1531 = vmatmul.msk.bf16.vlgmr.msra.gmra.mxu0 %vm980_vm1, %v2307_v50  ;;  %1532 = vmatmul.msk.bf16.vlgmr.msra.gmra.mxu1 %vm980_vm1, %v2307_v50 }
 0x557   : > { %v1053_v40 = vpop.permute.xlu2 %1052 }
 0x577   : > { %v1063_v53 = vpop.permute.xlu0 %1062 }
 0x595   : > { %v1045_v43 = vpop.f32.mrf.mxu3 }
 0x596   : > { %v1058_v16 = vmul.f32 %v1053_v40, %v1045_v43 }
 0x598   : > { %v1068_v12 = vadd.f32 %v1063_v53, %v1058_v16 }
 0x59a   : > { %v1072_v13 = vmax.f32 %v1068_v12, 0.0 }
 0x59c   : > { %v1032_v29 = vpop.f32.mrf.mxu2 }
 0x59d   : > { %v1047_v38 = vpop.f32.mrf.mxu3  ;;  %v1057_v43 = vmul.f32 %v1053_v40, %v1032_v29  ;;  %v1374_v29 = vld [vmem:[%s2735_s9] sm:$0xff] }
 0x59f   : > { %v1067_v38 = vadd.f32 %v1063_v53, %v1057_v43 }
 0x5a4   : > { %v1034_v34 = vpop.f32.mrf.mxu2 }
 0x5a5   : > { %v1071_v34 = vmax.f32 %v1067_v38, 0.0 }
 0x5ae   : > { %v1006_v10 = vpop.f32.mrf.mxu0  ;;  %v1019_v62 = vpop.f32.mrf.mxu1 }
 0x5af   : > { %v1055_v15 = vmul.f32 %v1053_v40, %v1006_v10  ;;  %v1056_v56 = vmul.f32 %v1053_v40, %v1019_v62  ;;  %v1084_v10 = vld.sshfl [vmem:[#allocation1] sm:$0xff pattern:$0x75316420] }
 0x5b0   : > { %v2456_v62 = vadd.f32 %v1084_v10, %v1071_v34 }
 0x5b1   : > { %v1065_v25 = vadd.f32 %v1063_v53, %v1055_v15  ;;  %v1066_v33 = vadd.f32 %v1063_v53, %v1056_v56 }
 0x5b3   : > { %v1069_v37 = vmax.f32 %v1065_v25, 0.0  ;;  %v1070_v50 = vmax.f32 %v1066_v33, 0.0 }
 0x5b5   : > { %v2426_v6 = vadd.f32 %v1078_v63, %v1069_v37  ;;  %v2428_v2 = vadd.f32 %v1079_v28, %v1070_v50  ;;  %v1085_v63 = vld.sshfl [vmem:[#allocation1 + $0x8] sm:$0xff pattern:$0x75316420] }
 0x5b6   : > { %v1008_v17 = vpop.f32.mrf.mxu0  ;;  %v1021_v7 = vpop.f32.mrf.mxu1  ;;  %v2442_v28 = vadd.f32 %v1085_v63, %v1072_v13 }
 0x5b7   : > { %1094 = vrot.lane.b32.xlu0 %v2428_v2, %s1825_s22  ;;  %1156 = vrot.lane.b32.xlu2 %v2426_v6, %s1822_s3 }
 0x5b8   : > { %1204 = vrot.lane.b32.xlu1 %v2426_v6, %s1821_s2 }
 0x5bf   : > { %1126 = vrot.lane.b32.xlu0 %v2428_v2, %s1826_s27  ;;  %1188 = vrot.lane.b32.xlu2 %v2426_v6, %s1823_s24 }
 0x5c0   : > { %1190 = vrot.lane.b32.xlu1 %v2428_v2, %s1823_s24 }
 0x5c7   : > { %1158 = vrot.lane.b32.xlu0 %v2428_v2, %s1822_s3  ;;  %1172 = vrot.lane.b32.xlu2 %v2426_v6, %s1824_s19 }
 0x5c8   : > { %1210 = vrot.lane.b32.xlu1 %v2442_v28, %s1821_s2 }
 0x5cf   : > { %1108 = vrot.lane.b32.xlu0 %v2426_v6, %s1816_s12  ;;  %1110 = vrot.lane.b32.xlu2 %v2428_v2, %s1816_s12 }
 0x5d0   : > { %1162 = vrot.lane.b32.xlu1 %v2442_v28, %s1822_s3 }
 0x5d7   : > { %1160 = vrot.lane.b32.xlu0 %v2456_v62, %s1822_s3  ;;  %1142 = vrot.lane.b32.xlu2 %v2428_v2, %s2756_s15 }
 0x5d8   : > { %1194 = vrot.lane.b32.xlu1 %v2442_v28, %s1823_s24 }
 0x5df   : > { %1192 = vrot.lane.b32.xlu0 %v2456_v62, %s1823_s24  ;;  %1206 = vrot.lane.b32.xlu2 %v2428_v2, %s1821_s2 }
 0x5e0   : > { %1178 = vrot.lane.b32.xlu1 %v2442_v28, %s1824_s19 }
 0x5e7   : > { %1176 = vrot.lane.b32.xlu0 %v2456_v62, %s1824_s19  ;;  %1174 = vrot.lane.b32.xlu2 %v2428_v2, %s1824_s19 }
 0x5e8   : > { %1114 = vrot.lane.b32.xlu1 %v2442_v28, %s1816_s12 }
 0x5ef   : > { %1112 = vrot.lane.b32.xlu0 %v2456_v62, %s1816_s12  ;;  %1208 = vrot.lane.b32.xlu2 %v2456_v62, %s1821_s2  ;;  %s1747_s2 = sshra.s32 %s1410_s17, 4  ;;  %s1748_s2 = int_to_ptr.hbm [resolvable:$true] %s1747_s2 }
 0x5f0   : > { %1146 = vrot.lane.b32.xlu1 %v2442_v28, %s2756_s15  ;;  %s1749_s3 = scalar_lea.hbm %s1748_s2, 32  ;;  %p1754_p9 = scmp.lt.s32.totalorder %s1748_s2, %s2736_s10 }
 0x5f1   : > { %p1750_p1 = scmp.ne.s32.totalorder %s1748_s2, %s1749_s3 }
 0x5f3   : > { %p1751_p4 = pnand %p1750_p1, %p1952_p5 }
 0x5f5   : > { %p1752_p11 = pneg %p1751_p4 }
 0x5f7   : > { %1144 = vrot.lane.b32.xlu0 %v2456_v62, %s2756_s15  ;;  %1098 = vrot.lane.b32.xlu2 %v2442_v28, %s1825_s22 }
 0x5f8   : > { %1096 = vrot.lane.b32.xlu1 %v2456_v62, %s1825_s22 }
 0x5ff   : > { %1124 = vrot.lane.b32.xlu0 %v2426_v6, %s1826_s27  ;;  %1130 = vrot.lane.b32.xlu2 %v2442_v28, %s1826_s27 }
 0x600   : > { %1128 = vrot.lane.b32.xlu1 %v2456_v62, %s1826_s27  ;;  %s1527_s27 = sshll.u32 %s1979_s29, 5 }
 0x601   : > { %s429_s21 = scalar_lea.vmem [#allocation8], %s1527_s27 }
 0x607   : > { %1092 = vrot.lane.b32.xlu2 %v2426_v6, %s1825_s22  ;;  %s1753_s22 = scalar_lea.hbm %s2736_s10, 64 }
 0x608   : > { %1140 = vrot.lane.b32.xlu1 %v2426_v6, %s2756_s15  ;;  %s1407_s15 = sshll.u32 %s429_s21, 4  ;;  %p1755_p2 = scmp.lt.s32.totalorder %s1753_s22, %s1749_s3  ;;  %s1408_s15 = int_to_ptr.vmem [resolvable:$true] %s1407_s15 }
 0x60a   : > { %p1756_p10 = por %p1755_p2, %p1754_p9 }
 0x60c   : > { %p1757_p12 = pnand %p1756_p10, %p1752_p11 }
 0x60f   : > { %1377 = vperm.xlu2 %1640, %v1374_v29  }
 0x611   : > { %v1157_v40 = vpop.permute.xlu2 %1156 }
 0x619   : > { %v1189_v53 = vpop.permute.xlu2 %1188 }
 0x621   : > { %v1173_v15 = vpop.permute.xlu2 %1172 }
 0x629   : > { %v2501_v56 = vpop.permute.xlu0 %1094  ;;  %v2503_v25 = vpop.permute.xlu2 %1110 }
 0x62a   : > { %v1205_v33 = vpop.permute.xlu1 %1204 }
 0x631   : > { %v2505_v37 = vpop.permute.xlu0 %1126  ;;  %v2507_v50 = vpop.permute.xlu2 %1142 }
 0x632   : > { %v1191_v17 = vpop.permute.xlu1 %1190 }
 0x633   : > { %v1198_v34 = vsel %vm854_vm10, %v1189_v53, %v1191_v17 }
 0x634   : > { %v1200_v21 = vmul.f32 %v1198_v34, %v862_v11 }
 0x639   : > { %v1159_v7 = vpop.permute.xlu0 %1158  ;;  %v1207_v16 = vpop.permute.xlu2 %1206 }
 0x63a   : > { %v1166_v12 = vsel %vm798_vm9, %v1157_v40, %v1159_v7  ;;  %v1214_v13 = vsel %vm882_vm7, %v1205_v33, %v1207_v16  ;;  %v1211_v63 = vpop.permute.xlu1 %1210 }
 0x63b   : > { %v1216_v43 = vmul.f32 %v1214_v13, %v890_v31  ;;  %v1215_v38 = vsel %vm882_vm7, %v1211_v63, %v1205_v33  ;;  %v1168_v29 = vmul.f32 %v1166_v12, %v806_v42  ;;  %v1261_v42 = vrot.slane %v1200_v21, 4 }
 0x63c   : > { %v1219_v10 = vmul.f32 %v1215_v38, %v893_v36 }
 0x63d   : > { %v1293_v27 = vpack.c.bf16 %v1216_v43, %v1216_v43  ;;  %v1249_v33 = vrot.slane %v1168_v29, 4 }
 0x63e   : > { %v1296_v0 = vpack.c.bf16 %v1219_v10, %v1219_v10 }
 0x63f   : > { %v1301_v5 = vsel %vm984_vm8, %v1293_v27, 0  ;;  %v1277_v11 = vsel %vm951_vm12, %v2426_v6, %v1249_v33 }
 0x640   : > { %1317 = vmatpush.bf16.msrb.mxu0 %v1301_v5  ;;  %v1310_v31 = vsel %vm984_vm8, %v1296_v0, 0 }
 0x641   : > { %1356 = vmatpush.bf16.msrb.mxu3 %v1310_v31  ;;  %v2527_v13 = vpop.permute.xlu0 %1108  ;;  %v1175_v22 = vpop.permute.xlu2 %1174 }
 0x642   : > { %v1182_v36 = vsel %vm826_vm11, %v1173_v15, %v1175_v22  ;;  %v1163_v38 = vpop.permute.xlu1 %1162 }
 0x643   : > { %v1184_v12 = vmul.f32 %v1182_v36, %v834_v30  ;;  %v1167_v21 = vsel %vm798_vm9, %v1163_v38, %v1157_v40 }
 0x645   : > { %v1281_v5 = vsel %vm951_vm12, %v1184_v12, %v1261_v42 }
 0x646   : > { %v1289_v27 = vpack.c.bf16 %v1281_v5, %v1277_v11 }
 0x648   : > { %1318 = vmatpush.bf16.msrb.mxu0 %v1289_v27 }
 0x649   : > { %v1161_v0 = vpop.permute.xlu0 %1160  ;;  %v1209_v43 = vpop.permute.xlu2 %1208 }
 0x64a   : > { %v1212_v34 = vsel %vm882_vm7, %v1209_v43, %v1211_v63  ;;  %v1213_v10 = vsel %vm882_vm7, %v1207_v16, %v1209_v43  ;;  %v1195_v29 = vpop.permute.xlu1 %1194  ;;  %v1171_v63 = vmul.f32 %v1167_v21, %v809_v49  ;;  %v1165_v49 = vsel %vm798_vm9, %v1159_v7, %v1161_v0 }
 0x64b   : > { %v1217_v30 = vmul.f32 %v1213_v10, %v891_v32  ;;  %v1218_v6 = vmul.f32 %v1212_v34, %v892_v46  ;;  %v1199_v31 = vsel %vm854_vm10, %v1195_v29, %v1189_v53  ;;  %v1164_v53 = vsel %vm798_vm9, %v1161_v0, %v1163_v38 }
 0x64c   : > { %v1203_v42 = vmul.f32 %v1199_v31, %v865_v54  ;;  %v1252_v46 = vrot.slane %v1171_v63, 4  ;;  %v1169_v38 = vmul.f32 %v1165_v49, %v807_v44  ;;  %v1170_v7 = vmul.f32 %v1164_v53, %v808_v9 }
 0x64d   : > { %v1294_v33 = vpack.c.bf16 %v1217_v30, %v1217_v30  ;;  %v1295_v36 = vpack.c.bf16 %v1218_v6, %v1218_v6 }
 0x64e   : > { %v1264_v5 = vrot.slane %v1203_v42, 4  ;;  %v1280_v0 = vsel %vm951_vm12, %v2442_v28, %v1252_v46 }
 0x64f   : > { %v1304_v16 = vsel %vm984_vm8, %v1294_v33, 0  ;;  %v1307_v40 = vsel %vm984_vm8, %v1295_v36, 0 }
 0x650   : > { %1330 = vmatpush.bf16.msrb.mxu1 %v1304_v16  ;;  %1343 = vmatpush.bf16.msrb.mxu2 %v1307_v40 }
 0x651   : > { %v1193_v32 = vpop.permute.xlu0 %1192  ;;  %v2554_v35 = vpop.permute.xlu2 %1098 }
 0x652   : > { %v1179_v12 = vpop.permute.xlu1 %1178  ;;  %v1196_v54 = vsel %vm854_vm10, %v1193_v32, %v1195_v29  ;;  %v1197_v27 = vsel %vm854_vm10, %v1191_v17, %v1193_v32  ;;  %v1250_v29 = vrot.slane %v1169_v38, 4 }
 0x653   : > { %v1183_v11 = vsel %vm826_vm11, %v1179_v12, %v1173_v15  ;;  %v1201_v34 = vmul.f32 %v1197_v27, %v863_v26  ;;  %v1202_v17 = vmul.f32 %v1196_v54, %v864_v14  ;;  %v1118_v26 = vsel %vm491_vm13, %v2527_v13, %v2503_v25 }
 0x654   : > { %v1187_v43 = vmul.f32 %v1183_v11, %v837_v61  ;;  %v1251_v61 = vrot.slane %v1170_v7, 4  ;;  %v1278_v31 = vsel %vm951_vm12, %v2428_v2, %v1250_v29  ;;  %v1121_v57 = vmul.f32 %v1118_v26, %v724_v51  ;;  %v1364_v51 = vld [vmem:[%s2734_s8] sm:$0xff] }
 0x655   : > { %v1262_v30 = vrot.slane %v1201_v34, 4  ;;  %v1263_v6 = vrot.slane %v1202_v17, 4  ;;  %1367 = vperm.xlu1 %1642, %v1364_v51   ;;  %v2758_v26 = vperm.slane %v2243_v47, 0 }
 0x656   : > { %v1284_v15 = vsel %vm951_vm12, %v1187_v43, %v1264_v5  ;;  %v1226_v40 = vrot.slane %v1121_v57, 4 }
 0x657   : > { %v1292_v10 = vpack.c.bf16 %v1284_v15, %v1280_v0 }
 0x659   : > { %1357 = vmatpush.bf16.msrb.mxu3 %v1292_v10  ;;  %v1177_v21 = vpop.permute.xlu0 %1176  ;;  %v2579_v44 = vpop.permute.xlu2 %1130 }
 0x65a   : > { %v1180_v45 = vsel %vm826_vm11, %v1177_v21, %v1179_v12  ;;  %v1181_v9 = vsel %vm826_vm11, %v1175_v22, %v1177_v21  ;;  %v1115_v28 = vpop.permute.xlu1 %1114  ;;  %v1279_v22 = vsel %vm951_vm12, %v2456_v62, %v1251_v61 }
 0x65b   : > { %v1185_v48 = vmul.f32 %v1181_v9, %v835_v41  ;;  %v1186_v14 = vmul.f32 %v1180_v45, %v836_v19 }
 0x65d   : > { %v1282_v33 = vsel %vm951_vm12, %v1185_v48, %v1262_v30  ;;  %v1283_v63 = vsel %vm951_vm12, %v1186_v14, %v1263_v6  ;;  %v2757_v48 = vperm.slane %v2247_v58, 0 }
 0x65e   : > { %v1290_v36 = vpack.c.bf16 %v1282_v33, %v1278_v31  ;;  %v1291_v41 = vpack.c.bf16 %v1283_v63, %v1279_v22  ;;  %v2759_v33 = vperm.slane %v2243_v47, 1  ;;  %v2760_v22 = vperm.slane %v2258_v3, 0 }
 0x660   : > { %1331 = vmatpush.bf16.msrb.mxu1 %v1290_v36  ;;  %1344 = vmatpush.bf16.msrb.mxu2 %v1291_v41 }
 0x661   : > { %v1113_v19 = vpop.permute.xlu0 %1112  ;;  %v1093_v16 = vpop.permute.xlu2 %1092 }
 0x662   : > { %v1102_v2 = vsel %vm689_vm15, %v1093_v16, %v2501_v56  ;;  %v1147_v42 = vpop.permute.xlu1 %1146  ;;  %v1117_v32 = vsel %vm491_vm13, %v2503_v25, %v1113_v19  ;;  %v1116_v11 = vsel %vm491_vm13, %v1113_v19, %v1115_v28 }
 0x663   : > { %v1105_v62 = vmul.f32 %v1102_v2, %v697_v23  ;;  %v1122_v53 = vmul.f32 %v1117_v32, %v725_v20  ;;  %v1123_v43 = vmul.f32 %v1116_v11, %v726_v59 }
 0x665   : > { %v1270_v46 = vsel %vm951_vm12, %v1105_v62, %v1226_v40  ;;  %v1227_v25 = vrot.slane %v1122_v53, 4  ;;  %v1228_v15 = vrot.slane %v1123_v43, 4 }
 0x669   : > { %v1145_v49 = vpop.permute.xlu0 %1144  ;;  %v1378_v32 = vpop.permute.xlu2 %1377 }
 0x66a   : > { %v1097_v12 = vpop.permute.xlu1 %1096  ;;  %v1148_v54 = vsel %vm559_vm14, %v1145_v49, %v1147_v42  ;;  %v1149_v20 = vsel %vm559_vm14, %v2507_v50, %v1145_v49 }
 0x66b   : > { %v1101_v23 = vsel %vm689_vm15, %v2501_v56, %v1097_v12  ;;  %v1100_v56 = vsel %vm689_vm15, %v1097_v12, %v2554_v35  ;;  %v1154_v38 = vmul.f32 %v1149_v20, %v780_v24 }
 0x66c   : > { %v1106_v5 = vmul.f32 %v1101_v23, %v698_v39  ;;  %v1155_v39 = vmul.f32 %v1148_v54, %v781_v60  ;;  %v1107_v7 = vmul.f32 %v1100_v56, %v699_v4  ;;  %v1119_v4 = vsel %vm491_vm13, %v1115_v28, %v2527_v13 }
 0x66d   : > { %v1239_v17 = vrot.slane %v1154_v38, 4  ;;  %v1120_v6 = vmul.f32 %v1119_v4, %v723_v1 }
 0x66e   : > { %v1271_v27 = vsel %vm951_vm12, %v1106_v5, %v1227_v25  ;;  %v1240_v10 = vrot.slane %v1155_v39, 4  ;;  %v1272_v61 = vsel %vm951_vm12, %v1107_v7, %v1228_v15 }
 0x671   : > { %v1125_v30 = vpop.permute.xlu0 %1124 }
 0x672   : > { %v1129_v0 = vpop.permute.xlu1 %1128  ;;  %v1134_v28 = vsel %vm743_vm0, %v1125_v30, %v2505_v37  ;;  %v1135_v55 = vsel %vm743_vm0, %v2579_v44, %v1125_v30 }
 0x673   : > { %v1132_v34 = vsel %vm743_vm0, %v1129_v0, %v2579_v44  ;;  %v1133_v59 = vsel %vm743_vm0, %v2505_v37, %v1129_v0  ;;  %v1225_v44 = vrot.slane %v1120_v6, 4  ;;  %v1137_v63 = vmul.f32 %v1134_v28, %v2761_v18 }
 0x674   : > { %v1138_v24 = vmul.f32 %v1133_v59, %v753_v52  ;;  %v1139_v60 = vmul.f32 %v1132_v34, %v754_v8  ;;  %v1103_v8 = vsel %vm689_vm15, %v2554_v35, %v1093_v16  ;;  %v1220_v52 = vld [vmem:[%s2733_s7] sm:$0xf] }
 0x675   : > { %v1104_v14 = vmul.f32 %v1103_v8, %v2757_v48 }
 0x676   : > { %v1275_v29 = vsel %vm951_vm12, %v1138_v24, %v1239_v17  ;;  %v1276_v21 = vsel %vm951_vm12, %v1139_v60, %v1240_v10 }
 0x677   : > { %v1287_v45 = vpack.c.bf16 %v1275_v29, %v1271_v27  ;;  %v1288_v9 = vpack.c.bf16 %v1276_v21, %v1272_v61  ;;  %v1269_v41 = vsel %vm951_vm12, %v1104_v14, %v1225_v44 }
 0x679   : > { %1345 = vmatpush.bf16.msrb.mxu2 %v1287_v45  ;;  %1358 = vmatpush.bf16.msrb.mxu3 %v1288_v9 }
 0x67a   : > { %v1141_v13 = vpop.permute.xlu1 %1140 }
 0x67b   : > { %v1150_v1 = vsel %vm559_vm14, %v1141_v13, %v2507_v50  ;;  %v1151_v35 = vsel %vm559_vm14, %v1147_v42, %v1141_v13  ;;  %v1136_v50 = vmul.f32 %v1135_v55, %v2760_v22 }
 0x67c   : > { %v1152_v31 = vmul.f32 %v1151_v35, %v2758_v26  ;;  %v1153_v37 = vmul.f32 %v1150_v1, %v2759_v33  ;;  %1538 = vmatmul.msk.bf16.vlgmr.msrb.gmra.mxu2 %vm980_vm1, %v1220_v52  ;;  %1539 = vmatmul.msk.bf16.vlgmr.msrb.gmra.mxu3 %vm980_vm1, %v1220_v52 }
 0x67e   : > { %v1237_v58 = vrot.slane %v1152_v31, 4  ;;  %v1238_v36 = vrot.slane %v1153_v37, 4 }
 0x680   : > { %v1273_v47 = vsel %vm951_vm12, %v1136_v50, %v1237_v58  ;;  %v1274_v57 = vsel %vm951_vm12, %v1137_v63, %v1238_v36 }
 0x681   : > { %v1285_v19 = vpack.c.bf16 %v1273_v47, %v1269_v41  ;;  %v1286_v16 = vpack.c.bf16 %v1274_v57, %v1270_v46 }
 0x683   : > { %1319 = vmatpush.bf16.msrb.mxu0 %v1285_v19  ;;  %1332 = vmatpush.bf16.msrb.mxu1 %v1286_v16 }
 0x686   : > { %1536 = vmatmul.msk.bf16.vlgmr.msrb.gmra.mxu0 %vm980_vm1, %v1220_v52  ;;  %1537 = vmatmul.msk.bf16.vlgmr.msrb.gmra.mxu1 %vm980_vm1, %v1220_v52 }
 0x6c7   : > { %v1368_v3 = vpop.permute.xlu1 %1367 }
 0x6ff   : > { %v1347_v2 = vpop.f32.mrf.mxu2  ;;  %v1360_v42 = vpop.f32.mrf.mxu3 }
 0x700   : > { %v1372_v40 = vmul.f32 %v1368_v3, %v1347_v2  ;;  %v1373_v62 = vmul.f32 %v1368_v3, %v1360_v42 }
 0x702   : > { %v1382_v51 = vadd.f32 %v1378_v32, %v1372_v40  ;;  %v1383_v53 = vadd.f32 %v1378_v32, %v1373_v62 }
 0x703   : > { %v1321_v49 = vpop.f32.mrf.mxu0  ;;  %v1334_v12 = vpop.f32.mrf.mxu1 }
 0x704   : > { %v1386_v46 = vmax.f32 %v1382_v51, 0.0  ;;  %v1387_v23 = vmax.f32 %v1383_v53, 0.0  ;;  %v1370_v11 = vmul.f32 %v1368_v3, %v1321_v49  ;;  %v1371_v25 = vmul.f32 %v1368_v3, %v1334_v12 }
 0x706   : > { %1540 = vst [vmem:[%s429_s21 + $0x10] sm:$0xff] %v1386_v46  ;;  %v1380_v5 = vadd.f32 %v1378_v32, %v1370_v11  ;;  %v1381_v54 = vadd.f32 %v1378_v32, %v1371_v25 }
 0x707   : > { %1541 = vst [vmem:[%s429_s21 + $0x18] sm:$0xff] %v1387_v23  ;;  %v1349_v20 = vpop.f32.mrf.mxu2  ;;  %v1362_v27 = vpop.f32.mrf.mxu3 }
 0x708   : > { %v1384_v43 = vmax.f32 %v1380_v5, 0.0  ;;  %v1385_v56 = vmax.f32 %v1381_v54, 0.0 }
 0x70a   : > { %1388 = vst [vmem:[%s429_s21] sm:$0xff] %v1384_v43 }
 0x70b   : > { %1389 = vst [vmem:[%s429_s21 + $0x8] sm:$0xff] %v1385_v56  ;;  %v1323_v38 = vpop.f32.mrf.mxu0  ;;  %v1336_v39 = vpop.f32.mrf.mxu1 }
 0x70c   : > { %1760 = shalt.err (!%p1757_p12)
}
 0x70d   : > { %s1827_s29 = smov 256  }
 0x70e   : > { %1562 = dma.vmem_to_hbm [thread:$0]  (%p1952_p5), %s1408_s15, 512, %s1410_s17, %s1394_s30, %s1827_s29, %s1827_s29, %s1816_s12  }
 0x70f PF: > { %s1424_s11 = sand.u32 1, %s1791_s13   ;;  %p2762_p13 = scmp.ge.s32.totalorder %s1803_s16, 2 }
 0x710   : > { %s1425_s18 = scalar_lea.sflag [#allocation4], %s1424_s11 }
 0x711   : > { %p1576_p0 = pnand %p2762_p13, %p1918_p6 }
 0x713   : > { %p1577_p3 = pneg %p1576_p0 }
 0x715   : > { %1786 = dma.done.wait (%p1577_p3), %s1425_s18, 512  }
 0x716   : > { %1788 = vsyncadd (%p1577_p3), %s1425_s18, 4294966784  ;;  %s2763_s26 = sld [smem:[#allocation12_spill]]  ;;  %p24_p7 = scmp.ge.s32.totalorder %s1939_s25, 4  }
 0x717   : > { %s2764_s15 = sld [smem:[#allocation13_spill]]  ;;  %s2765_s13 = smov %s1795_s14 }
 0x718   : > { %s2767_s16 = smov %s1939_s25  ;;  %26 = sbr.rel (!%p24_p7) target bundleno = 9 (0x9), region = 135 }
 0x71c   : > { %s2766_s14 = smov %s2763_s26 }
 0x71d   :  { %1431 = vsyncpa [#allocation3], 1 }
 0x71e   :  { %1433 = vsyncpa [#allocation3 + $0x1], 1 }
 0x71f   :  { %1434 = vsyncpa [#allocation6], 1 }
 0x720   :  { %1435 = vsyncpa [#allocation4], 1 }
 0x721   :  { %1437 = vsyncpa [#allocation4 + $0x1], 1 }

</bundles_post_ra>
